<compile_context>
chip_gen: v7x
topology: tpu7x:2x2x1
jax: 0.10.0
libtpu: 0.0.40
codegen_flags: <defaults>
</compile_context>

<pallas_src>
import functools

import jax
import jax.numpy as jnp
from jax.experimental import pallas as pl
from jax.experimental.pallas import tpu as pltpu

ENC_DIMS = [1000, 512, 256, 128, 64]
DEC_DIMS = [64, 128, 256, 512, 1000]
_LANE = 128
_SUBLANE_BF16 = 16   # bf16 packs 16 rows per sublane group -> min batch granule

_ALL_DIMS = list(zip(ENC_DIMS[:-1], ENC_DIMS[1:])) + list(zip(DEC_DIMS[:-1], DEC_DIMS[1:]))


def _round_up(n, m):
    return ((n + m - 1) // m) * m


_PADDED_DIMS = [(_round_up(fi, _LANE), _round_up(fo, _LANE)) for fi, fo in _ALL_DIMS]


# ---------------------------------------------------------------------------
# Kernel
# ---------------------------------------------------------------------------
def _ae_kernel(x_ref,
               w1, b1, w2, b2, w3, b3, w4, b4,      # encoder
               w5, b5, w6, b6, w7, b7, w8, b8,      # decoder
               enc_ref, dec_ref):
    def layer(h_bf16, w_ref, b_ref, act):
        # bf16 x bf16 -> f32 on the MXU; bias add (VPU) and tanh (EUP) in f32.
        y = jnp.dot(h_bf16, w_ref[...], preferred_element_type=jnp.float32) + b_ref[...]
        if act:
            y = jnp.tanh(y)
        return y.astype(jnp.bfloat16), y

    h = x_ref[...]                                   # (TB, 1024) bf16
    # ---- encoder ----
    h, _ = layer(h, w1, b1, True)
    h, _ = layer(h, w2, b2, True)
    h, _ = layer(h, w3, b3, True)
    h, enc_f32 = layer(h, w4, b4, False)             # (TB, 128) padded latent (pre-activation)
    enc_ref[...] = enc_f32.astype(enc_ref.dtype)
    # ---- decoder ----
    h, _ = layer(h, w5, b5, True)
    h, _ = layer(h, w6, b6, True)
    h, _ = layer(h, w7, b7, True)
    _, dec_f32 = layer(h, w8, b8, False)             # (TB, 1024) padded reconstruction
    dec_ref[...] = dec_f32.astype(dec_ref.dtype)


# ---------------------------------------------------------------------------
# Parameter prep (one-time, outside the per-step forward)
# ---------------------------------------------------------------------------
def prepare_params(params):
    """One-time pad/cast (do NOT call per forward pass).

    Zero-pads every weight/bias feature dim to a multiple of 128; weights go to
    bf16 (MXU operands), biases stay f32 (added to the f32 accumulator).
    `params` is a list of 8 (W (in,out), b (1,out)) f32 pairs."""
    flat = []
    for w, b in params:
        fi, fo = w.shape
        fi_p, fo_p = _round_up(fi, _LANE), _round_up(fo, _LANE)
        wp = jnp.zeros((fi_p, fo_p), jnp.bfloat16).at[:fi, :fo].set(w.astype(jnp.bfloat16))
        bp = jnp.zeros((1, fo_p), jnp.float32).at[:, :fo].set(
            b.reshape(1, -1).astype(jnp.float32))
        flat += [wp, bp]
    return tuple(flat)


# ---------------------------------------------------------------------------
# Tiling
# ---------------------------------------------------------------------------
def _choose_tile(B, block_batch):
    """Pick (TB, B_pad).  TB is a multiple of 16 (bf16 sublane packing); large
    batches get 256-multiple tiles (block_batch, default 512); TB is capped at
    ceil(B_pad/2) so the grid has >= 2 steps whenever the batch allows it
    (lets the "parallel" batch axis shard across both v7x TensorCores)."""
    bp = _round_up(B, _SUBLANE_BF16)
    if bp < 2 * _SUBLANE_BF16:
        return bp, bp                                     # tiny batch: single tile
    half = _round_up(-(-bp // 2), _SUBLANE_BF16)          # ceil(bp/2), 16-aligned
    if bp >= 2 * 256:
        tb = min(_round_up(min(block_batch, bp), 256), half)
    else:
        tb = half
    tb = max(tb, _SUBLANE_BF16)
    return tb, _round_up(bp, tb)


# ---------------------------------------------------------------------------
# Forward
# ---------------------------------------------------------------------------
def _forward_padded(xp, flat, tb, dec_dtype):
    """xp: (B_pad, 1024) bf16 with B_pad % tb == 0.  Returns padded outputs."""
    B_pad, F_pad = xp.shape
    L_pad = _round_up(ENC_DIMS[-1], _LANE)
    grid = (B_pad // tb,)

    def _const_spec(a):
        nd = a.ndim
        # Constant block index: fetched once, resident in VMEM across the grid.
        return pl.BlockSpec(a.shape, lambda i, _nd=nd: (0,) * _nd)

    in_specs = [pl.BlockSpec((tb, F_pad), lambda i: (i, 0))] + [_const_spec(a) for a in flat]
    out_specs = (
        pl.BlockSpec((tb, L_pad), lambda i: (i, 0)),
        pl.BlockSpec((tb, F_pad), lambda i: (i, 0)),
    )
    out_shape = (
        jax.ShapeDtypeStruct((B_pad, L_pad), jnp.float32),
        jax.ShapeDtypeStruct((B_pad, F_pad), dec_dtype),
    )

    # Advisory cost estimate so XLA schedules surrounding pad/cast/slice well.
    mm_flops = 2 * B_pad * sum(fi * fo for fi, fo in _PADDED_DIMS)
    tanh_elems = B_pad * sum(fo for idx, (_fi, fo) in enumerate(_PADDED_DIMS)
                             if idx not in (3, 7))
    w_bytes = sum(fi * fo * 2 + fo * 4 for fi, fo in _PADDED_DIMS)
    act_bytes = B_pad * (F_pad * 2 + L_pad * 4 + F_pad * jnp.dtype(dec_dtype).itemsize)
    cost = pl.CostEstimate(flops=mm_flops, transcendentals=tanh_elems,
                           bytes_accessed=w_bytes + act_bytes)

    enc_p, dec_p = pl.pallas_call(
        _ae_kernel,
        out_shape=out_shape,
        grid=grid,
        in_specs=in_specs,
        out_specs=out_specs,
        compiler_params=pltpu.CompilerParams(
            dimension_semantics=("parallel",),
            vmem_limit_bytes=32 << 20,
        ),
        cost_estimate=cost,
    )(xp, *flat)
    return enc_p, dec_p


@functools.partial(jax.jit, static_argnames=("block_batch", "dec_dtype"))
def autoencoder_forward_padded(xp, flat_params, *, block_batch=512,
                               dec_dtype=jnp.bfloat16):
    """Padded-layout entry point (no per-call feature pad/cast/slice passes).

    xp: (B_pad, 1024) bf16, real data in columns [:1000], B_pad % 16 == 0.
    Returns (enc (B_pad, 128) f32, dec (B_pad, 1024) dec_dtype), still padded."""
    B_pad, F_pad = xp.shape
    assert F_pad == _round_up(ENC_DIMS[0], _LANE)
    tb, B_need = _choose_tile(B_pad, block_batch)
    if B_need != B_pad:
        xp = jnp.pad(xp, ((0, B_need - B_pad), (0, 0)))
    enc_p, dec_p = _forward_padded(xp, tuple(flat_params), tb, dec_dtype)
    return enc_p[:B_pad], dec_p[:B_pad]


@functools.partial(jax.jit, static_argnames=("block_batch", "dec_dtype"))
def autoencoder_forward(x, flat_params, *, block_batch=512, dec_dtype=jnp.bfloat16):
    """Convenience wrapper.  x: (B, 1000) f32; flat_params from prepare_params().
    Returns (encoded (B, 64) f32, decoded (B, 1000) dec_dtype).  jit-compiled so
    the pad/cast and output slices fuse with surrounding XLA ops instead of
    being standalone HBM passes."""
    B, F = x.shape
    assert F == ENC_DIMS[0]
    F_pad = _round_up(F, _LANE)                      # 1024
    L = ENC_DIMS[-1]                                 # 64

    tb, B_pad = _choose_tile(B, block_batch)
    xp = jnp.zeros((B_pad, F_pad), jnp.bfloat16).at[:B, :F].set(x.astype(jnp.bfloat16))
    enc_p, dec_p = _forward_padded(xp, tuple(flat_params), tb, dec_dtype)
    return enc_p[:B, :L], dec_p[:B, :F]


# ---------------------------------------------------------------------------
# Init + references
# ---------------------------------------------------------------------------
def init_params(key):
    """Deterministic PyTorch-Linear-style init: U(-1/sqrt(fan_in), 1/sqrt(fan_in)).
    Weights stored as (in, out) == W.T so the kernel computes x @ W + b."""
    params = []
    for (fan_in, fan_out) in _ALL_DIMS:
        key, kw, kb = jax.random.split(key, 3)
        bound = 1.0 / jnp.sqrt(jnp.float32(fan_in))
        w = jax.random.uniform(kw, (fan_in, fan_out), jnp.float32, -bound, bound)
        b = jax.random.uniform(kb, (1, fan_out), jnp.float32, -bound, bound)
        params.append((w, b))
    return params


def reference_forward_f32(x, params):
    """Original full-f32 math (matches the PyTorch module)."""
    h = x
    enc = None
    for i, (w, b) in enumerate(params):
        h = h @ w + b
        if i not in (3, 7):
            h = jnp.tanh(h)
        if i == 3:
            enc = h
    return enc, h


def reference_forward_bf16(x, params):
    """Pure-JAX emulation of the kernel's dtype strategy (bf16 operands, f32 accum)."""
    h = x.astype(jnp.bfloat16)
    enc = None
    y = None
    for i, (w, b) in enumerate(params):
        y = jnp.dot(h, w.astype(jnp.bfloat16), preferred_element_type=jnp.float32) + b
        if i not in (3, 7):
            y = jnp.tanh(y)
        if i == 3:
            enc = y
        h = y.astype(jnp.bfloat16)
    return enc, y


if __name__ == "__main__":
    key = jax.random.PRNGKey(0)
    key, kx = jax.random.split(key)
    B = 40                                            # exercises a 2-step batch grid
    x = jax.random.normal(kx, (B, 1000), jnp.float32)
    params = init_params(key)
    flat = prepare_params(params)                     # one-time pad/cast of weights

    enc, dec = autoencoder_forward(x, flat)
    jax.block_until_ready((enc, dec))

    assert enc.shape == (B, 64) and dec.shape == (B, 1000)
    assert enc.dtype == jnp.float32 and dec.dtype == jnp.bfloat16

    # Tight check vs a pure-JAX emulation of the kernel's bf16/f32 numerics.
    enc_bf, dec_bf = reference_forward_bf16(x, params)
    assert jnp.allclose(enc, enc_bf, atol=5e-3, rtol=5e-3)
    assert jnp.allclose(dec.astype(jnp.float32), dec_bf, atol=1e-2, rtol=1e-2)

    # Looser sanity check vs the original full-f32 math (bf16 quantization noise).
    enc_f32, dec_f32 = reference_forward_f32(x, params)
    assert jnp.allclose(enc, enc_f32, atol=1e-1, rtol=1e-1)
    assert jnp.allclose(dec.astype(jnp.float32), dec_f32, atol=1e-1, rtol=1e-1)

    print("KERNEL_OK")
</pallas_src>

<mosaic_0001>
module attributes {stable_mosaic.version = 11 : i64} {
  func.func @_ae_kernel(%arg0: i32, %arg1: memref<32x1024xbf16, #tpu.memory_space<vmem>>, %arg2: memref<1024x512xbf16, #tpu.memory_space<vmem>>, %arg3: memref<1x512xf32, #tpu.memory_space<vmem>>, %arg4: memref<512x256xbf16, #tpu.memory_space<vmem>>, %arg5: memref<1x256xf32, #tpu.memory_space<vmem>>, %arg6: memref<256x128xbf16, #tpu.memory_space<vmem>>, %arg7: memref<1x128xf32, #tpu.memory_space<vmem>>, %arg8: memref<128x128xbf16, #tpu.memory_space<vmem>>, %arg9: memref<1x128xf32, #tpu.memory_space<vmem>>, %arg10: memref<128x128xbf16, #tpu.memory_space<vmem>>, %arg11: memref<1x128xf32, #tpu.memory_space<vmem>>, %arg12: memref<128x256xbf16, #tpu.memory_space<vmem>>, %arg13: memref<1x256xf32, #tpu.memory_space<vmem>>, %arg14: memref<256x512xbf16, #tpu.memory_space<vmem>>, %arg15: memref<1x512xf32, #tpu.memory_space<vmem>>, %arg16: memref<512x1024xbf16, #tpu.memory_space<vmem>>, %arg17: memref<1x1024xf32, #tpu.memory_space<vmem>>, %arg18: memref<32x128xf32, #tpu.memory_space<vmem>>, %arg19: memref<32x1024xbf16, #tpu.memory_space<vmem>>) attributes {dimension_semantics = [#tpu.dimension_semantics<parallel>], iteration_bounds = array<i64: 2>, scalar_prefetch = 0 : i64, scratch_operands = 0 : i64, tpu.core_type = #tpu.core_type<tc>, window_params = [{transform_indices = @transform_0, window_bounds = array<i64: 32, 1024>}, {pipeline_mode = #tpu.pipeline_mode<synchronous>, transform_indices = @transform_1, window_bounds = array<i64: 1024, 512>}, {pipeline_mode = #tpu.pipeline_mode<synchronous>, transform_indices = @transform_2, window_bounds = array<i64: 1, 512>}, {pipeline_mode = #tpu.pipeline_mode<synchronous>, transform_indices = @transform_3, window_bounds = array<i64: 512, 256>}, {pipeline_mode = #tpu.pipeline_mode<synchronous>, transform_indices = @transform_4, window_bounds = array<i64: 1, 256>}, {pipeline_mode = #tpu.pipeline_mode<synchronous>, transform_indices = @transform_5, window_bounds = array<i64: 256, 128>}, {pipeline_mode = #tpu.pipeline_mode<synchronous>, transform_indices = @transform_6, window_bounds = array<i64: 1, 128>}, {pipeline_mode = #tpu.pipeline_mode<synchronous>, transform_indices = @transform_7, window_bounds = array<i64: 128, 128>}, {pipeline_mode = #tpu.pipeline_mode<synchronous>, transform_indices = @transform_8, window_bounds = array<i64: 1, 128>}, {pipeline_mode = #tpu.pipeline_mode<synchronous>, transform_indices = @transform_9, window_bounds = array<i64: 128, 128>}, {pipeline_mode = #tpu.pipeline_mode<synchronous>, transform_indices = @transform_10, window_bounds = array<i64: 1, 128>}, {pipeline_mode = #tpu.pipeline_mode<synchronous>, transform_indices = @transform_11, window_bounds = array<i64: 128, 256>}, {pipeline_mode = #tpu.pipeline_mode<synchronous>, transform_indices = @transform_12, window_bounds = array<i64: 1, 256>}, {pipeline_mode = #tpu.pipeline_mode<synchronous>, transform_indices = @transform_13, window_bounds = array<i64: 256, 512>}, {pipeline_mode = #tpu.pipeline_mode<synchronous>, transform_indices = @transform_14, window_bounds = array<i64: 1, 512>}, {pipeline_mode = #tpu.pipeline_mode<synchronous>, transform_indices = @transform_15, window_bounds = array<i64: 512, 1024>}, {pipeline_mode = #tpu.pipeline_mode<synchronous>, transform_indices = @transform_16, window_bounds = array<i64: 1, 1024>}, {transform_indices = @transform_17, window_bounds = array<i64: 32, 128>}, {transform_indices = @transform_18, window_bounds = array<i64: 32, 1024>}]} {
    %c0 = arith.constant 0 : index
    %c0_0 = arith.constant 0 : index
    %0 = vector.load %arg1[%c0, %c0_0] : memref<32x1024xbf16, #tpu.memory_space<vmem>>, vector<32x1024xbf16>
    %c0_1 = arith.constant 0 : index
    %c0_2 = arith.constant 0 : index
    %1 = vector.load %arg2[%c0_1, %c0_2] : memref<1024x512xbf16, #tpu.memory_space<vmem>>, vector<1024x512xbf16>
    %cst = arith.constant dense<0.000000e+00> : vector<32x512xf32>
    %2 = tpu.matmul %0, %1, %cst {dimension_numbers = #tpu.dot_dimension_numbers<[1], [0], [0], [1], [0, 0, 1, 1], [], []>} : vector<32x1024xbf16>, vector<1024x512xbf16>, vector<32x512xf32> -> vector<32x512xf32>
    %c0_3 = arith.constant 0 : index
    %c0_4 = arith.constant 0 : index
    %3 = vector.load %arg3[%c0_3, %c0_4] : memref<1x512xf32, #tpu.memory_space<vmem>>, vector<1x512xf32>
    %4 = vector.broadcast %3 : vector<1x512xf32> to vector<32x512xf32>
    %5 = arith.addf %2, %4 : vector<32x512xf32>
    %6 = math.tanh %5 : vector<32x512xf32>
    %7 = arith.truncf %6 : vector<32x512xf32> to vector<32x512xbf16>
    %c0_5 = arith.constant 0 : index
    %c0_6 = arith.constant 0 : index
    %8 = vector.load %arg4[%c0_5, %c0_6] : memref<512x256xbf16, #tpu.memory_space<vmem>>, vector<512x256xbf16>
    %cst_7 = arith.constant dense<0.000000e+00> : vector<32x256xf32>
    %9 = tpu.matmul %7, %8, %cst_7 {dimension_numbers = #tpu.dot_dimension_numbers<[1], [0], [0], [1], [0, 0, 1, 1], [], []>} : vector<32x512xbf16>, vector<512x256xbf16>, vector<32x256xf32> -> vector<32x256xf32>
    %c0_8 = arith.constant 0 : index
    %c0_9 = arith.constant 0 : index
    %10 = vector.load %arg5[%c0_8, %c0_9] : memref<1x256xf32, #tpu.memory_space<vmem>>, vector<1x256xf32>
    %11 = vector.broadcast %10 : vector<1x256xf32> to vector<32x256xf32>
    %12 = arith.addf %9, %11 : vector<32x256xf32>
    %13 = math.tanh %12 : vector<32x256xf32>
    %14 = arith.truncf %13 : vector<32x256xf32> to vector<32x256xbf16>
    %c0_10 = arith.constant 0 : index
    %c0_11 = arith.constant 0 : index
    %15 = vector.load %arg6[%c0_10, %c0_11] : memref<256x128xbf16, #tpu.memory_space<vmem>>, vector<256x128xbf16>
    %cst_12 = arith.constant dense<0.000000e+00> : vector<32x128xf32>
    %16 = tpu.matmul %14, %15, %cst_12 {dimension_numbers = #tpu.dot_dimension_numbers<[1], [0], [0], [1], [0, 0, 1, 1], [], []>} : vector<32x256xbf16>, vector<256x128xbf16>, vector<32x128xf32> -> vector<32x128xf32>
    %c0_13 = arith.constant 0 : index
    %c0_14 = arith.constant 0 : index
    %17 = vector.load %arg7[%c0_13, %c0_14] : memref<1x128xf32, #tpu.memory_space<vmem>>, vector<1x128xf32>
    %18 = vector.broadcast %17 : vector<1x128xf32> to vector<32x128xf32>
    %19 = arith.addf %16, %18 : vector<32x128xf32>
    %20 = math.tanh %19 : vector<32x128xf32>
    %21 = arith.truncf %20 : vector<32x128xf32> to vector<32x128xbf16>
    %c0_15 = arith.constant 0 : index
    %c0_16 = arith.constant 0 : index
    %22 = vector.load %arg8[%c0_15, %c0_16] : memref<128x128xbf16, #tpu.memory_space<vmem>>, vector<128x128xbf16>
    %cst_17 = arith.constant dense<0.000000e+00> : vector<32x128xf32>
    %23 = tpu.matmul %21, %22, %cst_17 {dimension_numbers = #tpu.dot_dimension_numbers<[1], [0], [0], [1], [0, 0, 1, 1], [], []>} : vector<32x128xbf16>, vector<128x128xbf16>, vector<32x128xf32> -> vector<32x128xf32>
    %c0_18 = arith.constant 0 : index
    %c0_19 = arith.constant 0 : index
    %24 = vector.load %arg9[%c0_18, %c0_19] : memref<1x128xf32, #tpu.memory_space<vmem>>, vector<1x128xf32>
    %25 = vector.broadcast %24 : vector<1x128xf32> to vector<32x128xf32>
    %26 = arith.addf %23, %25 : vector<32x128xf32>
    %27 = arith.truncf %26 : vector<32x128xf32> to vector<32x128xbf16>
    %c0_20 = arith.constant 0 : index
    %c0_21 = arith.constant 0 : index
    %28 = vector.load %arg18[%c0_20, %c0_21] : memref<32x128xf32, #tpu.memory_space<vmem>>, vector<32x128xf32>
    tpu.vector_store %arg18[%c0_20, %c0_21], %26 {strides = array<i32>} : memref<32x128xf32, #tpu.memory_space<vmem>>, vector<32x128xf32>,
    %c0_22 = arith.constant 0 : index
    %c0_23 = arith.constant 0 : index
    %29 = vector.load %arg10[%c0_22, %c0_23] : memref<128x128xbf16, #tpu.memory_space<vmem>>, vector<128x128xbf16>
    %cst_24 = arith.constant dense<0.000000e+00> : vector<32x128xf32>
    %30 = tpu.matmul %27, %29, %cst_24 {dimension_numbers = #tpu.dot_dimension_numbers<[1], [0], [0], [1], [0, 0, 1, 1], [], []>} : vector<32x128xbf16>, vector<128x128xbf16>, vector<32x128xf32> -> vector<32x128xf32>
    %c0_25 = arith.constant 0 : index
    %c0_26 = arith.constant 0 : index
    %31 = vector.load %arg11[%c0_25, %c0_26] : memref<1x128xf32, #tpu.memory_space<vmem>>, vector<1x128xf32>
    %32 = vector.broadcast %31 : vector<1x128xf32> to vector<32x128xf32>
    %33 = arith.addf %30, %32 : vector<32x128xf32>
    %34 = math.tanh %33 : vector<32x128xf32>
    %35 = arith.truncf %34 : vector<32x128xf32> to vector<32x128xbf16>
    %c0_27 = arith.constant 0 : index
    %c0_28 = arith.constant 0 : index
    %36 = vector.load %arg12[%c0_27, %c0_28] : memref<128x256xbf16, #tpu.memory_space<vmem>>, vector<128x256xbf16>
    %cst_29 = arith.constant dense<0.000000e+00> : vector<32x256xf32>
    %37 = tpu.matmul %35, %36, %cst_29 {dimension_numbers = #tpu.dot_dimension_numbers<[1], [0], [0], [1], [0, 0, 1, 1], [], []>} : vector<32x128xbf16>, vector<128x256xbf16>, vector<32x256xf32> -> vector<32x256xf32>
    %c0_30 = arith.constant 0 : index
    %c0_31 = arith.constant 0 : index
    %38 = vector.load %arg13[%c0_30, %c0_31] : memref<1x256xf32, #tpu.memory_space<vmem>>, vector<1x256xf32>
    %39 = vector.broadcast %38 : vector<1x256xf32> to vector<32x256xf32>
    %40 = arith.addf %37, %39 : vector<32x256xf32>
    %41 = math.tanh %40 : vector<32x256xf32>
    %42 = arith.truncf %41 : vector<32x256xf32> to vector<32x256xbf16>
    %c0_32 = arith.constant 0 : index
    %c0_33 = arith.constant 0 : index
    %43 = vector.load %arg14[%c0_32, %c0_33] : memref<256x512xbf16, #tpu.memory_space<vmem>>, vector<256x512xbf16>
    %cst_34 = arith.constant dense<0.000000e+00> : vector<32x512xf32>
    %44 = tpu.matmul %42, %43, %cst_34 {dimension_numbers = #tpu.dot_dimension_numbers<[1], [0], [0], [1], [0, 0, 1, 1], [], []>} : vector<32x256xbf16>, vector<256x512xbf16>, vector<32x512xf32> -> vector<32x512xf32>
    %c0_35 = arith.constant 0 : index
    %c0_36 = arith.constant 0 : index
    %45 = vector.load %arg15[%c0_35, %c0_36] : memref<1x512xf32, #tpu.memory_space<vmem>>, vector<1x512xf32>
    %46 = vector.broadcast %45 : vector<1x512xf32> to vector<32x512xf32>
    %47 = arith.addf %44, %46 : vector<32x512xf32>
    %48 = math.tanh %47 : vector<32x512xf32>
    %49 = arith.truncf %48 : vector<32x512xf32> to vector<32x512xbf16>
    %c0_37 = arith.constant 0 : index
    %c0_38 = arith.constant 0 : index
    %50 = vector.load %arg16[%c0_37, %c0_38] : memref<512x1024xbf16, #tpu.memory_space<vmem>>, vector<512x1024xbf16>
    %cst_39 = arith.constant dense<0.000000e+00> : vector<32x1024xf32>
    %51 = tpu.matmul %49, %50, %cst_39 {dimension_numbers = #tpu.dot_dimension_numbers<[1], [0], [0], [1], [0, 0, 1, 1], [], []>} : vector<32x512xbf16>, vector<512x1024xbf16>, vector<32x1024xf32> -> vector<32x1024xf32>
    %c0_40 = arith.constant 0 : index
    %c0_41 = arith.constant 0 : index
    %52 = vector.load %arg17[%c0_40, %c0_41] : memref<1x1024xf32, #tpu.memory_space<vmem>>, vector<1x1024xf32>
    %53 = vector.broadcast %52 : vector<1x1024xf32> to vector<32x1024xf32>
    %54 = arith.addf %51, %53 : vector<32x1024xf32>
    %55 = arith.truncf %54 : vector<32x1024xf32> to vector<32x1024xbf16>
    %c0_42 = arith.constant 0 : index
    %c0_43 = arith.constant 0 : index
    %56 = vector.load %arg19[%c0_42, %c0_43] : memref<32x1024xbf16, #tpu.memory_space<vmem>>, vector<32x1024xbf16>
    tpu.vector_store %arg19[%c0_42, %c0_43], %55 {strides = array<i32>} : memref<32x1024xbf16, #tpu.memory_space<vmem>>, vector<32x1024xbf16>,
    return
  }
  func.func @transform_0(%arg0: i32) -> (i32, i32) {
    %c0_i32 = arith.constant 0 : i32
    %c0_i32_0 = arith.constant 0 : i32
    return %arg0, %c0_i32 : i32, i32
  }
  func.func @transform_1(%arg0: i32) -> (i32, i32) {
    %c0_i32 = arith.constant 0 : i32
    %c0_i32_0 = arith.constant 0 : i32
    %c0_i32_1 = arith.constant 0 : i32
    return %c0_i32, %c0_i32_0 : i32, i32
  }
  func.func @transform_2(%arg0: i32) -> (i32, i32) {
    %c0_i32 = arith.constant 0 : i32
    %c0_i32_0 = arith.constant 0 : i32
    %c0_i32_1 = arith.constant 0 : i32
    return %c0_i32, %c0_i32_0 : i32, i32
  }
  func.func @transform_3(%arg0: i32) -> (i32, i32) {
    %c0_i32 = arith.constant 0 : i32
    %c0_i32_0 = arith.constant 0 : i32
    %c0_i32_1 = arith.constant 0 : i32
    return %c0_i32, %c0_i32_0 : i32, i32
  }
  func.func @transform_4(%arg0: i32) -> (i32, i32) {
    %c0_i32 = arith.constant 0 : i32
    %c0_i32_0 = arith.constant 0 : i32
    %c0_i32_1 = arith.constant 0 : i32
    return %c0_i32, %c0_i32_0 : i32, i32
  }
  func.func @transform_5(%arg0: i32) -> (i32, i32) {
    %c0_i32 = arith.constant 0 : i32
    %c0_i32_0 = arith.constant 0 : i32
    %c0_i32_1 = arith.constant 0 : i32
    return %c0_i32, %c0_i32_0 : i32, i32
  }
  func.func @transform_6(%arg0: i32) -> (i32, i32) {
    %c0_i32 = arith.constant 0 : i32
    %c0_i32_0 = arith.constant 0 : i32
    %c0_i32_1 = arith.constant 0 : i32
    return %c0_i32, %c0_i32_0 : i32, i32
  }
  func.func @transform_7(%arg0: i32) -> (i32, i32) {
    %c0_i32 = arith.constant 0 : i32
    %c0_i32_0 = arith.constant 0 : i32
    %c0_i32_1 = arith.constant 0 : i32
    return %c0_i32, %c0_i32_0 : i32, i32
  }
  func.func @transform_8(%arg0: i32) -> (i32, i32) {
    %c0_i32 = arith.constant 0 : i32
    %c0_i32_0 = arith.constant 0 : i32
    %c0_i32_1 = arith.constant 0 : i32
    return %c0_i32, %c0_i32_0 : i32, i32
  }
  func.func @transform_9(%arg0: i32) -> (i32, i32) {
    %c0_i32 = arith.constant 0 : i32
    %c0_i32_0 = arith.constant 0 : i32
    %c0_i32_1 = arith.constant 0 : i32
    return %c0_i32, %c0_i32_0 : i32, i32
  }
  func.func @transform_10(%arg0: i32) -> (i32, i32) {
    %c0_i32 = arith.constant 0 : i32
    %c0_i32_0 = arith.constant 0 : i32
    %c0_i32_1 = arith.constant 0 : i32
    return %c0_i32, %c0_i32_0 : i32, i32
  }
  func.func @transform_11(%arg0: i32) -> (i32, i32) {
    %c0_i32 = arith.constant 0 : i32
    %c0_i32_0 = arith.constant 0 : i32
    %c0_i32_1 = arith.constant 0 : i32
    return %c0_i32, %c0_i32_0 : i32, i32
  }
  func.func @transform_12(%arg0: i32) -> (i32, i32) {
    %c0_i32 = arith.constant 0 : i32
    %c0_i32_0 = arith.constant 0 : i32
    %c0_i32_1 = arith.constant 0 : i32
    return %c0_i32, %c0_i32_0 : i32, i32
  }
  func.func @transform_13(%arg0: i32) -> (i32, i32) {
    %c0_i32 = arith.constant 0 : i32
    %c0_i32_0 = arith.constant 0 : i32
    %c0_i32_1 = arith.constant 0 : i32
    return %c0_i32, %c0_i32_0 : i32, i32
  }
  func.func @transform_14(%arg0: i32) -> (i32, i32) {
    %c0_i32 = arith.constant 0 : i32
    %c0_i32_0 = arith.constant 0 : i32
    %c0_i32_1 = arith.constant 0 : i32
    return %c0_i32, %c0_i32_0 : i32, i32
  }
  func.func @transform_15(%arg0: i32) -> (i32, i32) {
    %c0_i32 = arith.constant 0 : i32
    %c0_i32_0 = arith.constant 0 : i32
    %c0_i32_1 = arith.constant 0 : i32
    return %c0_i32, %c0_i32_0 : i32, i32
  }
  func.func @transform_16(%arg0: i32) -> (i32, i32) {
    %c0_i32 = arith.constant 0 : i32
    %c0_i32_0 = arith.constant 0 : i32
    %c0_i32_1 = arith.constant 0 : i32
    return %c0_i32, %c0_i32_0 : i32, i32
  }
  func.func @transform_17(%arg0: i32) -> (i32, i32) {
    %c0_i32 = arith.constant 0 : i32
    %c0_i32_0 = arith.constant 0 : i32
    return %arg0, %c0_i32 : i32, i32
  }
  func.func @transform_18(%arg0: i32) -> (i32, i32) {
    %c0_i32 = arith.constant 0 : i32
    %c0_i32_0 = arith.constant 0 : i32
    return %arg0, %c0_i32 : i32, i32
  }
}

</mosaic_0001>

<bundles_post_ra>
// kernel: autoencoder_forward.1
= control target key start
LH: loop header
LB: loop body
LE: loop exit
PB: predicated region body
PF: predicated region fallthrough
CT: control target
= control target key end

     0   :  { %s9411_s0 = inlined_call_operand.vmem [shape: bf16[64,1024], index: 0, kind: input, shape index: {}]   ;;  %s9412_s1 = inlined_call_operand.hbm [shape: bf16[1024,512], index: 1, kind: input, shape index: {}]   ;;  %s9413_s2 = inlined_call_operand.vmem [shape: f32[1,512], index: 2, kind: input, shape index: {}]   ;;  %s9414_s3 = inlined_call_operand.vmem [shape: bf16[512,256], index: 3, kind: input, shape index: {}]   ;;  %s9415_s4 = inlined_call_operand.hbm [shape: f32[1,256], index: 4, kind: input, shape index: {}]   ;;  %s9416_s5 = inlined_call_operand.vmem [shape: bf16[256,128], index: 5, kind: input, shape index: {}]   ;;  %s9417_s6 = inlined_call_operand.vmem [shape: f32[1,128], index: 6, kind: input, shape index: {}]   ;;  %s9418_s7 = inlined_call_operand.vmem [shape: bf16[128,128], index: 7, kind: input, shape index: {}]   ;;  %s9419_s8 = inlined_call_operand.vmem [shape: f32[1,128], index: 8, kind: input, shape index: {}]   ;;  %s9420_s9 = inlined_call_operand.vmem [shape: bf16[128,128], index: 9, kind: input, shape index: {}]   ;;  %s9421_s10 = inlined_call_operand.vmem [shape: f32[1,128], index: 10, kind: input, shape index: {}]   ;;  %s9422_s11 = inlined_call_operand.vmem [shape: bf16[128,256], index: 11, kind: input, shape index: {}]   ;;  %s9423_s12 = inlined_call_operand.vmem [shape: f32[1,256], index: 12, kind: input, shape index: {}]   ;;  %s9424_s13 = inlined_call_operand.hbm [shape: bf16[256,512], index: 13, kind: input, shape index: {}]   ;;  %s9425_s14 = inlined_call_operand.vmem [shape: f32[1,512], index: 14, kind: input, shape index: {}]   ;;  %s9426_s15 = inlined_call_operand.hbm [shape: bf16[512,1024], index: 15, kind: input, shape index: {}]   ;;  %s9427_s16 = inlined_call_operand.vmem [shape: f32[1,1024], index: 16, kind: input, shape index: {}]   ;;  %s9428_s17 = inlined_call_operand.vmem [shape: f32[64,128], index: 17, kind: output, shape index: {0}]   ;;  %s9429_s18 = inlined_call_operand.vmem [shape: bf16[64,1024], index: 18, kind: output, shape index: {1}]  }
   0x1   :  { %9435 = sst [smem:[#allocation12_spill]] %s9411_s0 }
   0x2   :  { %9436 = sst [smem:[#allocation13_spill]] %s9412_s1 }
   0x3   :  { %9437 = sst [smem:[#allocation14_spill]] %s9413_s2 }
   0x4   :  { %9438 = sst [smem:[#allocation15_spill]] %s9415_s4 }
   0x5   :  { %9439 = sst [smem:[#allocation16_spill]] %s9423_s12 }
   0x6   :  { %9440 = sst [smem:[#allocation17_spill]] %s9425_s14 }
   0x7   :  { %9441 = sst [smem:[#allocation18_spill]] %s9427_s16 }
   0x8   :  { %9442 = sst [smem:[#allocation19_spill]] %s9429_s18 }
   0x9   :  { %24 = vsyncpa [#allocation3], 0 }
   0xa   :  { %25 = vsyncpa [#allocation5], 0 }
   0xb   :  { %26 = vsyncpa [#allocation8], 0  ;;  %s8700_s27 = smov 0  }
   0xc LB: > { %s8596_s28 = smov [#allocation4]   ;;  %s9431_s30 = sadd.s32 4294967295, %s8594_s27   ;;  %s8594_s27 = sphi %s8700_s27, %s32_s27  }
   0xd   : > { %s483_s29 = sshll.u32 %s8596_s28, 4  ;;  %p6672_p0 = scmp.ge.s32.totalorder %s8594_s27, 1  ;;  %s8714_s29 = int_to_ptr.vmem [resolvable:$true] %s483_s29 }
   0xe   : > { %p451_p1 = scmp.lt.s32.totalorder %s8594_s27, 3  ;;  %p8710_p2 = scmp.eq.s32.totalorder %s9431_s30, 0 }
   0xf   : > { %s8597_s1 = smov [#allocation2]   ;;  %s8598_s22 = smov [#allocation6]  }
  0x10   : > { %s9443_s0 = scalar_select %p8710_p2, 1, 0 }
  0x11   : > { %p8716_p3 = pnand %p6672_p0, %p451_p1  ;;  %s463_s20 = sshll.u32 %s8597_s1, 4  ;;  %s8722_s20 = int_to_ptr.vmem [resolvable:$true] %s463_s20 }
  0x12   : > { %s517_s2 = sshll.u32 %s8598_s22, 4  ;;  %s8599_s23 = smov [#allocation7]   ;;  %s8730_s2 = int_to_ptr.vmem [resolvable:$true] %s517_s2 }
  0x13   : > { %s9444_s19 = scalar_select %p8716_p3, 1, 0 }
  0x14   : > { %p7682_p4 = pneg %p8716_p3  ;;  %s8732_s24 = sshll.u32 %s8599_s23, 4  ;;  %s534_s24 = int_to_ptr.vmem [resolvable:$true] %s8732_s24 }
  0x15   : > { %s9446_s4 = sld [smem:[#allocation15_spill]] }
  0x16   : > { %p8726_p5 = pnand %p8710_p2, %p7682_p4 }
  0x18   : > { %p8742_p7 = pneg %p8726_p5 }
  0x1b   : > { %s8464_s28 = scalar_lea.hbm %s9446_s4, 32 }
  0x1c   : > { %p8465_p6 = scmp.ne.s32.totalorder %s9446_s4, %s8464_s28  ;;  %p8471_p10 = scmp.lt.u32.totalorder %s8464_s28, %s9446_s4 }
  0x1e   : > { %p8467_p8 = pnand %p8742_p7, %p8465_p6 }
  0x20   : > { %p8468_p9 = pneg %p8467_p8 }
  0x22   : > { %p8473_p11 = pnand %p8471_p10, %p8468_p9 }
  0x24   : > { %8476 = shalt.err (!%p8473_p11)
}
  0x25   : > { %s8477_s30 = scalar_lea.vmem %s8714_s29, 32  ;;  %p8485_p1 = scmp.lt.s32.totalorder %s8714_s29, %s8714_s29 }
  0x26   : > { %p8478_p12 = scmp.ne.s32.totalorder %s8714_s29, %s8477_s30  ;;  %p8486_p4 = scmp.lt.s32.totalorder %s8477_s30, %s8477_s30 }
  0x28   : > { %p8480_p13 = pnand %p8478_p12, %p8742_p7  ;;  %p8487_p6 = por %p8486_p4, %p8485_p1 }
  0x2a   : > { %p8481_p0 = pneg %p8480_p13 }
  0x2c   : > { %p8488_p8 = pnand %p8487_p6, %p8481_p0 }
  0x2e   : > { %8491 = shalt.err (!%p8488_p8)
}
  0x2f   : > { %7688 = dma.hbm_to_vmem [thread:$0]  (!%p8726_p5), %s9446_s4, 32, %s8714_s29, [#allocation5]  }
  0x30   : > { %s9448_s22 = sld [smem:[#allocation13_spill]] }
  0x36   : > { %s8492_s23 = scalar_lea.hbm %s9448_s22, 32768 }
  0x37   : > { %p8493_p9 = scmp.ne.s32.totalorder %s9448_s22, %s8492_s23  ;;  %p8499_p12 = scmp.lt.u32.totalorder %s8492_s23, %s9448_s22 }
  0x39   : > { %p8495_p10 = pnand %p8493_p9, %p8742_p7 }
  0x3b   : > { %p8496_p11 = pneg %p8495_p10 }
  0x3d   : > { %p8501_p13 = pnand %p8499_p12, %p8496_p11 }
  0x3f   : > { %8504 = shalt.err (!%p8501_p13)
}
  0x40   : > { %s8505_s29 = scalar_lea.vmem %s8722_s20, 32768  ;;  %p8513_p6 = scmp.lt.s32.totalorder %s8722_s20, %s8722_s20 }
  0x41   : > { %p8506_p0 = scmp.ne.s32.totalorder %s8722_s20, %s8505_s29  ;;  %p8514_p8 = scmp.lt.s32.totalorder %s8505_s29, %s8505_s29 }
  0x43   : > { %p8508_p1 = pnand %p8506_p0, %p8742_p7  ;;  %p8515_p9 = por %p8514_p8, %p8513_p6 }
  0x45   : > { %p8509_p4 = pneg %p8508_p1 }
  0x47   : > { %p8516_p10 = pnand %p8515_p9, %p8509_p4 }
  0x49   : > { %8519 = shalt.err (!%p8516_p10)
}
  0x4a   : > { %s8600_s14 = smov 256   ;;  %s8601_s12 = smov 16  }
  0x4b   : > { %7685 = dma.hbm_to_vmem [thread:$0]  (!%p8726_p5), %s9448_s22, 32768, %s8722_s20, [#allocation3], %s8600_s14, %s8600_s14, %s8601_s12  }
  0x4c   : > { %s8520_s1 = scalar_lea.hbm %s9424_s13, 8192 }
  0x4d   : > { %p8521_p11 = scmp.ne.s32.totalorder %s9424_s13, %s8520_s1  ;;  %p8527_p0 = scmp.lt.u32.totalorder %s8520_s1, %s9424_s13 }
  0x4f   : > { %p8523_p12 = pnand %p8521_p11, %p8742_p7 }
  0x51   : > { %p8524_p13 = pneg %p8523_p12 }
  0x53   : > { %p8529_p1 = pnand %p8527_p0, %p8524_p13 }
  0x55   : > { %8532 = shalt.err (!%p8529_p1)
}
  0x56   : > { %s8533_s20 = scalar_lea.vmem %s8730_s2, 8192  ;;  %p8541_p9 = scmp.lt.s32.totalorder %s8730_s2, %s8730_s2 }
  0x57   : > { %p8534_p4 = scmp.ne.s32.totalorder %s8730_s2, %s8533_s20  ;;  %p8542_p10 = scmp.lt.s32.totalorder %s8533_s20, %s8533_s20 }
  0x59   : > { %p8536_p6 = pnand %p8534_p4, %p8742_p7  ;;  %p8543_p11 = por %p8542_p10, %p8541_p9 }
  0x5b   : > { %p8537_p8 = pneg %p8536_p6 }
  0x5d   : > { %p8544_p12 = pnand %p8543_p11, %p8537_p8 }
  0x5f   : > { %8547 = shalt.err (!%p8544_p12)
}
  0x60   : > { %7691 = dma.hbm_to_vmem [thread:$0]  (!%p8726_p5), %s9424_s13, 8192, %s8730_s2, [#allocation5], %s8600_s14, %s8600_s14, %s8601_s12  }
  0x61   : > { %s8548_s28 = scalar_lea.hbm %s9426_s15, 32768 }
  0x62   : > { %p8549_p13 = scmp.ne.s32.totalorder %s9426_s15, %s8548_s28  ;;  %p8555_p4 = scmp.lt.u32.totalorder %s8548_s28, %s9426_s15 }
  0x64   : > { %p8551_p0 = pnand %p8549_p13, %p8742_p7 }
  0x66   : > { %p8552_p1 = pneg %p8551_p0 }
  0x68   : > { %p8557_p6 = pnand %p8555_p4, %p8552_p1 }
  0x6a   : > { %8560 = shalt.err (!%p8557_p6)
}
  0x6b   : > { %s8561_s20 = scalar_lea.vmem %s534_s24, 32768  ;;  %p8569_p11 = scmp.lt.s32.totalorder %s534_s24, %s534_s24 }
  0x6c   : > { %p8562_p8 = scmp.ne.s32.totalorder %s534_s24, %s8561_s20  ;;  %p8570_p12 = scmp.lt.s32.totalorder %s8561_s20, %s8561_s20 }
  0x6e   : > { %p8564_p9 = pnand %p8562_p8, %p8742_p7  ;;  %p8571_p2 = por %p8570_p12, %p8569_p11 }
  0x70   : > { %p8565_p10 = pneg %p8564_p9 }
  0x72   : > { %p8572_p3 = pnand %p8571_p2, %p8565_p10 }
  0x74   : > { %8575 = shalt.err (!%p8572_p3)
}
  0x75   : > { %s8602_s2 = smov 512   ;;  %s8603_s14 = smov 32  }
  0x76   : > { %7694 = dma.hbm_to_vmem [thread:$0]  (!%p8726_p5), %s9426_s15, 32768, %s534_s24, [#allocation8], %s8602_s2, %s8602_s2, %s8603_s14  }
  0x77   : > { %p9449_p13 = scmp.ne.s32.totalorder %s9444_s19, 0 }
  0x78   : > { %p9450_p0 = scmp.ne.s32.totalorder (!%p9449_p13), %s9443_s0, 0 }
  0x79   : > { %562 = sbr.rel (%p9449_p13) target bundleno = 2496 (0x9c0), region = 88 }
  0x80   : > { %8581 = dma.done.wait (%p9450_p0), [#allocation3], 32768  }
  0x81   : > { %8583 = vsyncadd (%p9450_p0), [#allocation3], 4294934528 }
  0x82   : > { %8585 = dma.done.wait (%p9450_p0), [#allocation5], 8224  }
  0x83   : > { %8587 = vsyncadd (%p9450_p0), [#allocation5], 4294959072 }
  0x84   : > { %8589 = dma.done.wait (%p9450_p0), [#allocation8], 32768  }
  0x85   : > { %8591 = vsyncadd (%p9450_p0), [#allocation8], 4294934528  ;;  %v7720_v0 = vld [vmem:[#allocation2 + $0x4] ss:$16 sps:$4 sm:$0xff]   ;;  %v7722_v1 = vld [vmem:[#allocation2 + $0xc] ss:$16 sps:$4 sm:$0xff]  }
  0x86   : > { %2310 = vmatprep.subr.bf16.mxu0 %v7720_v0  ;;  %v7724_v2 = vld [vmem:[#allocation2] ss:$16 sps:$4 sm:$0xff]   ;;  %v7725_v3 = vld [vmem:[#allocation2 + $0x8] ss:$16 sps:$4 sm:$0xff]   ;;  %2522 = vmatprep.subr.bf16.mxu1 %v7722_v1  ;;  %v7726_v4 = vld [vmem:[#allocation2 + $0x24] ss:$16 sps:$4 sm:$0xff]  }
  0x87   : > { %2311 = vmatpush1.bf16.msra.mxu0 %v7724_v2  ;;  %2523 = vmatpush1.bf16.msra.mxu1 %v7725_v3  ;;  %v7728_v5 = vld [vmem:[#allocation2 + $0x2c] ss:$16 sps:$4 sm:$0xff]   ;;  %v7730_v6 = vld [vmem:[#allocation2 + $0x20] ss:$16 sps:$4 sm:$0xff]   ;;  %v7731_v7 = vld [vmem:[#allocation2 + $0x28] ss:$16 sps:$4 sm:$0xff]  }
  0x88   : > { %2312 = vmatprep.subr.bf16.mxu0 %v7726_v4  ;;  %2524 = vmatprep.subr.bf16.mxu1 %v7728_v5  ;;  %v7732_v8 = vld [vmem:[#allocation2 + $0x44] ss:$16 sps:$4 sm:$0xff]   ;;  %v7734_v9 = vld [vmem:[#allocation2 + $0x4c] ss:$16 sps:$4 sm:$0xff]   ;;  %v7736_v10 = vld [vmem:[#allocation2 + $0x40] ss:$16 sps:$4 sm:$0xff]  }
  0x89   : > { %v7737_v11 = vld [vmem:[#allocation2 + $0x48] ss:$16 sps:$4 sm:$0xff]   ;;  %v7738_v12 = vld [vmem:[#allocation2 + $0x64] ss:$16 sps:$4 sm:$0xff]   ;;  %v7740_v13 = vld [vmem:[#allocation2 + $0x6c] ss:$16 sps:$4 sm:$0xff]  }
  0x8a   : > { %v7742_v14 = vld [vmem:[#allocation2 + $0x60] ss:$16 sps:$4 sm:$0xff]   ;;  %v7743_v15 = vld [vmem:[#allocation2 + $0x68] ss:$16 sps:$4 sm:$0xff]   ;;  %v7744_v16 = vld [vmem:[#allocation2 + $0x84] ss:$16 sps:$4 sm:$0xff]  }
  0x8b   : > { %2313 = vmatpush1.bf16.msra.mxu0 %v7730_v6  ;;  %2525 = vmatpush1.bf16.msra.mxu1 %v7731_v7  ;;  %v7746_v17 = vld [vmem:[#allocation2 + $0x8c] ss:$16 sps:$4 sm:$0xff]   ;;  %v7748_v18 = vld [vmem:[#allocation2 + $0x80] ss:$16 sps:$4 sm:$0xff]   ;;  %v7749_v19 = vld [vmem:[#allocation2 + $0x88] ss:$16 sps:$4 sm:$0xff]  }
  0x8c   : > { %2314 = vmatprep.subr.bf16.mxu0 %v7732_v8  ;;  %2526 = vmatprep.subr.bf16.mxu1 %v7734_v9  ;;  %v7750_v20 = vld [vmem:[#allocation2 + $0xa4] ss:$16 sps:$4 sm:$0xff]   ;;  %v7752_v21 = vld [vmem:[#allocation2 + $0xac] ss:$16 sps:$4 sm:$0xff]   ;;  %v7754_v22 = vld [vmem:[#allocation2 + $0xa0] ss:$16 sps:$4 sm:$0xff]  }
  0x8d   : > { %v7755_v23 = vld [vmem:[#allocation2 + $0xa8] ss:$16 sps:$4 sm:$0xff]   ;;  %v7756_v24 = vld [vmem:[#allocation2 + $0xc4] ss:$16 sps:$4 sm:$0xff]   ;;  %v7758_v25 = vld [vmem:[#allocation2 + $0xcc] ss:$16 sps:$4 sm:$0xff]  }
  0x8e   : > { %v7760_v26 = vld [vmem:[#allocation2 + $0xc0] ss:$16 sps:$4 sm:$0xff]   ;;  %v7761_v27 = vld [vmem:[#allocation2 + $0xc8] ss:$16 sps:$4 sm:$0xff]   ;;  %v7762_v28 = vld [vmem:[#allocation2 + $0xe4] ss:$16 sps:$4 sm:$0xff]  }
  0x8f   : > { %2315 = vmatpush1.bf16.msra.mxu0 %v7736_v10  ;;  %2527 = vmatpush1.bf16.msra.mxu1 %v7737_v11  ;;  %v7764_v29 = vld [vmem:[#allocation2 + $0xec] ss:$16 sps:$4 sm:$0xff]   ;;  %s9451_s18 = sadd.s32 4294967295, %s8594_s27   ;;  %v7766_v30 = vld [vmem:[#allocation2 + $0xe0] ss:$16 sps:$4 sm:$0xff]   ;;  %s9452_s16 = sld [smem:[#allocation12_spill]] }
  0x90   : > { %2316 = vmatprep.subr.bf16.mxu0 %v7738_v12  ;;  %2528 = vmatprep.subr.bf16.mxu1 %v7740_v13  ;;  %s6683_s0 = sshll.u32 %s9451_s18, 2  ;;  %v7767_v31 = vld [vmem:[#allocation2 + $0xe8] ss:$16 sps:$4 sm:$0xff]   ;;  %v7768_v32 = vld [vmem:[#allocation2 + $0x104] ss:$16 sps:$4 sm:$0xff]   ;;  %s9453_s26 = sld [smem:[#allocation14_spill]] }
  0x91   : > { %p636_p2 = scmp.lt.s32.totalorder %s6683_s0, 7  ;;  %v7770_v33 = vld [vmem:[#allocation2 + $0x10c] ss:$16 sps:$4 sm:$0xff]   ;;  %v7772_v34 = vld [vmem:[#allocation2 + $0x100] ss:$16 sps:$4 sm:$0xff]   ;;  %s9455_s1 = sld [smem:[#allocation17_spill]] }
  0x92   : > { %v7773_v35 = vld [vmem:[#allocation2 + $0x108] ss:$16 sps:$4 sm:$0xff]   ;;  %v7774_v36 = vld [vmem:[#allocation2 + $0x124] ss:$16 sps:$4 sm:$0xff]   ;;  %v7776_v37 = vld [vmem:[#allocation2 + $0x12c] ss:$16 sps:$4 sm:$0xff]  }
  0x93   : > { %2317 = vmatpush1.bf16.msra.mxu0 %v7742_v14  ;;  %2529 = vmatpush1.bf16.msra.mxu1 %v7743_v15  ;;  %s9459_s0 = smov (!%p636_p2, %s6683_s0), 7  ;;  %v7778_v38 = vld [vmem:[#allocation2 + $0x120] ss:$16 sps:$4 sm:$0xff]   ;;  %v7779_v39 = vld [vmem:[#allocation2 + $0x128] ss:$16 sps:$4 sm:$0xff]   ;;  %s9456_s29 = sld [smem:[#allocation18_spill]] }
  0x94   : > { %2318 = vmatprep.subr.bf16.mxu0 %v7744_v16  ;;  %2530 = vmatprep.subr.bf16.mxu1 %v7746_v17  ;;  %v7780_v40 = vld [vmem:[#allocation2 + $0x144] ss:$16 sps:$4 sm:$0xff]   ;;  %s7416_s19 = sshll.u32 %s9459_s0, 5  ;;  %v7782_v41 = vld [vmem:[#allocation2 + $0x14c] ss:$16 sps:$4 sm:$0xff]   ;;  %s6687_s2 = sshll.u32 %s9459_s0, 3 }
  0x95   : > { %v7784_v42 = vld [vmem:[#allocation2 + $0x140] ss:$16 sps:$4 sm:$0xff]   ;;  %v7785_v43 = vld [vmem:[#allocation2 + $0x148] ss:$16 sps:$4 sm:$0xff]   ;;  %s8852_s25 = scalar_lea.vmem %s9452_s16, %s7416_s19  ;;  %v7786_v44 = vld [vmem:[#allocation2 + $0x164] ss:$16 sps:$4 sm:$0xff]   ;;  %s646_s21 = scalar_lea.vmem %s9428_s17, %s6687_s2 }
  0x96   : > { %v7788_v45 = vld [vmem:[#allocation2 + $0x16c] ss:$16 sps:$4 sm:$0xff]   ;;  %v656_v46 = vld [vmem:[%s8852_s25] sm:$0xff]  ;;  %v7791_v49 = vld [vmem:[#allocation2 + $0x168] ss:$16 sps:$4 sm:$0xff]   ;;  %s9457_s14 = sld [smem:[#allocation19_spill]] }
  0x97   : > { %2319 = vmatpush1.bf16.msra.mxu0 %v7748_v18  ;;  %2531 = vmatpush1.bf16.msra.mxu1 %v7749_v19  ;;  %v660_v47 = vld [vmem:[%s8852_s25 + $0x20] sm:$0xff]  ;;  %v7794_v52 = vld [vmem:[#allocation2 + $0x18c] ss:$16 sps:$4 sm:$0xff]   ;;  %v7797_v54 = vld [vmem:[#allocation2 + $0x188] ss:$16 sps:$4 sm:$0xff]  }
  0x98   : > { %2320 = vmatprep.subr.bf16.mxu0 %v7750_v20  ;;  %2532 = vmatprep.subr.bf16.mxu1 %v7752_v21  ;;  %v7790_v48 = vld [vmem:[#allocation2 + $0x160] ss:$16 sps:$4 sm:$0xff]   ;;  %v6692_v50 = vcombine.high %v656_v46, %v660_v47  ;;  %v7792_v51 = vld [vmem:[#allocation2 + $0x184] ss:$16 sps:$4 sm:$0xff]   ;;  %v7800_v56 = vld [vmem:[#allocation2 + $0x1ac] ss:$16 sps:$4 sm:$0xff]   ;;  %v6691_v5 = vcombine.low %v656_v46, %v660_v47 }
  0x99   : > { %v7796_v53 = vld [vmem:[#allocation2 + $0x180] ss:$16 sps:$4 sm:$0xff]   ;;  %v7798_v55 = vld [vmem:[#allocation2 + $0x1a4] ss:$16 sps:$4 sm:$0xff]   ;;  %v7803_v58 = vld [vmem:[#allocation2 + $0x1a8] ss:$16 sps:$4 sm:$0xff]  }
  0x9a   : > { %2342 = vmatprep.mubr.bf16.mxu0 %v6692_v50  ;;  %2554 = vmatprep.mubr.bf16.mxu1 %v6692_v50  ;;  %v7802_v57 = vld [vmem:[#allocation2 + $0x1a0] ss:$16 sps:$4 sm:$0xff]   ;;  %v7804_v59 = vld [vmem:[#allocation2 + $0x1c4] ss:$16 sps:$4 sm:$0xff]   ;;  %v7806_v60 = vld [vmem:[#allocation2 + $0x1cc] ss:$16 sps:$4 sm:$0xff]  }
  0x9b   : > { %2321 = vmatpush1.bf16.msra.mxu0 %v7754_v22  ;;  %2533 = vmatpush1.bf16.msra.mxu1 %v7755_v23  ;;  %v7808_v61 = vld [vmem:[#allocation2 + $0x1c0] ss:$16 sps:$4 sm:$0xff]   ;;  %v7809_v62 = vld [vmem:[#allocation2 + $0x1c8] ss:$16 sps:$4 sm:$0xff]   ;;  %v7810_v63 = vld [vmem:[#allocation2 + $0x1e4] ss:$16 sps:$4 sm:$0xff]  }
  0x9c   : > { %2322 = vmatprep.subr.bf16.mxu0 %v7756_v24  ;;  %2534 = vmatprep.subr.bf16.mxu1 %v7758_v25  ;;  %v7812_v0 = vld [vmem:[#allocation2 + $0x1ec] ss:$16 sps:$4 sm:$0xff]   ;;  %v7814_v1 = vld [vmem:[#allocation2 + $0x1e0] ss:$16 sps:$4 sm:$0xff]   ;;  %v7815_v2 = vld [vmem:[#allocation2 + $0x1e8] ss:$16 sps:$4 sm:$0xff]   ;;  %s9386_s12 = scalar_lea.vmem %s9457_s14, %s7416_s19 }
  0x9d   : > { %v7818_v3 = vld [vmem:[#allocation2 + $0x204] ss:$16 sps:$4 sm:$0xff]   ;;  %v7821_v4 = vld [vmem:[#allocation2 + $0x20c] ss:$16 sps:$4 sm:$0xff]   ;;  %v7816_v6 = vld [vmem:[#allocation2 + $0x200] ss:$16 sps:$4 sm:$0xff]  }
  0x9e   : > { %v7819_v7 = vld [vmem:[#allocation2 + $0x208] ss:$16 sps:$4 sm:$0xff]   ;;  %v7824_v8 = vld [vmem:[#allocation2 + $0x224] ss:$16 sps:$4 sm:$0xff]   ;;  %v7827_v9 = vld [vmem:[#allocation2 + $0x22c] ss:$16 sps:$4 sm:$0xff]  }
  0x9f   : > { %2323 = vmatpush1.bf16.msra.mxu0 %v7760_v26  ;;  %2535 = vmatpush1.bf16.msra.mxu1 %v7761_v27  ;;  %v7822_v10 = vld [vmem:[#allocation2 + $0x220] ss:$16 sps:$4 sm:$0xff]   ;;  %v7825_v11 = vld [vmem:[#allocation2 + $0x228] ss:$16 sps:$4 sm:$0xff]   ;;  %v7830_v12 = vld [vmem:[#allocation2 + $0x244] ss:$16 sps:$4 sm:$0xff]  }
  0xa0   : > { %2324 = vmatprep.subr.bf16.mxu0 %v7762_v28  ;;  %2536 = vmatprep.subr.bf16.mxu1 %v7764_v29  ;;  %v7833_v13 = vld [vmem:[#allocation2 + $0x24c] ss:$16 sps:$4 sm:$0xff]   ;;  %v7828_v14 = vld [vmem:[#allocation2 + $0x240] ss:$16 sps:$4 sm:$0xff]   ;;  %v7831_v15 = vld [vmem:[#allocation2 + $0x248] ss:$16 sps:$4 sm:$0xff]  }
  0xa1   : > { %v7836_v16 = vld [vmem:[#allocation2 + $0x264] ss:$16 sps:$4 sm:$0xff]   ;;  %v7839_v17 = vld [vmem:[#allocation2 + $0x26c] ss:$16 sps:$4 sm:$0xff]   ;;  %v7834_v18 = vld [vmem:[#allocation2 + $0x260] ss:$16 sps:$4 sm:$0xff]  }
  0xa2   : > { %v7837_v19 = vld [vmem:[#allocation2 + $0x268] ss:$16 sps:$4 sm:$0xff]   ;;  %v7842_v20 = vld [vmem:[#allocation2 + $0x284] ss:$16 sps:$4 sm:$0xff]   ;;  %v7845_v21 = vld [vmem:[#allocation2 + $0x28c] ss:$16 sps:$4 sm:$0xff]  }
  0xa3   : > { %2325 = vmatpush1.bf16.msra.mxu0 %v7766_v30  ;;  %2537 = vmatpush1.bf16.msra.mxu1 %v7767_v31  ;;  %v7840_v22 = vld [vmem:[#allocation2 + $0x280] ss:$16 sps:$4 sm:$0xff]   ;;  %v7843_v23 = vld [vmem:[#allocation2 + $0x288] ss:$16 sps:$4 sm:$0xff]   ;;  %v7848_v24 = vld [vmem:[#allocation2 + $0x2a4] ss:$16 sps:$4 sm:$0xff]  }
  0xa4   : > { %2326 = vmatprep.subr.bf16.mxu0 %v7768_v32  ;;  %2538 = vmatprep.subr.bf16.mxu1 %v7770_v33  ;;  %v7851_v25 = vld [vmem:[#allocation2 + $0x2ac] ss:$16 sps:$4 sm:$0xff]   ;;  %v664_v26 = vld [vmem:[%s8852_s25 + $0x40] sm:$0xff]  ;;  %v7849_v30 = vld [vmem:[#allocation2 + $0x2a8] ss:$16 sps:$4 sm:$0xff]  }
  0xa5   : > { %v668_v27 = vld [vmem:[%s8852_s25 + $0x60] sm:$0xff]  ;;  %v7857_v33 = vld [vmem:[#allocation2 + $0x2cc] ss:$16 sps:$4 sm:$0xff]   ;;  %v7867_v46 = vld [vmem:[#allocation2 + $0x308] ss:$16 sps:$4 sm:$0xff]  }
  0xa6   : > { %v6700_v28 = vcombine.high %v664_v26, %v668_v27  ;;  %v7846_v29 = vld [vmem:[#allocation2 + $0x2a0] ss:$16 sps:$4 sm:$0xff]   ;;  %v6699_v31 = vcombine.low %v664_v26, %v668_v27  ;;  %v7854_v32 = vld [vmem:[#allocation2 + $0x2c4] ss:$16 sps:$4 sm:$0xff]   ;;  %v7873_v50 = vld [vmem:[#allocation2 + $0x328] ss:$16 sps:$4 sm:$0xff]  }
  0xa7   : > { %2327 = vmatpush1.bf16.msra.mxu0 %v7772_v34  ;;  %2539 = vmatpush1.bf16.msra.mxu1 %v7773_v35  ;;  %v8859_v34 = vld [vmem:[%s8852_s25 + $0x8] sm:$0xff]  ;;  %v7872_v47 = vld [vmem:[#allocation2 + $0x324] ss:$16 sps:$4 sm:$0xff]  }
  0xa8   : > { %2328 = vmatprep.subr.bf16.mxu0 %v7774_v36  ;;  %2540 = vmatprep.subr.bf16.mxu1 %v7776_v37  ;;  %v8862_v35 = vld [vmem:[%s8852_s25 + $0x28] sm:$0xff]  ;;  %v7852_v36 = vld [vmem:[#allocation2 + $0x2c0] ss:$16 sps:$4 sm:$0xff]  }
  0xa9   : > { %v7855_v37 = vld [vmem:[#allocation2 + $0x2c8] ss:$16 sps:$4 sm:$0xff]   ;;  %v8874_v27 = vld [vmem:[%s8852_s25 + $0x30] sm:$0xff] }
  0xab   : > { %2329 = vmatpush1.bf16.msra.mxu0 %v7778_v38  ;;  %2541 = vmatpush1.bf16.msra.mxu1 %v7779_v39  ;;  %v6694_v38 = vcombine.high %v8859_v34, %v8862_v35  ;;  %v7860_v39 = vld [vmem:[#allocation2 + $0x2e4] ss:$16 sps:$4 sm:$0xff]  }
  0xac   : > { %2330 = vmatprep.subr.bf16.mxu0 %v7780_v40  ;;  %2542 = vmatprep.subr.bf16.mxu1 %v7782_v41  ;;  %v7863_v40 = vld [vmem:[#allocation2 + $0x2ec] ss:$16 sps:$4 sm:$0xff]   ;;  %v7858_v41 = vld [vmem:[#allocation2 + $0x2e0] ss:$16 sps:$4 sm:$0xff]  }
  0xaf   : > { %2331 = vmatpush1.bf16.msra.mxu0 %v7784_v42  ;;  %2543 = vmatpush1.bf16.msra.mxu1 %v7785_v43  ;;  %v7861_v42 = vld [vmem:[#allocation2 + $0x2e8] ss:$16 sps:$4 sm:$0xff]   ;;  %v7866_v43 = vld [vmem:[#allocation2 + $0x304] ss:$16 sps:$4 sm:$0xff]  }
  0xb0   : > { %2332 = vmatprep.subr.bf16.mxu0 %v7786_v44  ;;  %2544 = vmatprep.subr.bf16.mxu1 %v7788_v45  ;;  %v7869_v44 = vld [vmem:[#allocation2 + $0x30c] ss:$16 sps:$4 sm:$0xff]   ;;  %v7864_v45 = vld [vmem:[#allocation2 + $0x300] ss:$16 sps:$4 sm:$0xff]  }
  0xb3   : > { %2333 = vmatpush1.bf16.msra.mxu0 %v7790_v48  ;;  %2545 = vmatpush1.bf16.msra.mxu1 %v7791_v49  ;;  %v7875_v48 = vld [vmem:[#allocation2 + $0x32c] ss:$16 sps:$4 sm:$0xff]   ;;  %v7870_v49 = vld [vmem:[#allocation2 + $0x320] ss:$16 sps:$4 sm:$0xff]  }
  0xb4   : > { %2334 = vmatprep.subr.bf16.mxu0 %v7792_v51  ;;  %2546 = vmatprep.subr.bf16.mxu1 %v7794_v52  ;;  %v7878_v51 = vld [vmem:[#allocation2 + $0x344] ss:$16 sps:$4 sm:$0xff]   ;;  %v7881_v52 = vld [vmem:[#allocation2 + $0x34c] ss:$16 sps:$4 sm:$0xff]  }
  0xb7   : > { %2335 = vmatpush1.bf16.msra.mxu0 %v7796_v53  ;;  %2547 = vmatpush1.bf16.msra.mxu1 %v7797_v54  ;;  %v7876_v53 = vld [vmem:[#allocation2 + $0x340] ss:$16 sps:$4 sm:$0xff]   ;;  %v7879_v54 = vld [vmem:[#allocation2 + $0x348] ss:$16 sps:$4 sm:$0xff]  }
  0xb8   : > { %2336 = vmatprep.subr.bf16.mxu0 %v7798_v55  ;;  %2548 = vmatprep.subr.bf16.mxu1 %v7800_v56  ;;  %v7884_v55 = vld [vmem:[#allocation2 + $0x364] ss:$16 sps:$4 sm:$0xff]   ;;  %v7887_v56 = vld [vmem:[#allocation2 + $0x36c] ss:$16 sps:$4 sm:$0xff]  }
  0xbb   : > { %2337 = vmatpush1.bf16.msra.mxu0 %v7802_v57  ;;  %2549 = vmatpush1.bf16.msra.mxu1 %v7803_v58  ;;  %v7882_v57 = vld [vmem:[#allocation2 + $0x360] ss:$16 sps:$4 sm:$0xff]   ;;  %v7885_v58 = vld [vmem:[#allocation2 + $0x368] ss:$16 sps:$4 sm:$0xff]  }
  0xbc   : > { %2338 = vmatprep.subr.bf16.mxu0 %v7804_v59  ;;  %2550 = vmatprep.subr.bf16.mxu1 %v7806_v60  ;;  %v7890_v59 = vld [vmem:[#allocation2 + $0x384] ss:$16 sps:$4 sm:$0xff]   ;;  %v7893_v60 = vld [vmem:[#allocation2 + $0x38c] ss:$16 sps:$4 sm:$0xff]  }
  0xbf   : > { %2339 = vmatpush1.bf16.msra.mxu0 %v7808_v61  ;;  %2551 = vmatpush1.bf16.msra.mxu1 %v7809_v62  ;;  %v7888_v61 = vld [vmem:[#allocation2 + $0x380] ss:$16 sps:$4 sm:$0xff]   ;;  %v7891_v62 = vld [vmem:[#allocation2 + $0x388] ss:$16 sps:$4 sm:$0xff]  }
  0xc0   : > { %2340 = vmatprep.subr.bf16.mxu0 %v7810_v63  ;;  %2552 = vmatprep.subr.bf16.mxu1 %v7812_v0  ;;  %v7896_v63 = vld [vmem:[#allocation2 + $0x3a4] ss:$16 sps:$4 sm:$0xff]   ;;  %v7899_v0 = vld [vmem:[#allocation2 + $0x3ac] ss:$16 sps:$4 sm:$0xff]  }
  0xc3   : > { %2341 = vmatpush1.bf16.msra.mxu0 %v7814_v1  ;;  %2553 = vmatpush1.bf16.msra.mxu1 %v7815_v2  ;;  %v7894_v1 = vld [vmem:[#allocation2 + $0x3a0] ss:$16 sps:$4 sm:$0xff]   ;;  %v7897_v2 = vld [vmem:[#allocation2 + $0x3a8] ss:$16 sps:$4 sm:$0xff]  }
  0xc4   : > { %2363 = vmatprep.subr.bf16.mxu0 %v7818_v3  ;;  %2575 = vmatprep.subr.bf16.mxu1 %v7821_v4  ;;  %v7902_v3 = vld [vmem:[#allocation2 + $0x3c4] ss:$16 sps:$4 sm:$0xff]   ;;  %v7905_v4 = vld [vmem:[#allocation2 + $0x3cc] ss:$16 sps:$4 sm:$0xff]  }
  0xc6   : > { %2343 = vmatmul.mubr.bf16.vlgmr.msra.gmra.mrb[0].mxu0 %v6691_v5  ;;  %2555 = vmatmul.mubr.bf16.vlgmr.msra.gmra.mrb[0].mxu1 %v6691_v5  ;;  %v7900_v5 = vld [vmem:[#allocation2 + $0x3c0] ss:$16 sps:$4 sm:$0xff]  }
  0xc7   : > { %2364 = vmatpush1.bf16.msra.mxu0 %v7816_v6  ;;  %2576 = vmatpush1.bf16.msra.mxu1 %v7819_v7  ;;  %v7903_v6 = vld [vmem:[#allocation2 + $0x3c8] ss:$16 sps:$4 sm:$0xff]   ;;  %v7908_v7 = vld [vmem:[#allocation2 + $0x3e4] ss:$16 sps:$4 sm:$0xff]  }
  0xc8   : > { %2365 = vmatprep.subr.bf16.mxu0 %v7824_v8  ;;  %2577 = vmatprep.subr.bf16.mxu1 %v7827_v9  ;;  %v7911_v8 = vld [vmem:[#allocation2 + $0x3ec] ss:$16 sps:$4 sm:$0xff]   ;;  %v7906_v9 = vld [vmem:[#allocation2 + $0x3e0] ss:$16 sps:$4 sm:$0xff]  }
  0xc9   : > { %2352 = vmatprep.mubr.bf16.mxu0 %v6700_v28  ;;  %2564 = vmatprep.mubr.bf16.mxu1 %v6700_v28  ;;  %v7924_v28 = vld [vmem:[#allocation2 + $0x440] ss:$16 sps:$4 sm:$0xff]  }
  0xcb   : > { %2366 = vmatpush1.bf16.msra.mxu0 %v7822_v10  ;;  %2578 = vmatpush1.bf16.msra.mxu1 %v7825_v11  ;;  %v7909_v10 = vld [vmem:[#allocation2 + $0x3e8] ss:$16 sps:$4 sm:$0xff]   ;;  %v7914_v11 = vld [vmem:[#allocation2 + $0x404] ss:$16 sps:$4 sm:$0xff]  }
  0xcc   : > { %2367 = vmatprep.subr.bf16.mxu0 %v7830_v12  ;;  %2579 = vmatprep.subr.bf16.mxu1 %v7833_v13  ;;  %v7917_v12 = vld [vmem:[#allocation2 + $0x40c] ss:$16 sps:$4 sm:$0xff]   ;;  %v7912_v13 = vld [vmem:[#allocation2 + $0x400] ss:$16 sps:$4 sm:$0xff]  }
  0xce   : > { %2353 = vmatmul.mubr.bf16.gmra.mrb[4].mxu0 %v6699_v31  ;;  %2565 = vmatmul.mubr.bf16.gmra.mrb[4].mxu1 %v6699_v31  ;;  %v7935_v31 = vld [vmem:[#allocation2 + $0x46c] ss:$16 sps:$4 sm:$0xff]  }
  0xcf   : > { %2368 = vmatpush1.bf16.msra.mxu0 %v7828_v14  ;;  %2580 = vmatpush1.bf16.msra.mxu1 %v7831_v15  ;;  %v7915_v14 = vld [vmem:[#allocation2 + $0x408] ss:$16 sps:$4 sm:$0xff]   ;;  %v6693_v15 = vcombine.low %v8859_v34, %v8862_v35  ;;  %v7938_v35 = vld [vmem:[#allocation2 + $0x484] ss:$16 sps:$4 sm:$0xff]  }
  0xd0   : > { %2369 = vmatprep.subr.bf16.mxu0 %v7836_v16  ;;  %2581 = vmatprep.subr.bf16.mxu1 %v7839_v17  ;;  %v665_v16 = vld [vmem:[%s8852_s25 + $0x48] sm:$0xff] }
  0xd1   : > { %2395 = vmatprep.mubr.bf16.mxu0 %v6694_v38  ;;  %2607 = vmatprep.mubr.bf16.mxu1 %v6694_v38  ;;  %v669_v17 = vld [vmem:[%s8852_s25 + $0x68] sm:$0xff] }
  0xd2   : > { %v6701_v26 = vcombine.low %v665_v16, %v669_v17  ;;  %v7933_v34 = vld [vmem:[#allocation2 + $0x468] ss:$16 sps:$4 sm:$0xff]  }
  0xd3   : > { %2370 = vmatpush1.bf16.msra.mxu0 %v7834_v18  ;;  %2582 = vmatpush1.bf16.msra.mxu1 %v7837_v19  ;;  %v7920_v18 = vld [vmem:[#allocation2 + $0x424] ss:$16 sps:$4 sm:$0xff]   ;;  %v7923_v19 = vld [vmem:[#allocation2 + $0x42c] ss:$16 sps:$4 sm:$0xff]   ;;  %v7939_v38 = vld [vmem:[#allocation2 + $0x488] ss:$16 sps:$4 sm:$0xff]  }
  0xd4   : > { %2371 = vmatprep.subr.bf16.mxu0 %v7842_v20  ;;  %2583 = vmatprep.subr.bf16.mxu1 %v7845_v21  ;;  %v6702_v20 = vcombine.high %v665_v16, %v669_v17  ;;  %v7918_v21 = vld [vmem:[#allocation2 + $0x420] ss:$16 sps:$4 sm:$0xff]   ;;  %v8007_v16 = vld [vmem:[#allocation2 + $0x5ec] ss:$16 sps:$4 sm:$0xff]  }
  0xd5   : > { %v8002_v17 = vld [vmem:[#allocation2 + $0x5e0] ss:$16 sps:$4 sm:$0xff]  }
  0xd7   : > { %2372 = vmatpush1.bf16.msra.mxu0 %v7840_v22  ;;  %2584 = vmatpush1.bf16.msra.mxu1 %v7843_v23  ;;  %v7921_v22 = vld [vmem:[#allocation2 + $0x428] ss:$16 sps:$4 sm:$0xff]   ;;  %v7926_v23 = vld [vmem:[#allocation2 + $0x444] ss:$16 sps:$4 sm:$0xff]  }
  0xd8   : > { %2373 = vmatprep.subr.bf16.mxu0 %v7848_v24  ;;  %2585 = vmatprep.subr.bf16.mxu1 %v7851_v25  ;;  %v7929_v24 = vld [vmem:[#allocation2 + $0x44c] ss:$16 sps:$4 sm:$0xff]   ;;  %v8871_v25 = vld [vmem:[%s8852_s25 + $0x10] sm:$0xff] }
  0xdb   : > { %2374 = vmatpush1.bf16.msra.mxu0 %v7846_v29  ;;  %2586 = vmatpush1.bf16.msra.mxu1 %v7849_v30  ;;  %v7927_v29 = vld [vmem:[#allocation2 + $0x448] ss:$16 sps:$4 sm:$0xff]   ;;  %v7932_v30 = vld [vmem:[#allocation2 + $0x464] ss:$16 sps:$4 sm:$0xff]  }
  0xdc   : > { %2375 = vmatprep.subr.bf16.mxu0 %v7854_v32  ;;  %2587 = vmatprep.subr.bf16.mxu1 %v7857_v33  ;;  %v6696_v32 = vcombine.high %v8871_v25, %v8874_v27  ;;  %v7930_v33 = vld [vmem:[#allocation2 + $0x460] ss:$16 sps:$4 sm:$0xff]  }
  0xdf   : > { %2376 = vmatpush1.bf16.msra.mxu0 %v7852_v36  ;;  %2588 = vmatpush1.bf16.msra.mxu1 %v7855_v37  ;;  %v7941_v36 = vld [vmem:[#allocation2 + $0x48c] ss:$16 sps:$4 sm:$0xff]   ;;  %v7936_v37 = vld [vmem:[#allocation2 + $0x480] ss:$16 sps:$4 sm:$0xff]  }
  0xe0   : > { %2377 = vmatprep.subr.bf16.mxu0 %v7860_v39  ;;  %2589 = vmatprep.subr.bf16.mxu1 %v7863_v40  ;;  %v7944_v39 = vld [vmem:[#allocation2 + $0x4a4] ss:$16 sps:$4 sm:$0xff]   ;;  %v7947_v40 = vld [vmem:[#allocation2 + $0x4ac] ss:$16 sps:$4 sm:$0xff]  }
  0xe3   : > { %2378 = vmatpush1.bf16.msra.mxu0 %v7858_v41  ;;  %2590 = vmatpush1.bf16.msra.mxu1 %v7861_v42  ;;  %v7942_v41 = vld [vmem:[#allocation2 + $0x4a0] ss:$16 sps:$4 sm:$0xff]   ;;  %v7945_v42 = vld [vmem:[#allocation2 + $0x4a8] ss:$16 sps:$4 sm:$0xff]  }
  0xe4   : > { %2379 = vmatprep.subr.bf16.mxu0 %v7866_v43  ;;  %2591 = vmatprep.subr.bf16.mxu1 %v7869_v44  ;;  %v7950_v43 = vld [vmem:[#allocation2 + $0x4c4] ss:$16 sps:$4 sm:$0xff]   ;;  %v7953_v44 = vld [vmem:[#allocation2 + $0x4cc] ss:$16 sps:$4 sm:$0xff]  }
  0xe7   : > { %2380 = vmatpush1.bf16.msra.mxu0 %v7864_v45  ;;  %2592 = vmatpush1.bf16.msra.mxu1 %v7867_v46  ;;  %v7948_v45 = vld [vmem:[#allocation2 + $0x4c0] ss:$16 sps:$4 sm:$0xff]   ;;  %v7951_v46 = vld [vmem:[#allocation2 + $0x4c8] ss:$16 sps:$4 sm:$0xff]  }
  0xe8   : > { %2381 = vmatprep.subr.bf16.mxu0 %v7872_v47  ;;  %2593 = vmatprep.subr.bf16.mxu1 %v7875_v48  ;;  %v7956_v47 = vld [vmem:[#allocation2 + $0x4e4] ss:$16 sps:$4 sm:$0xff]   ;;  %v7959_v48 = vld [vmem:[#allocation2 + $0x4ec] ss:$16 sps:$4 sm:$0xff]  }
  0xeb   : > { %2382 = vmatpush1.bf16.msra.mxu0 %v7870_v49  ;;  %2594 = vmatpush1.bf16.msra.mxu1 %v7873_v50  ;;  %v7954_v49 = vld [vmem:[#allocation2 + $0x4e0] ss:$16 sps:$4 sm:$0xff]   ;;  %v7957_v50 = vld [vmem:[#allocation2 + $0x4e8] ss:$16 sps:$4 sm:$0xff]  }
  0xec   : > { %2383 = vmatprep.subr.bf16.mxu0 %v7878_v51  ;;  %2595 = vmatprep.subr.bf16.mxu1 %v7881_v52  ;;  %v7962_v51 = vld [vmem:[#allocation2 + $0x504] ss:$16 sps:$4 sm:$0xff]   ;;  %v7965_v52 = vld [vmem:[#allocation2 + $0x50c] ss:$16 sps:$4 sm:$0xff]  }
  0xef   : > { %2384 = vmatpush1.bf16.msra.mxu0 %v7876_v53  ;;  %2596 = vmatpush1.bf16.msra.mxu1 %v7879_v54  ;;  %v7960_v53 = vld [vmem:[#allocation2 + $0x500] ss:$16 sps:$4 sm:$0xff]   ;;  %v7963_v54 = vld [vmem:[#allocation2 + $0x508] ss:$16 sps:$4 sm:$0xff]  }
  0xf0   : > { %2385 = vmatprep.subr.bf16.mxu0 %v7884_v55  ;;  %2597 = vmatprep.subr.bf16.mxu1 %v7887_v56  ;;  %v7968_v55 = vld [vmem:[#allocation2 + $0x524] ss:$16 sps:$4 sm:$0xff]   ;;  %v7971_v56 = vld [vmem:[#allocation2 + $0x52c] ss:$16 sps:$4 sm:$0xff]  }
  0xf3   : > { %2386 = vmatpush1.bf16.msra.mxu0 %v7882_v57  ;;  %2598 = vmatpush1.bf16.msra.mxu1 %v7885_v58  ;;  %v7966_v57 = vld [vmem:[#allocation2 + $0x520] ss:$16 sps:$4 sm:$0xff]   ;;  %v7969_v58 = vld [vmem:[#allocation2 + $0x528] ss:$16 sps:$4 sm:$0xff]  }
  0xf4   : > { %2387 = vmatprep.subr.bf16.mxu0 %v7890_v59  ;;  %2599 = vmatprep.subr.bf16.mxu1 %v7893_v60  ;;  %v7974_v59 = vld [vmem:[#allocation2 + $0x544] ss:$16 sps:$4 sm:$0xff]   ;;  %v7977_v60 = vld [vmem:[#allocation2 + $0x54c] ss:$16 sps:$4 sm:$0xff]  }
  0xf7   : > { %2388 = vmatpush1.bf16.msra.mxu0 %v7888_v61  ;;  %2600 = vmatpush1.bf16.msra.mxu1 %v7891_v62  ;;  %v7972_v61 = vld [vmem:[#allocation2 + $0x540] ss:$16 sps:$4 sm:$0xff]   ;;  %v7975_v62 = vld [vmem:[#allocation2 + $0x548] ss:$16 sps:$4 sm:$0xff]  }
  0xf8   : > { %2389 = vmatprep.subr.bf16.mxu0 %v7896_v63  ;;  %2601 = vmatprep.subr.bf16.mxu1 %v7899_v0  ;;  %v7980_v63 = vld [vmem:[#allocation2 + $0x564] ss:$16 sps:$4 sm:$0xff]   ;;  %v7983_v0 = vld [vmem:[#allocation2 + $0x56c] ss:$16 sps:$4 sm:$0xff]  }
  0xfb   : > { %2390 = vmatpush1.bf16.msra.mxu0 %v7894_v1  ;;  %2602 = vmatpush1.bf16.msra.mxu1 %v7897_v2  ;;  %v7978_v1 = vld [vmem:[#allocation2 + $0x560] ss:$16 sps:$4 sm:$0xff]   ;;  %v7981_v2 = vld [vmem:[#allocation2 + $0x568] ss:$16 sps:$4 sm:$0xff]  }
  0xfc   : > { %2391 = vmatprep.subr.bf16.mxu0 %v7902_v3  ;;  %2603 = vmatprep.subr.bf16.mxu1 %v7905_v4  ;;  %v7986_v3 = vld [vmem:[#allocation2 + $0x584] ss:$16 sps:$4 sm:$0xff]   ;;  %v7989_v4 = vld [vmem:[#allocation2 + $0x58c] ss:$16 sps:$4 sm:$0xff]  }
  0xff   : > { %2392 = vmatpush1.bf16.msra.mxu0 %v7900_v5  ;;  %2604 = vmatpush1.bf16.msra.mxu1 %v7903_v6  ;;  %v7984_v5 = vld [vmem:[#allocation2 + $0x580] ss:$16 sps:$4 sm:$0xff]   ;;  %v7987_v6 = vld [vmem:[#allocation2 + $0x588] ss:$16 sps:$4 sm:$0xff]  }
 0x100   : > { %2393 = vmatprep.subr.bf16.mxu0 %v7908_v7  ;;  %2605 = vmatprep.subr.bf16.mxu1 %v7911_v8  ;;  %v7992_v7 = vld [vmem:[#allocation2 + $0x5a4] ss:$16 sps:$4 sm:$0xff]   ;;  %v7995_v8 = vld [vmem:[#allocation2 + $0x5ac] ss:$16 sps:$4 sm:$0xff]  }
 0x103   : > { %2394 = vmatpush1.bf16.msra.mxu0 %v7906_v9  ;;  %2606 = vmatpush1.bf16.msra.mxu1 %v7909_v10  ;;  %v7990_v9 = vld [vmem:[#allocation2 + $0x5a0] ss:$16 sps:$4 sm:$0xff]   ;;  %v7993_v10 = vld [vmem:[#allocation2 + $0x5a8] ss:$16 sps:$4 sm:$0xff]  }
 0x104   : > { %2416 = vmatprep.subr.bf16.mxu0 %v7914_v11  ;;  %2628 = vmatprep.subr.bf16.mxu1 %v7917_v12  ;;  %v7998_v11 = vld [vmem:[#allocation2 + $0x5c4] ss:$16 sps:$4 sm:$0xff]   ;;  %v8001_v12 = vld [vmem:[#allocation2 + $0x5cc] ss:$16 sps:$4 sm:$0xff]  }
 0x106   : > { %2396 = vmatmul.mubr.bf16.vlgmr.msra.gmra.mrb[0].mxu0 %v6693_v15  ;;  %2608 = vmatmul.mubr.bf16.vlgmr.msra.gmra.mrb[0].mxu1 %v6693_v15  ;;  %v8004_v15 = vld [vmem:[#allocation2 + $0x5e4] ss:$16 sps:$4 sm:$0xff]  }
 0x107   : > { %2417 = vmatpush1.bf16.msra.mxu0 %v7912_v13  ;;  %2629 = vmatpush1.bf16.msra.mxu1 %v7915_v14  ;;  %v7996_v13 = vld [vmem:[#allocation2 + $0x5c0] ss:$16 sps:$4 sm:$0xff]   ;;  %v7999_v14 = vld [vmem:[#allocation2 + $0x5c8] ss:$16 sps:$4 sm:$0xff]  }
 0x108   : > { %2418 = vmatprep.subr.bf16.mxu0 %v7920_v18  ;;  %2630 = vmatprep.subr.bf16.mxu1 %v7923_v19  ;;  %v8005_v18 = vld [vmem:[#allocation2 + $0x5e8] ss:$16 sps:$4 sm:$0xff]   ;;  %v8010_v19 = vld [vmem:[#allocation2 + $0x604] ss:$16 sps:$4 sm:$0xff]  }
 0x109   : > { %2405 = vmatprep.mubr.bf16.mxu0 %v6702_v20  ;;  %2617 = vmatprep.mubr.bf16.mxu1 %v6702_v20  ;;  %v8013_v20 = vld [vmem:[#allocation2 + $0x60c] ss:$16 sps:$4 sm:$0xff]  }
 0x10b   : > { %2419 = vmatpush1.bf16.msra.mxu0 %v7918_v21  ;;  %2631 = vmatpush1.bf16.msra.mxu1 %v7921_v22  ;;  %v8008_v21 = vld [vmem:[#allocation2 + $0x600] ss:$16 sps:$4 sm:$0xff]   ;;  %v8011_v22 = vld [vmem:[#allocation2 + $0x608] ss:$16 sps:$4 sm:$0xff]  }
 0x10c   : > { %2420 = vmatprep.subr.bf16.mxu0 %v7926_v23  ;;  %2632 = vmatprep.subr.bf16.mxu1 %v7929_v24  ;;  %v6695_v23 = vcombine.low %v8871_v25, %v8874_v27  ;;  %v8016_v24 = vld [vmem:[#allocation2 + $0x624] ss:$16 sps:$4 sm:$0xff]   ;;  %v8883_v25 = vld [vmem:[%s8852_s25 + $0x18] sm:$0xff] }
 0x10d   : > { %v8886_v27 = vld [vmem:[%s8852_s25 + $0x38] sm:$0xff] }
 0x10e   : > { %2406 = vmatmul.mubr.bf16.gmra.mrb[4].mxu0 %v6701_v26  ;;  %2618 = vmatmul.mubr.bf16.gmra.mrb[4].mxu1 %v6701_v26  ;;  %v666_v26 = vld [vmem:[%s8852_s25 + $0x50] sm:$0xff] }
 0x10f   : > { %2421 = vmatpush1.bf16.msra.mxu0 %v7924_v28  ;;  %2633 = vmatpush1.bf16.msra.mxu1 %v7927_v29  ;;  %v670_v28 = vld [vmem:[%s8852_s25 + $0x70] sm:$0xff]  ;;  %v8019_v29 = vld [vmem:[#allocation2 + $0x62c] ss:$16 sps:$4 sm:$0xff]  }
 0x110   : > { %2422 = vmatprep.subr.bf16.mxu0 %v7932_v30  ;;  %2634 = vmatprep.subr.bf16.mxu1 %v7935_v31  ;;  %v8014_v30 = vld [vmem:[#allocation2 + $0x620] ss:$16 sps:$4 sm:$0xff]   ;;  %v8017_v31 = vld [vmem:[#allocation2 + $0x628] ss:$16 sps:$4 sm:$0xff]  }
 0x111   : > { %2448 = vmatprep.mubr.bf16.mxu0 %v6696_v32  ;;  %2660 = vmatprep.mubr.bf16.mxu1 %v6696_v32  ;;  %v6704_v32 = vcombine.high %v666_v26, %v670_v28 }
 0x113   : > { %2423 = vmatpush1.bf16.msra.mxu0 %v7930_v33  ;;  %2635 = vmatpush1.bf16.msra.mxu1 %v7933_v34  ;;  %v8022_v33 = vld [vmem:[#allocation2 + $0x644] ss:$16 sps:$4 sm:$0xff]   ;;  %v8025_v34 = vld [vmem:[#allocation2 + $0x64c] ss:$16 sps:$4 sm:$0xff]  }
 0x114   : > { %2424 = vmatprep.subr.bf16.mxu0 %v7938_v35  ;;  %2636 = vmatprep.subr.bf16.mxu1 %v7941_v36  ;;  %v8020_v35 = vld [vmem:[#allocation2 + $0x640] ss:$16 sps:$4 sm:$0xff]   ;;  %v8023_v36 = vld [vmem:[#allocation2 + $0x648] ss:$16 sps:$4 sm:$0xff]  }
 0x117   : > { %2425 = vmatpush1.bf16.msra.mxu0 %v7936_v37  ;;  %2637 = vmatpush1.bf16.msra.mxu1 %v7939_v38  ;;  %v8028_v37 = vld [vmem:[#allocation2 + $0x664] ss:$16 sps:$4 sm:$0xff]   ;;  %v8031_v38 = vld [vmem:[#allocation2 + $0x66c] ss:$16 sps:$4 sm:$0xff]  }
 0x118   : > { %2426 = vmatprep.subr.bf16.mxu0 %v7944_v39  ;;  %2638 = vmatprep.subr.bf16.mxu1 %v7947_v40  ;;  %v6703_v39 = vcombine.low %v666_v26, %v670_v28  ;;  %v8026_v40 = vld [vmem:[#allocation2 + $0x660] ss:$16 sps:$4 sm:$0xff]   ;;  %v8101_v28 = vld [vmem:[#allocation2 + $0x7e8] ss:$16 sps:$4 sm:$0xff]  }
 0x119   : > { %v8098_v26 = vld [vmem:[#allocation2 + $0x7e0] ss:$16 sps:$4 sm:$0xff]  }
 0x11b   : > { %2427 = vmatpush1.bf16.msra.mxu0 %v7942_v41  ;;  %2639 = vmatpush1.bf16.msra.mxu1 %v7945_v42  ;;  %v8029_v41 = vld [vmem:[#allocation2 + $0x668] ss:$16 sps:$4 sm:$0xff]   ;;  %v6698_v42 = vcombine.high %v8883_v25, %v8886_v27 }
 0x11c   : > { %2428 = vmatprep.subr.bf16.mxu0 %v7950_v43  ;;  %2640 = vmatprep.subr.bf16.mxu1 %v7953_v44  ;;  %v8034_v43 = vld [vmem:[#allocation2 + $0x684] ss:$16 sps:$4 sm:$0xff]   ;;  %v8037_v44 = vld [vmem:[#allocation2 + $0x68c] ss:$16 sps:$4 sm:$0xff]  }
 0x11f   : > { %2429 = vmatpush1.bf16.msra.mxu0 %v7948_v45  ;;  %2641 = vmatpush1.bf16.msra.mxu1 %v7951_v46  ;;  %v8032_v45 = vld [vmem:[#allocation2 + $0x680] ss:$16 sps:$4 sm:$0xff]   ;;  %v8035_v46 = vld [vmem:[#allocation2 + $0x688] ss:$16 sps:$4 sm:$0xff]  }
 0x120   : > { %2430 = vmatprep.subr.bf16.mxu0 %v7956_v47  ;;  %2642 = vmatprep.subr.bf16.mxu1 %v7959_v48  ;;  %v8040_v47 = vld [vmem:[#allocation2 + $0x6a4] ss:$16 sps:$4 sm:$0xff]   ;;  %v8043_v48 = vld [vmem:[#allocation2 + $0x6ac] ss:$16 sps:$4 sm:$0xff]  }
 0x123   : > { %2431 = vmatpush1.bf16.msra.mxu0 %v7954_v49  ;;  %2643 = vmatpush1.bf16.msra.mxu1 %v7957_v50  ;;  %v8038_v49 = vld [vmem:[#allocation2 + $0x6a0] ss:$16 sps:$4 sm:$0xff]   ;;  %v8041_v50 = vld [vmem:[#allocation2 + $0x6a8] ss:$16 sps:$4 sm:$0xff]  }
 0x124   : > { %2432 = vmatprep.subr.bf16.mxu0 %v7962_v51  ;;  %2644 = vmatprep.subr.bf16.mxu1 %v7965_v52  ;;  %v8046_v51 = vld [vmem:[#allocation2 + $0x6c4] ss:$16 sps:$4 sm:$0xff]   ;;  %v8049_v52 = vld [vmem:[#allocation2 + $0x6cc] ss:$16 sps:$4 sm:$0xff]  }
 0x127   : > { %2433 = vmatpush1.bf16.msra.mxu0 %v7960_v53  ;;  %2645 = vmatpush1.bf16.msra.mxu1 %v7963_v54  ;;  %v8044_v53 = vld [vmem:[#allocation2 + $0x6c0] ss:$16 sps:$4 sm:$0xff]   ;;  %v8047_v54 = vld [vmem:[#allocation2 + $0x6c8] ss:$16 sps:$4 sm:$0xff]  }
 0x128   : > { %2434 = vmatprep.subr.bf16.mxu0 %v7968_v55  ;;  %2646 = vmatprep.subr.bf16.mxu1 %v7971_v56  ;;  %v8052_v55 = vld [vmem:[#allocation2 + $0x6e4] ss:$16 sps:$4 sm:$0xff]   ;;  %v8055_v56 = vld [vmem:[#allocation2 + $0x6ec] ss:$16 sps:$4 sm:$0xff]  }
 0x12b   : > { %2435 = vmatpush1.bf16.msra.mxu0 %v7966_v57  ;;  %2647 = vmatpush1.bf16.msra.mxu1 %v7969_v58  ;;  %v8050_v57 = vld [vmem:[#allocation2 + $0x6e0] ss:$16 sps:$4 sm:$0xff]   ;;  %v8053_v58 = vld [vmem:[#allocation2 + $0x6e8] ss:$16 sps:$4 sm:$0xff]  }
 0x12c   : > { %2436 = vmatprep.subr.bf16.mxu0 %v7974_v59  ;;  %2648 = vmatprep.subr.bf16.mxu1 %v7977_v60  ;;  %v8058_v59 = vld [vmem:[#allocation2 + $0x704] ss:$16 sps:$4 sm:$0xff]   ;;  %v8061_v60 = vld [vmem:[#allocation2 + $0x70c] ss:$16 sps:$4 sm:$0xff]  }
 0x12f   : > { %2437 = vmatpush1.bf16.msra.mxu0 %v7972_v61  ;;  %2649 = vmatpush1.bf16.msra.mxu1 %v7975_v62  ;;  %v8056_v61 = vld [vmem:[#allocation2 + $0x700] ss:$16 sps:$4 sm:$0xff]   ;;  %v8059_v62 = vld [vmem:[#allocation2 + $0x708] ss:$16 sps:$4 sm:$0xff]  }
 0x130   : > { %2438 = vmatprep.subr.bf16.mxu0 %v7980_v63  ;;  %2650 = vmatprep.subr.bf16.mxu1 %v7983_v0  ;;  %v8064_v63 = vld [vmem:[#allocation2 + $0x724] ss:$16 sps:$4 sm:$0xff]   ;;  %v8067_v0 = vld [vmem:[#allocation2 + $0x72c] ss:$16 sps:$4 sm:$0xff]  }
 0x133   : > { %2439 = vmatpush1.bf16.msra.mxu0 %v7978_v1  ;;  %2651 = vmatpush1.bf16.msra.mxu1 %v7981_v2  ;;  %v8062_v1 = vld [vmem:[#allocation2 + $0x720] ss:$16 sps:$4 sm:$0xff]   ;;  %v8065_v2 = vld [vmem:[#allocation2 + $0x728] ss:$16 sps:$4 sm:$0xff]  }
 0x134   : > { %2440 = vmatprep.subr.bf16.mxu0 %v7986_v3  ;;  %2652 = vmatprep.subr.bf16.mxu1 %v7989_v4  ;;  %v8070_v3 = vld [vmem:[#allocation2 + $0x744] ss:$16 sps:$4 sm:$0xff]   ;;  %v8073_v4 = vld [vmem:[#allocation2 + $0x74c] ss:$16 sps:$4 sm:$0xff]  }
 0x137   : > { %2441 = vmatpush1.bf16.msra.mxu0 %v7984_v5  ;;  %2653 = vmatpush1.bf16.msra.mxu1 %v7987_v6  ;;  %v8068_v5 = vld [vmem:[#allocation2 + $0x740] ss:$16 sps:$4 sm:$0xff]   ;;  %v8071_v6 = vld [vmem:[#allocation2 + $0x748] ss:$16 sps:$4 sm:$0xff]  }
 0x138   : > { %2442 = vmatprep.subr.bf16.mxu0 %v7992_v7  ;;  %2654 = vmatprep.subr.bf16.mxu1 %v7995_v8  ;;  %v8076_v7 = vld [vmem:[#allocation2 + $0x764] ss:$16 sps:$4 sm:$0xff]   ;;  %v8079_v8 = vld [vmem:[#allocation2 + $0x76c] ss:$16 sps:$4 sm:$0xff]  }
 0x13b   : > { %2443 = vmatpush1.bf16.msra.mxu0 %v7990_v9  ;;  %2655 = vmatpush1.bf16.msra.mxu1 %v7993_v10  ;;  %v8074_v9 = vld [vmem:[#allocation2 + $0x760] ss:$16 sps:$4 sm:$0xff]   ;;  %v8077_v10 = vld [vmem:[#allocation2 + $0x768] ss:$16 sps:$4 sm:$0xff]  }
 0x13c   : > { %2444 = vmatprep.subr.bf16.mxu0 %v7998_v11  ;;  %2656 = vmatprep.subr.bf16.mxu1 %v8001_v12  ;;  %v8082_v11 = vld [vmem:[#allocation2 + $0x784] ss:$16 sps:$4 sm:$0xff]   ;;  %v8085_v12 = vld [vmem:[#allocation2 + $0x78c] ss:$16 sps:$4 sm:$0xff]  }
 0x13f   : > { %2445 = vmatpush1.bf16.msra.mxu0 %v7996_v13  ;;  %2657 = vmatpush1.bf16.msra.mxu1 %v7999_v14  ;;  %v8080_v13 = vld [vmem:[#allocation2 + $0x780] ss:$16 sps:$4 sm:$0xff]   ;;  %v8083_v14 = vld [vmem:[#allocation2 + $0x788] ss:$16 sps:$4 sm:$0xff]  }
 0x140   : > { %2446 = vmatprep.subr.bf16.mxu0 %v8004_v15  ;;  %2658 = vmatprep.subr.bf16.mxu1 %v8007_v16  ;;  %v8088_v15 = vld [vmem:[#allocation2 + $0x7a4] ss:$16 sps:$4 sm:$0xff]   ;;  %v8091_v16 = vld [vmem:[#allocation2 + $0x7ac] ss:$16 sps:$4 sm:$0xff]  }
 0x143   : > { %2447 = vmatpush1.bf16.msra.mxu0 %v8002_v17  ;;  %2659 = vmatpush1.bf16.msra.mxu1 %v8005_v18  ;;  %v8086_v17 = vld [vmem:[#allocation2 + $0x7a0] ss:$16 sps:$4 sm:$0xff]   ;;  %v8089_v18 = vld [vmem:[#allocation2 + $0x7a8] ss:$16 sps:$4 sm:$0xff]  }
 0x144   : > { %2469 = vmatprep.subr.bf16.mxu0 %v8010_v19  ;;  %2681 = vmatprep.subr.bf16.mxu1 %v8013_v20  ;;  %v8094_v19 = vld [vmem:[#allocation2 + $0x7c4] ss:$16 sps:$4 sm:$0xff]   ;;  %v8097_v20 = vld [vmem:[#allocation2 + $0x7cc] ss:$16 sps:$4 sm:$0xff]  }
 0x146   : > { %2449 = vmatmul.mubr.bf16.vlgmr.msra.gmra.mrb[0].mxu0 %v6695_v23  ;;  %2661 = vmatmul.mubr.bf16.vlgmr.msra.gmra.mrb[0].mxu1 %v6695_v23  ;;  %v8100_v23 = vld [vmem:[#allocation2 + $0x7e4] ss:$16 sps:$4 sm:$0xff]  }
 0x147   : > { %2470 = vmatpush1.bf16.msra.mxu0 %v8008_v21  ;;  %2682 = vmatpush1.bf16.msra.mxu1 %v8011_v22  ;;  %v8092_v21 = vld [vmem:[#allocation2 + $0x7c0] ss:$16 sps:$4 sm:$0xff]   ;;  %v8095_v22 = vld [vmem:[#allocation2 + $0x7c8] ss:$16 sps:$4 sm:$0xff]  }
 0x148   : > { %2471 = vmatprep.subr.bf16.mxu0 %v8016_v24  ;;  %2683 = vmatprep.subr.bf16.mxu1 %v8019_v29  ;;  %v8103_v24 = vld [vmem:[#allocation2 + $0x7ec] ss:$16 sps:$4 sm:$0xff]  }
 0x149   : > { %2458 = vmatprep.mubr.bf16.mxu0 %v6704_v32  ;;  %2670 = vmatprep.mubr.bf16.mxu1 %v6704_v32  ;;  %v667_v29 = vld [vmem:[%s8852_s25 + $0x58] sm:$0xff]  ;;  %v6697_v32 = vcombine.low %v8883_v25, %v8886_v27  ;;  %v8112_v27 = vld [vmem:[%s9414_s3 + $0x24] ss:$8 sps:$4 sm:$0xff]  }
 0x14a   : > { %v8107_v25 = vld [vmem:[%s9414_s3 + $0x10] ss:$8 sps:$4 sm:$0xff]  }
 0x14b   : > { %2472 = vmatpush1.bf16.msra.mxu0 %v8014_v30  ;;  %2684 = vmatpush1.bf16.msra.mxu1 %v8017_v31  ;;  %v671_v30 = vld [vmem:[%s8852_s25 + $0x78] sm:$0xff]  ;;  %v8106_v31 = vld [vmem:[%s9414_s3 + $0x4] ss:$8 sps:$4 sm:$0xff]   ;;  %s9454_s25 = sld [smem:[#allocation16_spill]] }
 0x14c   : > { %2473 = vmatprep.subr.bf16.mxu0 %v8022_v33  ;;  %2685 = vmatprep.subr.bf16.mxu1 %v8025_v34  ;;  %v6706_v33 = vcombine.high %v667_v29, %v671_v30  ;;  %v8104_v34 = vld [vmem:[%s9414_s3] ss:$8 sps:$4 sm:$0xff]  }
 0x14e   : > { %2459 = vmatmul.mubr.bf16.gmra.mrb[4].mxu0 %v6703_v39  ;;  %2671 = vmatmul.mubr.bf16.gmra.mrb[4].mxu1 %v6703_v39  ;;  %v8113_v39 = vld [vmem:[%s9414_s3 + $0x30] ss:$8 sps:$4 sm:$0xff]  }
 0x14f   : > { %2474 = vmatpush1.bf16.msra.mxu0 %v8020_v35  ;;  %2686 = vmatpush1.bf16.msra.mxu1 %v8023_v36  ;;  %v8109_v35 = vld [vmem:[%s9414_s3 + $0x14] ss:$8 sps:$4 sm:$0xff]   ;;  %v6705_v36 = vcombine.low %v667_v29, %v671_v30 }
 0x150   : > { %2475 = vmatprep.subr.bf16.mxu0 %v8028_v37  ;;  %2687 = vmatprep.subr.bf16.mxu1 %v8031_v38  ;;  %v8110_v37 = vld [vmem:[%s9414_s3 + $0x20] ss:$8 sps:$4 sm:$0xff]   ;;  %v8115_v38 = vld [vmem:[%s9414_s3 + $0x34] ss:$8 sps:$4 sm:$0xff]  }
 0x151   : > { %2501 = vmatprep.mubr.bf16.mxu0 %v6698_v42  ;;  %2713 = vmatprep.mubr.bf16.mxu1 %v6698_v42  ;;  %v8121_v42 = vld [vmem:[%s9414_s3 + $0x54] ss:$8 sps:$4 sm:$0xff]  }
 0x153   : > { %2476 = vmatpush1.bf16.msra.mxu0 %v8026_v40  ;;  %2688 = vmatpush1.bf16.msra.mxu1 %v8029_v41  ;;  %v8118_v40 = vld [vmem:[%s9414_s3 + $0x44] ss:$8 sps:$4 sm:$0xff]   ;;  %v8116_v41 = vld [vmem:[%s9414_s3 + $0x40] ss:$8 sps:$4 sm:$0xff]  }
 0x154   : > { %2477 = vmatprep.subr.bf16.mxu0 %v8034_v43  ;;  %2689 = vmatprep.subr.bf16.mxu1 %v8037_v44  ;;  %v8119_v43 = vld [vmem:[%s9414_s3 + $0x50] ss:$8 sps:$4 sm:$0xff]   ;;  %v8124_v44 = vld [vmem:[%s9414_s3 + $0x64] ss:$8 sps:$4 sm:$0xff]  }
 0x157   : > { %2478 = vmatpush1.bf16.msra.mxu0 %v8032_v45  ;;  %2690 = vmatpush1.bf16.msra.mxu1 %v8035_v46  ;;  %v8122_v45 = vld [vmem:[%s9414_s3 + $0x60] ss:$8 sps:$4 sm:$0xff]   ;;  %v8127_v46 = vld [vmem:[%s9414_s3 + $0x74] ss:$8 sps:$4 sm:$0xff]  }
 0x158   : > { %2479 = vmatprep.subr.bf16.mxu0 %v8040_v47  ;;  %2691 = vmatprep.subr.bf16.mxu1 %v8043_v48  ;;  %v8125_v47 = vld [vmem:[%s9414_s3 + $0x70] ss:$8 sps:$4 sm:$0xff]   ;;  %v8130_v48 = vld [vmem:[%s9414_s3 + $0x84] ss:$8 sps:$4 sm:$0xff]  }
 0x15b   : > { %2480 = vmatpush1.bf16.msra.mxu0 %v8038_v49  ;;  %2692 = vmatpush1.bf16.msra.mxu1 %v8041_v50  ;;  %v8128_v49 = vld [vmem:[%s9414_s3 + $0x80] ss:$8 sps:$4 sm:$0xff]   ;;  %v8133_v50 = vld [vmem:[%s9414_s3 + $0x94] ss:$8 sps:$4 sm:$0xff]  }
 0x15c   : > { %2481 = vmatprep.subr.bf16.mxu0 %v8046_v51  ;;  %2693 = vmatprep.subr.bf16.mxu1 %v8049_v52  ;;  %v8131_v51 = vld [vmem:[%s9414_s3 + $0x90] ss:$8 sps:$4 sm:$0xff]   ;;  %v8136_v52 = vld [vmem:[%s9414_s3 + $0xa4] ss:$8 sps:$4 sm:$0xff]  }
 0x15f   : > { %2482 = vmatpush1.bf16.msra.mxu0 %v8044_v53  ;;  %2694 = vmatpush1.bf16.msra.mxu1 %v8047_v54  ;;  %v8134_v53 = vld [vmem:[%s9414_s3 + $0xa0] ss:$8 sps:$4 sm:$0xff]   ;;  %v8139_v54 = vld [vmem:[%s9414_s3 + $0xb4] ss:$8 sps:$4 sm:$0xff]  }
 0x160   : > { %2483 = vmatprep.subr.bf16.mxu0 %v8052_v55  ;;  %2695 = vmatprep.subr.bf16.mxu1 %v8055_v56  ;;  %v8137_v55 = vld [vmem:[%s9414_s3 + $0xb0] ss:$8 sps:$4 sm:$0xff]   ;;  %v8142_v56 = vld [vmem:[%s9414_s3 + $0xc4] ss:$8 sps:$4 sm:$0xff]  }
 0x163   : > { %2484 = vmatpush1.bf16.msra.mxu0 %v8050_v57  ;;  %2696 = vmatpush1.bf16.msra.mxu1 %v8053_v58  ;;  %v8140_v57 = vld [vmem:[%s9414_s3 + $0xc0] ss:$8 sps:$4 sm:$0xff]   ;;  %v8145_v58 = vld [vmem:[%s9414_s3 + $0xd4] ss:$8 sps:$4 sm:$0xff]  }
 0x164   : > { %2485 = vmatprep.subr.bf16.mxu0 %v8058_v59  ;;  %2697 = vmatprep.subr.bf16.mxu1 %v8061_v60  ;;  %v8143_v59 = vld [vmem:[%s9414_s3 + $0xd0] ss:$8 sps:$4 sm:$0xff]   ;;  %v8148_v60 = vld [vmem:[%s9414_s3 + $0xe4] ss:$8 sps:$4 sm:$0xff]  }
 0x167   : > { %2486 = vmatpush1.bf16.msra.mxu0 %v8056_v61  ;;  %2698 = vmatpush1.bf16.msra.mxu1 %v8059_v62  ;;  %v8146_v61 = vld [vmem:[%s9414_s3 + $0xe0] ss:$8 sps:$4 sm:$0xff]   ;;  %v8151_v62 = vld [vmem:[%s9414_s3 + $0xf4] ss:$8 sps:$4 sm:$0xff]  }
 0x168   : > { %2487 = vmatprep.subr.bf16.mxu0 %v8064_v63  ;;  %2699 = vmatprep.subr.bf16.mxu1 %v8067_v0  ;;  %v8149_v63 = vld [vmem:[%s9414_s3 + $0xf0] ss:$8 sps:$4 sm:$0xff]   ;;  %v8154_v0 = vld [vmem:[%s9414_s3 + $0x104] ss:$8 sps:$4 sm:$0xff]  }
 0x16b   : > { %2488 = vmatpush1.bf16.msra.mxu0 %v8062_v1  ;;  %2700 = vmatpush1.bf16.msra.mxu1 %v8065_v2  ;;  %v8200_v1 = vld [vmem:[%s9416_s5 + $0x40] sm:$0xff]  }
 0x16c   : > { %2489 = vmatprep.subr.bf16.mxu0 %v8070_v3  ;;  %2701 = vmatprep.subr.bf16.mxu1 %v8073_v4  ;;  %v8201_v2 = vld [vmem:[%s9416_s5] sm:$0xff]   ;;  %v8202_v3 = vld [vmem:[%s9416_s5 + $0x48] sm:$0xff]  }
 0x16d   : > { %v8203_v4 = vld [vmem:[%s9416_s5 + $0x8] sm:$0xff]  }
 0x16f   : > { %2490 = vmatpush1.bf16.msra.mxu0 %v8068_v5  ;;  %2702 = vmatpush1.bf16.msra.mxu1 %v8071_v6  ;;  %v8204_v5 = vld [vmem:[%s9416_s5 + $0x50] sm:$0xff]  }
 0x170   : > { %2491 = vmatprep.subr.bf16.mxu0 %v8076_v7  ;;  %2703 = vmatprep.subr.bf16.mxu1 %v8079_v8  ;;  %v8205_v6 = vld [vmem:[%s9416_s5 + $0x10] sm:$0xff]   ;;  %v930_v7 = vlaneseq }
 0x172   : > { %v9011_v8 = vshrl.u32 %v930_v7, 7 }
 0x173   : > { %2492 = vmatpush1.bf16.msra.mxu0 %v8074_v9  ;;  %2704 = vmatpush1.bf16.msra.mxu1 %v8077_v10 }
 0x174   : > { %2493 = vmatprep.subr.bf16.mxu0 %v8082_v11  ;;  %2705 = vmatprep.subr.bf16.mxu1 %v8085_v12  ;;  %v9014_v9 = vsub.s32 0, %v9011_v8  ;;  %v9017_v10 = vsub.s32 2, %v9011_v8  ;;  %v928_v11 = vld [vmem:[%s9453_s26] sm:$0xf]  ;;  %v9023_v12 = vsub.s32 1, %v9011_v8 }
 0x177   : > { %2494 = vmatpush1.bf16.msra.mxu0 %v8080_v13  ;;  %2706 = vmatpush1.bf16.msra.mxu1 %v8083_v14  ;;  %v9026_v13 = vsub.s32 3, %v9011_v8  ;;  %v933_v14 = vrot.slane %v928_v11, %v9014_v9 }
 0x178   : > { %2495 = vmatprep.subr.bf16.mxu0 %v8088_v15  ;;  %2707 = vmatprep.subr.bf16.mxu1 %v8091_v16  ;;  %v941_v15 = vrot.slane %v928_v11, %v9017_v10  ;;  %v937_v16 = vrot.slane %v928_v11, %v9023_v12 }
 0x17b   : > { %2496 = vmatpush1.bf16.msra.mxu0 %v8086_v17  ;;  %2708 = vmatpush1.bf16.msra.mxu1 %v8089_v18  ;;  %v945_v17 = vrot.slane %v928_v11, %v9026_v13 }
 0x17c   : > { %2497 = vmatprep.subr.bf16.mxu0 %v8094_v19  ;;  %2709 = vmatprep.subr.bf16.mxu1 %v8097_v20 }
 0x17f   : > { %2498 = vmatpush1.bf16.msra.mxu0 %v8092_v21  ;;  %2710 = vmatpush1.bf16.msra.mxu1 %v8095_v22 }
 0x180   : > { %2499 = vmatprep.subr.bf16.mxu0 %v8100_v23  ;;  %2711 = vmatprep.subr.bf16.mxu1 %v8103_v24 }
 0x183   : > { %2500 = vmatpush1.bf16.msra.mxu0 %v8098_v26  ;;  %2712 = vmatpush1.bf16.msra.mxu1 %v8101_v28 }
 0x184   : > { %3154 = vmatprep.subr.bf16.mxu0 %v8106_v31  ;;  %7434 = vmatprep.subr.bf16.mxu1 %v8200_v1 }
 0x186   : > { %2502 = vmatmul.mubr.bf16.vlgmr.msra.gmra.mrb[0].mxu0 %v6697_v32  ;;  %2714 = vmatmul.mubr.bf16.vlgmr.msra.gmra.mrb[0].mxu1 %v6697_v32 }
 0x187   : > { %2511 = vmatprep.mubr.bf16.mxu0 %v6706_v33  ;;  %2723 = vmatprep.mubr.bf16.mxu1 %v6706_v33 }
 0x188   : > { %3155 = vmatpush1.bf16.msra.mxu0 %v8104_v34  ;;  %7435 = vmatpush3.bf16.msra.mxu1 %v8201_v2 }
 0x189   : > { %3156 = vmatprep.subr.bf16.mxu0 %v8109_v35  ;;  %7436 = vmatprep.subr.bf16.mxu1 %v8202_v3 }
 0x18c   : > { %3157 = vmatpush1.bf16.msra.mxu0 %v8107_v25  ;;  %7437 = vmatpush3.bf16.msra.mxu1 %v8203_v4  ;;  %v8155_v4 = vld [vmem:[%s9414_s3 + $0x110] ss:$8 sps:$4 sm:$0xff]  }
 0x18d   : > { %3158 = vmatprep.subr.bf16.mxu0 %v8112_v27  ;;  %7438 = vmatprep.subr.bf16.mxu1 %v8204_v5 }
 0x18e   : > { %2512 = vmatmul.mubr.bf16.gmra.mrb[4].mxu0 %v6705_v36  ;;  %2724 = vmatmul.mubr.bf16.gmra.mrb[4].mxu1 %v6705_v36 }
 0x190   : > { %3159 = vmatpush1.bf16.msra.mxu0 %v8110_v37  ;;  %7439 = vmatpush3.bf16.msra.mxu1 %v8205_v6  ;;  %v8160_v6 = vld [vmem:[%s9414_s3 + $0x124] ss:$8 sps:$4 sm:$0xff]  }
 0x191   : > { %3160 = vmatprep.subr.bf16.mxu0 %v8115_v38 }
 0x194   : > { %3161 = vmatpush1.bf16.msra.mxu0 %v8113_v39 }
 0x195   : > { %3162 = vmatprep.subr.bf16.mxu0 %v8118_v40 }
 0x198   : > { %3163 = vmatpush1.bf16.msra.mxu0 %v8116_v41 }
 0x199   : > { %3164 = vmatprep.subr.bf16.mxu0 %v8121_v42 }
 0x19c   : > { %3165 = vmatpush1.bf16.msra.mxu0 %v8119_v43 }
 0x19d   : > { %3166 = vmatprep.subr.bf16.mxu0 %v8124_v44 }
 0x1a0   : > { %3167 = vmatpush1.bf16.msra.mxu0 %v8122_v45 }
 0x1a1   : > { %3168 = vmatprep.subr.bf16.mxu0 %v8127_v46 }
 0x1a4   : > { %3169 = vmatpush1.bf16.msra.mxu0 %v8125_v47 }
 0x1a5   : > { %3170 = vmatprep.subr.bf16.mxu0 %v8130_v48 }
 0x1a8   : > { %3171 = vmatpush1.bf16.msra.mxu0 %v8128_v49 }
 0x1a9   : > { %3172 = vmatprep.subr.bf16.mxu0 %v8133_v50 }
 0x1ac   : > { %3173 = vmatpush1.bf16.msra.mxu0 %v8131_v51 }
 0x1ad   : > { %3174 = vmatprep.subr.bf16.mxu0 %v8136_v52 }
 0x1b0   : > { %3175 = vmatpush1.bf16.msra.mxu0 %v8134_v53 }
 0x1b1   : > { %3176 = vmatprep.subr.bf16.mxu0 %v8139_v54 }
 0x1b4   : > { %3177 = vmatpush1.bf16.msra.mxu0 %v8137_v55 }
 0x1b5   : > { %3178 = vmatprep.subr.bf16.mxu0 %v8142_v56 }
 0x1b8   : > { %3179 = vmatpush1.bf16.msra.mxu0 %v8140_v57 }
 0x1b9   : > { %3180 = vmatprep.subr.bf16.mxu0 %v8145_v58 }
 0x1bc   : > { %3181 = vmatpush1.bf16.msra.mxu0 %v8143_v59 }
 0x1bd   : > { %3182 = vmatprep.subr.bf16.mxu0 %v8148_v60 }
 0x1c0   : > { %3183 = vmatpush1.bf16.msra.mxu0 %v8146_v61  ;;  %v8152_v61 = vld [vmem:[%s9414_s3 + $0x100] ss:$8 sps:$4 sm:$0xff]  }
 0x1c1   : > { %3184 = vmatprep.subr.bf16.mxu0 %v8151_v62 }
 0x1c4   : > { %3185 = vmatpush1.bf16.msra.mxu0 %v8149_v63  ;;  %v8157_v63 = vld [vmem:[%s9414_s3 + $0x114] ss:$8 sps:$4 sm:$0xff]  }
 0x1c5   : > { %3207 = vmatprep.subr.bf16.mxu0 %v8154_v0 }
 0x259   : > { %v2503_v18 = vpop.f32.mrb[0].mxu0  ;;  %v2715_v19 = vpop.f32.mrb[0].mxu1 }
 0x25a   : > { %v7522_v20 = vadd.f32 %v2503_v18, %v933_v14  ;;  %v7530_v21 = vadd.f32 %v2715_v19, %v941_v15  ;;  %v2505_v22 = vpop.f32.mrb[1].mxu0  ;;  %v2717_v23 = vpop.f32.mrb[1].mxu1  ;;  %v8158_v18 = vld [vmem:[%s9414_s3 + $0x120] ss:$8 sps:$4 sm:$0xff]   ;;  %v8163_v19 = vld [vmem:[%s9414_s3 + $0x134] ss:$8 sps:$4 sm:$0xff]  }
 0x25b   : > { %v7523_v24 = vadd.f32 %v2505_v22, %v937_v16  ;;  %v7531_v26 = vadd.f32 %v2717_v23, %v945_v17  ;;  %v2507_v28 = vpop.f32.mrb[2].mxu0  ;;  %v2719_v29 = vpop.f32.mrb[2].mxu1  ;;  %v8166_v22 = vld [vmem:[%s9414_s3 + $0x144] ss:$8 sps:$4 sm:$0xff]   ;;  %v8164_v23 = vld [vmem:[%s9414_s3 + $0x140] ss:$8 sps:$4 sm:$0xff]  }
 0x25c   : > { %8352 = vtanh.f32 %v7522_v20  ;;  %v7524_v30 = vadd.f32 %v2507_v28, %v933_v14  ;;  %v2509_v31 = vpop.f32.mrb[3].mxu0  ;;  %v2721_v32 = vpop.f32.mrb[3].mxu1  ;;  %v7532_v33 = vadd.f32 %v2719_v29, %v941_v15  ;;  %v8172_v28 = vld [vmem:[%s9414_s3 + $0x164] ss:$8 sps:$4 sm:$0xff]   ;;  %v8170_v29 = vld [vmem:[%s9414_s3 + $0x160] ss:$8 sps:$4 sm:$0xff]  }
 0x25d   : > { %8354 = vtanh.f32 %v7530_v21  ;;  %v7525_v34 = vadd.f32 %v2509_v31, %v937_v16  ;;  %v7533_v35 = vadd.f32 %v2721_v32, %v945_v17  ;;  %v8161_v21 = vld [vmem:[%s9414_s3 + $0x130] ss:$8 sps:$4 sm:$0xff]   ;;  %v8178_v32 = vld [vmem:[%s9414_s3 + $0x184] ss:$8 sps:$4 sm:$0xff]  }
 0x25e   : > { %8356 = vtanh.f32 %v7523_v24  ;;  %v8169_v24 = vld [vmem:[%s9414_s3 + $0x154] ss:$8 sps:$4 sm:$0xff]   ;;  %v8173_v31 = vld [vmem:[%s9414_s3 + $0x170] ss:$8 sps:$4 sm:$0xff]  }
 0x25f   : > { %8358 = vtanh.f32 %v7531_v26  ;;  %v8167_v26 = vld [vmem:[%s9414_s3 + $0x150] ss:$8 sps:$4 sm:$0xff]  }
 0x260   : > { %8360 = vtanh.f32 %v7524_v30  ;;  %v8175_v30 = vld [vmem:[%s9414_s3 + $0x174] ss:$8 sps:$4 sm:$0xff]  }
 0x261   : > { %8362 = vtanh.f32 %v7532_v33  ;;  %v2513_v25 = vpop.f32.mrb[4].mxu0  ;;  %v2725_v27 = vpop.f32.mrb[4].mxu1  ;;  %v8176_v33 = vld [vmem:[%s9414_s3 + $0x180] ss:$8 sps:$4 sm:$0xff]  }
 0x262   : > { %8364 = vtanh.f32 %v7525_v34  ;;  %v7526_v36 = vadd.f32 %v2513_v25, %v933_v14  ;;  %v7534_v37 = vadd.f32 %v2725_v27, %v941_v15  ;;  %v2515_v38 = vpop.f32.mrb[5].mxu0  ;;  %v2727_v39 = vpop.f32.mrb[5].mxu1  ;;  %v8181_v34 = vld [vmem:[%s9414_s3 + $0x194] ss:$8 sps:$4 sm:$0xff]   ;;  %v8184_v25 = vld [vmem:[%s9414_s3 + $0x1a4] ss:$8 sps:$4 sm:$0xff]  }
 0x263   : > { %8366 = vtanh.f32 %v7533_v35  ;;  %v7527_v40 = vadd.f32 %v2515_v38, %v937_v16  ;;  %v7535_v41 = vadd.f32 %v2727_v39, %v945_v17  ;;  %v2517_v42 = vpop.f32.mrb[6].mxu0  ;;  %v2729_v43 = vpop.f32.mrb[6].mxu1  ;;  %v8179_v35 = vld [vmem:[%s9414_s3 + $0x190] ss:$8 sps:$4 sm:$0xff]   ;;  %v8182_v27 = vld [vmem:[%s9414_s3 + $0x1a0] ss:$8 sps:$4 sm:$0xff]  }
 0x264   : > { %8368 = vtanh.f32 %v7526_v36  ;;  %v7528_v44 = vadd.f32 %v2517_v42, %v933_v14  ;;  %v2519_v45 = vpop.f32.mrb[7].mxu0  ;;  %v2731_v46 = vpop.f32.mrb[7].mxu1  ;;  %v7536_v47 = vadd.f32 %v2729_v43, %v941_v15  ;;  %v8187_v36 = vld [vmem:[%s9414_s3 + $0x1b4] ss:$8 sps:$4 sm:$0xff]   ;;  %v8190_v38 = vld [vmem:[%s9414_s3 + $0x1c4] ss:$8 sps:$4 sm:$0xff]  }
 0x265   : > { %8370 = vtanh.f32 %v7534_v37  ;;  %v7529_v49 = vadd.f32 %v2519_v45, %v937_v16  ;;  %v7537_v51 = vadd.f32 %v2731_v46, %v945_v17  ;;  %v8185_v37 = vld [vmem:[%s9414_s3 + $0x1b0] ss:$8 sps:$4 sm:$0xff]   ;;  %v8188_v39 = vld [vmem:[%s9414_s3 + $0x1c0] ss:$8 sps:$4 sm:$0xff]   ;;  %v8196_v42 = vld [vmem:[%s9414_s3 + $0x1e4] ss:$8 sps:$4 sm:$0xff]  }
 0x266   : > { %v8353_v48 = vpop.eup %8352  ;;  %8372 = vtanh.f32 %v7527_v40  ;;  %v8193_v40 = vld [vmem:[%s9414_s3 + $0x1d4] ss:$8 sps:$4 sm:$0xff]   ;;  %v8194_v43 = vld [vmem:[%s9414_s3 + $0x1e0] ss:$8 sps:$4 sm:$0xff]   ;;  %v8197_v45 = vld [vmem:[%s9414_s3 + $0x1f0] ss:$8 sps:$4 sm:$0xff]  }
 0x267   : > { %v9032_v50 = vpop.eup %8354  ;;  %8374 = vtanh.f32 %v7535_v41  ;;  %v8191_v41 = vld [vmem:[%s9414_s3 + $0x1d0] ss:$8 sps:$4 sm:$0xff]  }
 0x268   : > { %v8357_v52 = vpop.eup %8356  ;;  %8376 = vtanh.f32 %v7528_v44  ;;  %v8199_v44 = vld [vmem:[%s9414_s3 + $0x1f4] ss:$8 sps:$4 sm:$0xff]  }
 0x269   : > { %v8359_v53 = vpop.eup %8358  ;;  %8378 = vtanh.f32 %v7536_v47  ;;  %v8206_v46 = vld [vmem:[%s9416_s5 + $0x58] sm:$0xff]  }
 0x26a   : > { %v8361_v54 = vpop.eup %8360  ;;  %8380 = vtanh.f32 %v7529_v49  ;;  %v8207_v47 = vld [vmem:[%s9416_s5 + $0x18] sm:$0xff]   ;;  %7440 = vmatprep.subr.bf16.mxu1 %v8206_v46  ;;  %v8209_v49 = vld [vmem:[%s9416_s5 + $0x20] sm:$0xff]  }
 0x26b   : > { %v9034_v55 = vpop.eup %8362  ;;  %8382 = vtanh.f32 %v7537_v51  ;;  %v2750_v56 = vpack.c.bf16 %v8361_v54, %v8353_v48  ;;  %7441 = vmatpush3.bf16.msra.mxu1 %v8207_v47  ;;  %v8208_v48 = vld [vmem:[%s9416_s5 + $0x60] sm:$0xff]   ;;  %v8211_v51 = vld [vmem:[%s9416_s5 + $0x28] sm:$0xff]   ;;  %v8214_v54 = vld [vmem:[%s9416_s5 + $0x78] sm:$0xff]  }
 0x26c   : > { %v8365_v57 = vpop.eup %8364  ;;  %v2752_v58 = vpack.c.bf16 %v9034_v55, %v9032_v50  ;;  %7442 = vmatprep.subr.bf16.mxu1 %v8208_v48  ;;  %v8210_v50 = vld [vmem:[%s9416_s5 + $0x68] sm:$0xff]   ;;  %v8215_v55 = vld [vmem:[%s9416_s5 + $0x38] sm:$0xff]  }
 0x26d   : > { %v8367_v59 = vpop.eup %8366  ;;  %v2751_v60 = vpack.c.bf16 %v8365_v57, %v8357_v52  ;;  %v8212_v52 = vld [vmem:[%s9416_s5 + $0x70] sm:$0xff]   ;;  %v2822_v57 = vld [vmem:[#allocation4] sm:$0x3] }
 0x26e   : > { %v8369_v62 = vpop.eup %8368  ;;  %v2753_v0 = vpack.c.bf16 %v8367_v59, %v8359_v53  ;;  %v8213_v53 = vld [vmem:[%s9416_s5 + $0x30] sm:$0xff]   ;;  %v2831_v59 = vrot.slane %v2822_v57, %v9023_v12 }
 0x26f   : > { %v9044_v1 = vpop.eup %8370  ;;  %3186 = vmatprep.mubr.bf16.mxu0 %v2751_v60  ;;  %7443 = vmatpush3.bf16.msra.mxu1 %v8209_v49 }
 0x270   : > { %v8373_v2 = vpop.eup %8372  ;;  %3187 = vmatmul.mubr.bf16.vlgmr.msra.gmra.mrb[8].mxu0 %v2750_v56  ;;  %7444 = vmatprep.subr.bf16.mxu1 %v8210_v50  ;;  %v8216_v56 = vld [vmem:[%s9418_s7] sm:$0xff]  }
 0x271   : > { %v9046_v3 = vpop.eup %8374  ;;  %3208 = vmatpush1.bf16.msra.mxu0 %v8152_v61 }
 0x272   : > { %v8377_v5 = vpop.eup %8376  ;;  %3209 = vmatprep.subr.bf16.mxu0 %v8157_v63 }
 0x273   : > { %v9054_v7 = vpop.eup %8378  ;;  %v2754_v11 = vpack.c.bf16 %v8377_v5, %v8369_v62  ;;  %7445 = vmatpush3.bf16.msra.mxu1 %v8211_v51 }
 0x274   : > { %v8381_v14 = vpop.eup %8380  ;;  %v2756_v15 = vpack.c.bf16 %v9054_v7, %v9044_v1  ;;  %7446 = vmatprep.subr.bf16.mxu1 %v8212_v52 }
 0x275   : > { %v9058_v16 = vpop.eup %8382  ;;  %3210 = vmatpush1.bf16.msra.mxu0 %v8155_v4  ;;  %v2755_v17 = vpack.c.bf16 %v8381_v14, %v8373_v2 }
 0x276   : > { %3211 = vmatprep.subr.bf16.mxu0 %v8160_v6  ;;  %v2757_v20 = vpack.c.bf16 %v9058_v16, %v9046_v3 }
 0x277   : > { %3196 = vmatprep.mubr.bf16.mxu0 %v2755_v17  ;;  %7447 = vmatpush3.bf16.msra.mxu1 %v8213_v53 }
 0x278   : > { %3197 = vmatmul.mubr.bf16.gmra.mrb[12].mxu0 %v2754_v11  ;;  %7448 = vmatprep.subr.bf16.mxu1 %v8214_v54 }
 0x279   : > { %3212 = vmatpush1.bf16.msra.mxu0 %v8158_v18  ;;  %3239 = vmatprep.mubr.bf16.mxu0 %v2753_v0 }
 0x27a   : > { %3213 = vmatprep.subr.bf16.mxu0 %v8163_v19 }
 0x27b   : > { %7449 = vmatpush3.bf16.msra.mxu1 %v8215_v55 }
 0x27c   : > { %7482 = vmatprep.subr.bf16.mxu1 %v8216_v56 }
 0x27d   : > { %3214 = vmatpush1.bf16.msra.mxu0 %v8161_v21 }
 0x27e   : > { %3215 = vmatprep.subr.bf16.mxu0 %v8166_v22 }
 0x281   : > { %3216 = vmatpush1.bf16.msra.mxu0 %v8164_v23 }
 0x282   : > { %3217 = vmatprep.subr.bf16.mxu0 %v8169_v24 }
 0x285   : > { %3218 = vmatpush1.bf16.msra.mxu0 %v8167_v26 }
 0x286   : > { %3219 = vmatprep.subr.bf16.mxu0 %v8172_v28 }
 0x289   : > { %3220 = vmatpush1.bf16.msra.mxu0 %v8170_v29 }
 0x28a   : > { %3221 = vmatprep.subr.bf16.mxu0 %v8175_v30 }
 0x28d   : > { %3222 = vmatpush1.bf16.msra.mxu0 %v8173_v31  ;;  %v8217_v31 = vld [vmem:[%s9418_s7 + $0x8] sm:$0xff]  }
 0x28e   : > { %3223 = vmatprep.subr.bf16.mxu0 %v8178_v32  ;;  %v8218_v32 = vld [vmem:[%s9418_s7 + $0x10] sm:$0xff]  }
 0x291   : > { %3224 = vmatpush1.bf16.msra.mxu0 %v8176_v33  ;;  %v8219_v33 = vld [vmem:[%s9418_s7 + $0x18] sm:$0xff]  }
 0x292   : > { %3225 = vmatprep.subr.bf16.mxu0 %v8181_v34  ;;  %v8220_v34 = vld [vmem:[%s9418_s7 + $0x20] sm:$0xff]  }
 0x295   : > { %3226 = vmatpush1.bf16.msra.mxu0 %v8179_v35  ;;  %v8221_v35 = vld [vmem:[%s9418_s7 + $0x28] sm:$0xff]  }
 0x296   : > { %3227 = vmatprep.subr.bf16.mxu0 %v8184_v25  ;;  %v8222_v25 = vld [vmem:[%s9418_s7 + $0x30] sm:$0xff]  }
 0x299   : > { %3228 = vmatpush1.bf16.msra.mxu0 %v8182_v27  ;;  %v8223_v27 = vld [vmem:[%s9418_s7 + $0x38] sm:$0xff]  }
 0x29a   : > { %3229 = vmatprep.subr.bf16.mxu0 %v8187_v36  ;;  %v8224_v36 = vld [vmem:[%s9420_s9] sm:$0xff]  }
 0x29d   : > { %3230 = vmatpush1.bf16.msra.mxu0 %v8185_v37 }
 0x29e   : > { %3231 = vmatprep.subr.bf16.mxu0 %v8190_v38  ;;  %v7027_v38 = vld [vmem:[%s9417_s6] ss:$0 sm:$0xff] }
 0x2a1   : > { %3232 = vmatpush1.bf16.msra.mxu0 %v8188_v39 }
 0x2a2   : > { %3233 = vmatprep.subr.bf16.mxu0 %v8193_v40 }
 0x2a5   : > { %3234 = vmatpush1.bf16.msra.mxu0 %v8191_v41 }
 0x2a6   : > { %3235 = vmatprep.subr.bf16.mxu0 %v8196_v42 }
 0x2a9   : > { %3236 = vmatpush1.bf16.msra.mxu0 %v8194_v43 }
 0x2aa   : > { %3237 = vmatprep.subr.bf16.mxu0 %v8199_v44 }
 0x2ad   : > { %3238 = vmatpush1.bf16.msra.mxu0 %v8197_v45 }
 0x2b0   : > { %3240 = vmatmul.mubr.bf16.vlgmr.msra.gmra.mrb[8].mxu0 %v2752_v58  ;;  %v2827_v58 = vrot.slane %v2822_v57, %v9014_v9 }
 0x2b1   : > { %3249 = vmatprep.mubr.bf16.mxu0 %v2757_v20 }
 0x2b8   : > { %3250 = vmatmul.mubr.bf16.gmra.mrb[12].mxu0 %v2756_v15 }
 0x383   : > { %v3241_v60 = vpop.f32.mrb[8].mxu0 }
 0x384   : > { %v7538_v61 = vadd.f32 %v3241_v60, %v2827_v58  ;;  %v3243_v62 = vpop.f32.mrb[9].mxu0  ;;  %v8225_v60 = vld [vmem:[%s9420_s9 + $0x8] sm:$0xff]  }
 0x385   : > { %v7539_v63 = vadd.f32 %v3243_v62, %v2831_v59  ;;  %v3245_v0 = vpop.f32.mrb[10].mxu0  ;;  %v8227_v62 = vld [vmem:[%s9420_s9 + $0x18] sm:$0xff]  }
 0x386   : > { %8384 = vtanh.f32 %v7538_v61  ;;  %v7540_v1 = vadd.f32 %v3245_v0, %v2827_v58  ;;  %v3247_v2 = vpop.f32.mrb[11].mxu0  ;;  %v8226_v61 = vld [vmem:[%s9420_s9 + $0x10] sm:$0xff]   ;;  %v8229_v0 = vld [vmem:[%s9420_s9 + $0x28] sm:$0xff]  }
 0x387   : > { %8386 = vtanh.f32 %v7539_v63  ;;  %v7541_v3 = vadd.f32 %v3247_v2, %v2831_v59  ;;  %v8228_v63 = vld [vmem:[%s9420_s9 + $0x20] sm:$0xff]   ;;  %v8231_v2 = vld [vmem:[%s9420_s9 + $0x38] sm:$0xff]  }
 0x388   : > { %8388 = vtanh.f32 %v7540_v1  ;;  %v8230_v1 = vld [vmem:[%s9420_s9 + $0x30] sm:$0xff]  }
 0x389   : > { %8390 = vtanh.f32 %v7541_v3  ;;  %v8234_v3 = vld [vmem:[%s9422_s11 + $0x4] ss:$8 sps:$4 sm:$0xff]  }
 0x38b   : > { %v3251_v4 = vpop.f32.mrb[12].mxu0 }
 0x38c   : > { %v7542_v5 = vadd.f32 %v3251_v4, %v2827_v58  ;;  %v3253_v6 = vpop.f32.mrb[13].mxu0  ;;  %v7044_v4 = vld [vmem:[%s9419_s8] ss:$0 sm:$0xff] }
 0x38d   : > { %v7543_v7 = vadd.f32 %v3253_v6, %v2831_v59  ;;  %v3255_v11 = vpop.f32.mrb[14].mxu0 }
 0x38e   : > { %8392 = vtanh.f32 %v7542_v5  ;;  %v7544_v14 = vadd.f32 %v3255_v11, %v2827_v58  ;;  %v3257_v15 = vpop.f32.mrb[15].mxu0 }
 0x38f   : > { %8394 = vtanh.f32 %v7543_v7  ;;  %v7545_v16 = vadd.f32 %v3257_v15, %v2831_v59 }
 0x390   : > { %v8385_v17 = vpop.eup %8384  ;;  %8396 = vtanh.f32 %v7544_v14 }
 0x391   : > { %v8387_v18 = vpop.eup %8386  ;;  %8398 = vtanh.f32 %v7545_v16 }
 0x392   : > { %v8389_v19 = vpop.eup %8388 }
 0x393   : > { %v8391_v20 = vpop.eup %8390  ;;  %v3268_v21 = vpack.c.bf16 %v8389_v19, %v8385_v17 }
 0x394   : > { %v3269_v22 = vpack.c.bf16 %v8391_v20, %v8387_v18  ;;  %v8232_v20 = vld [vmem:[%s9422_s11] ss:$8 sps:$4 sm:$0xff]  }
 0x396   : > { %3439 = vmatprep.mubr.bf16.mxu1 %v3269_v22  ;;  %v8235_v22 = vld [vmem:[%s9422_s11 + $0x10] ss:$8 sps:$4 sm:$0xff]  }
 0x397   : > { %3440 = vmatmul.mubr.bf16.vlgmr.msra.gmra.mrb[8].mxu1 %v3268_v21  ;;  %v8237_v21 = vld [vmem:[%s9422_s11 + $0x14] ss:$8 sps:$4 sm:$0xff]  }
 0x398   : > { %v8393_v23 = vpop.eup %8392  ;;  %7483 = vmatpush3.bf16.msra.mxu1 %v8216_v56 }
 0x399   : > { %v8395_v24 = vpop.eup %8394  ;;  %7484 = vmatprep.subr.bf16.mxu1 %v8217_v31 }
 0x39a   : > { %v8397_v26 = vpop.eup %8396 }
 0x39b   : > { %v8399_v28 = vpop.eup %8398  ;;  %v3270_v29 = vpack.c.bf16 %v8397_v26, %v8393_v23  ;;  %v8240_v23 = vld [vmem:[%s9422_s11 + $0x24] ss:$8 sps:$4 sm:$0xff]   ;;  %v8243_v26 = vld [vmem:[%s9422_s11 + $0x34] ss:$8 sps:$4 sm:$0xff]  }
 0x39c   : > { %v3271_v30 = vpack.c.bf16 %v8399_v28, %v8395_v24  ;;  %7485 = vmatpush3.bf16.msra.mxu1 %v8217_v31  ;;  %v8238_v24 = vld [vmem:[%s9422_s11 + $0x20] ss:$8 sps:$4 sm:$0xff]   ;;  %v8241_v28 = vld [vmem:[%s9422_s11 + $0x30] ss:$8 sps:$4 sm:$0xff]   ;;  %v8249_v31 = vld [vmem:[%s9422_s11 + $0x54] ss:$8 sps:$4 sm:$0xff]  }
 0x39d   : > { %7486 = vmatprep.subr.bf16.mxu1 %v8218_v32 }
 0x39e   : > { %3447 = vmatprep.mubr.bf16.mxu1 %v3271_v30  ;;  %v8244_v30 = vld [vmem:[%s9422_s11 + $0x40] ss:$8 sps:$4 sm:$0xff]  }
 0x39f   : > { %3448 = vmatmul.mubr.bf16.gmra.mrb[12].mxu1 %v3270_v29  ;;  %v8246_v29 = vld [vmem:[%s9422_s11 + $0x44] ss:$8 sps:$4 sm:$0xff]  }
 0x3a0   : > { %7487 = vmatpush3.bf16.msra.mxu1 %v8218_v32  ;;  %v8247_v32 = vld [vmem:[%s9422_s11 + $0x50] ss:$8 sps:$4 sm:$0xff]  }
 0x3a1   : > { %7488 = vmatprep.subr.bf16.mxu1 %v8219_v33 }
 0x3a4   : > { %7489 = vmatpush3.bf16.msra.mxu1 %v8219_v33  ;;  %v8252_v33 = vld [vmem:[%s9422_s11 + $0x64] ss:$8 sps:$4 sm:$0xff]  }
 0x3a5   : > { %7490 = vmatprep.subr.bf16.mxu1 %v8220_v34 }
 0x3a8   : > { %7491 = vmatpush3.bf16.msra.mxu1 %v8220_v34  ;;  %v8250_v34 = vld [vmem:[%s9422_s11 + $0x60] ss:$8 sps:$4 sm:$0xff]  }
 0x3a9   : > { %7492 = vmatprep.subr.bf16.mxu1 %v8221_v35 }
 0x3ac   : > { %7493 = vmatpush3.bf16.msra.mxu1 %v8221_v35  ;;  %v8604_v35 = vmov 0  }
 0x3ad   : > { %7494 = vmatprep.subr.bf16.mxu1 %v8222_v25 }
 0x3b0   : > { %7495 = vmatpush3.bf16.msra.mxu1 %v8222_v25  ;;  %v8255_v25 = vld [vmem:[%s9422_s11 + $0x74] ss:$8 sps:$4 sm:$0xff]  }
 0x3b1   : > { %7496 = vmatprep.subr.bf16.mxu1 %v8223_v27 }
 0x3b4   : > { %7497 = vmatpush3.bf16.msra.mxu1 %v8223_v27  ;;  %v8253_v27 = vld [vmem:[%s9422_s11 + $0x70] ss:$8 sps:$4 sm:$0xff]  }
 0x3b5   : > { %7502 = vmatprep.subr.bf16.mxu1 %v8224_v36 }
 0x46a   : > { %v7450_v37 = vpop.f32.mrb[8].mxu1 }
 0x46b   : > { %v7451_v39 = vpop.f32.mrb[9].mxu1 }
 0x46c   : > { %v7452_v40 = vadd.f32 %v7451_v39, %v7450_v37  ;;  %v7453_v41 = vpop.f32.mrb[10].mxu1  ;;  %v8258_v37 = vld [vmem:[#allocation6 + $0x4] ss:$16 sps:$4 sm:$0xff]  }
 0x46d   : > { %v7454_v42 = vpop.f32.mrb[11].mxu1  ;;  %v8264_v39 = vld [vmem:[#allocation6 + $0x24] ss:$16 sps:$4 sm:$0xff]   ;;  %4293 = vmatprep.subr.bf16.mxu0 %v8258_v37  ;;  %v8327_v37 = vld [vmem:[#allocation6 + $0x16c] ss:$16 sps:$4 sm:$0xff]  }
 0x46e   : > { %v3442_v43 = vadd.f32 %v7452_v40, %v7027_v38  ;;  %v7455_v44 = vadd.f32 %v7454_v42, %v7453_v41  ;;  %v8262_v40 = vld [vmem:[#allocation6 + $0x20] ss:$16 sps:$4 sm:$0xff]   ;;  %v8270_v41 = vld [vmem:[#allocation6 + $0x44] ss:$16 sps:$4 sm:$0xff]  }
 0x46f   : > { %v8268_v42 = vld [vmem:[#allocation6 + $0x40] ss:$16 sps:$4 sm:$0xff]  }
 0x470   : > { %v3445_v45 = vadd.f32 %v7455_v44, %v7027_v38  ;;  %8400 = vtanh.f32 %v3442_v43  ;;  %v8276_v43 = vld [vmem:[#allocation6 + $0x64] ss:$16 sps:$4 sm:$0xff]   ;;  %v8274_v44 = vld [vmem:[#allocation6 + $0x60] ss:$16 sps:$4 sm:$0xff]  }
 0x472   : > { %8402 = vtanh.f32 %v3445_v45  ;;  %v7456_v46 = vpop.f32.mrb[12].mxu1  ;;  %v8282_v45 = vld [vmem:[#allocation6 + $0x84] ss:$16 sps:$4 sm:$0xff]  }
 0x473   : > { %v7457_v47 = vpop.f32.mrb[13].mxu1 }
 0x474   : > { %v7458_v48 = vadd.f32 %v7457_v47, %v7456_v46  ;;  %v7459_v49 = vpop.f32.mrb[14].mxu1  ;;  %v8280_v46 = vld [vmem:[#allocation6 + $0x80] ss:$16 sps:$4 sm:$0xff]   ;;  %v8288_v47 = vld [vmem:[#allocation6 + $0xa4] ss:$16 sps:$4 sm:$0xff]  }
 0x475   : > { %v7460_v50 = vpop.f32.mrb[15].mxu1 }
 0x476   : > { %v3450_v51 = vadd.f32 %v7458_v48, %v7027_v38  ;;  %v7461_v52 = vadd.f32 %v7460_v50, %v7459_v49  ;;  %v8286_v48 = vld [vmem:[#allocation6 + $0xa0] ss:$16 sps:$4 sm:$0xff]   ;;  %v8294_v49 = vld [vmem:[#allocation6 + $0xc4] ss:$16 sps:$4 sm:$0xff]  }
 0x477   : > { %v8292_v50 = vld [vmem:[#allocation6 + $0xc0] ss:$16 sps:$4 sm:$0xff]  }
 0x478   : > { %v3453_v53 = vadd.f32 %v7461_v52, %v7027_v38  ;;  %8404 = vtanh.f32 %v3450_v51  ;;  %v8261_v38 = vld [vmem:[#allocation6 + $0xc] ss:$16 sps:$4 sm:$0xff]   ;;  %v8300_v51 = vld [vmem:[#allocation6 + $0xe4] ss:$16 sps:$4 sm:$0xff]   ;;  %v8298_v52 = vld [vmem:[#allocation6 + $0xe0] ss:$16 sps:$4 sm:$0xff]  }
 0x47a   : > { %8406 = vtanh.f32 %v3453_v53  ;;  %v8401_v54 = vpop.eup %8400  ;;  %v8306_v53 = vld [vmem:[#allocation6 + $0x104] ss:$16 sps:$4 sm:$0xff]  }
 0x47c   : > { %v8403_v55 = vpop.eup %8402 }
 0x47d   : > { %v3460_v56 = vpack.c.bf16 %v8403_v55, %v8401_v54  ;;  %v8304_v54 = vld [vmem:[#allocation6 + $0x100] ss:$16 sps:$4 sm:$0xff]   ;;  %v8312_v55 = vld [vmem:[#allocation6 + $0x124] ss:$16 sps:$4 sm:$0xff]  }
 0x47f   : > { %7498 = vmatprep.mubr.bf16.mxu1 %v3460_v56  ;;  %v8310_v56 = vld [vmem:[#allocation6 + $0x120] ss:$16 sps:$4 sm:$0xff]  }
 0x482   : > { %v8405_v57 = vpop.eup %8404 }
 0x484   : > { %v8407_v58 = vpop.eup %8406 }
 0x485   : > { %v3461_v59 = vpack.c.bf16 %v8407_v58, %v8405_v57  ;;  %v8318_v57 = vld [vmem:[#allocation6 + $0x144] ss:$16 sps:$4 sm:$0xff]   ;;  %v8316_v58 = vld [vmem:[#allocation6 + $0x140] ss:$16 sps:$4 sm:$0xff]  }
 0x487   : > { %7499 = vmatmul.mubr.bf16.vlgmr.msra.gmra.mrb[16].mxu1 %v3461_v59  ;;  %v7053_v59 = vld [vmem:[%s9421_s10] ss:$0 sm:$0xff] }
 0x488   : > { %7503 = vmatpush3.bf16.msra.mxu1 %v8224_v36  ;;  %v8256_v36 = vld [vmem:[#allocation6] ss:$16 sps:$4 sm:$0xff]  }
 0x489   : > { %7504 = vmatprep.subr.bf16.mxu1 %v8225_v60  ;;  %4294 = vmatpush1.bf16.msra.mxu0 %v8256_v36  ;;  %v8324_v36 = vld [vmem:[#allocation6 + $0x164] ss:$16 sps:$4 sm:$0xff]  }
 0x48a   : > { %4295 = vmatprep.subr.bf16.mxu0 %v8264_v39  ;;  %v8325_v39 = vld [vmem:[#allocation6 + $0x168] ss:$16 sps:$4 sm:$0xff]  }
 0x48c   : > { %7505 = vmatpush3.bf16.msra.mxu1 %v8225_v60 }
 0x48d   : > { %7506 = vmatprep.subr.bf16.mxu1 %v8226_v61  ;;  %4296 = vmatpush1.bf16.msra.mxu0 %v8262_v40  ;;  %v8330_v40 = vld [vmem:[#allocation6 + $0x184] ss:$16 sps:$4 sm:$0xff]  }
 0x48e   : > { %4297 = vmatprep.subr.bf16.mxu0 %v8270_v41  ;;  %v8333_v41 = vld [vmem:[#allocation6 + $0x18c] ss:$16 sps:$4 sm:$0xff]  }
 0x490   : > { %7507 = vmatpush3.bf16.msra.mxu1 %v8226_v61 }
 0x491   : > { %7508 = vmatprep.subr.bf16.mxu1 %v8227_v62  ;;  %4298 = vmatpush1.bf16.msra.mxu0 %v8268_v42  ;;  %v8328_v42 = vld [vmem:[#allocation6 + $0x180] ss:$16 sps:$4 sm:$0xff]  }
 0x492   : > { %4299 = vmatprep.subr.bf16.mxu0 %v8276_v43  ;;  %v8331_v43 = vld [vmem:[#allocation6 + $0x188] ss:$16 sps:$4 sm:$0xff]  }
 0x494   : > { %7509 = vmatpush3.bf16.msra.mxu1 %v8227_v62 }
 0x495   : > { %7510 = vmatprep.subr.bf16.mxu1 %v8228_v63  ;;  %4300 = vmatpush1.bf16.msra.mxu0 %v8274_v44  ;;  %v8336_v44 = vld [vmem:[#allocation6 + $0x1a4] ss:$16 sps:$4 sm:$0xff]  }
 0x496   : > { %4301 = vmatprep.subr.bf16.mxu0 %v8282_v45  ;;  %v8339_v45 = vld [vmem:[#allocation6 + $0x1ac] ss:$16 sps:$4 sm:$0xff]  }
 0x498   : > { %7511 = vmatpush3.bf16.msra.mxu1 %v8228_v63 }
 0x499   : > { %7512 = vmatprep.subr.bf16.mxu1 %v8229_v0  ;;  %4302 = vmatpush1.bf16.msra.mxu0 %v8280_v46  ;;  %v8334_v46 = vld [vmem:[#allocation6 + $0x1a0] ss:$16 sps:$4 sm:$0xff]  }
 0x49a   : > { %4303 = vmatprep.subr.bf16.mxu0 %v8288_v47  ;;  %v8337_v47 = vld [vmem:[#allocation6 + $0x1a8] ss:$16 sps:$4 sm:$0xff]  }
 0x49c   : > { %7513 = vmatpush3.bf16.msra.mxu1 %v8229_v0 }
 0x49d   : > { %7514 = vmatprep.subr.bf16.mxu1 %v8230_v1  ;;  %4304 = vmatpush1.bf16.msra.mxu0 %v8286_v48  ;;  %v8342_v48 = vld [vmem:[#allocation6 + $0x1c4] ss:$16 sps:$4 sm:$0xff]  }
 0x49e   : > { %4305 = vmatprep.subr.bf16.mxu0 %v8294_v49  ;;  %v8345_v49 = vld [vmem:[#allocation6 + $0x1cc] ss:$16 sps:$4 sm:$0xff]  }
 0x4a0   : > { %7515 = vmatpush3.bf16.msra.mxu1 %v8230_v1 }
 0x4a1   : > { %7516 = vmatprep.subr.bf16.mxu1 %v8231_v2  ;;  %4306 = vmatpush1.bf16.msra.mxu0 %v8292_v50  ;;  %v8340_v50 = vld [vmem:[#allocation6 + $0x1c0] ss:$16 sps:$4 sm:$0xff]  }
 0x4a2   : > { %4307 = vmatprep.subr.bf16.mxu0 %v8300_v51  ;;  %v8343_v51 = vld [vmem:[#allocation6 + $0x1c8] ss:$16 sps:$4 sm:$0xff]  }
 0x4a4   : > { %7517 = vmatpush3.bf16.msra.mxu1 %v8231_v2 }
 0x4a5   : > { %3822 = vmatprep.subr.bf16.mxu1 %v8234_v3  ;;  %4308 = vmatpush1.bf16.msra.mxu0 %v8298_v52  ;;  %v8346_v52 = vld [vmem:[#allocation6 + $0x1e0] ss:$16 sps:$4 sm:$0xff]  }
 0x4a6   : > { %4309 = vmatprep.subr.bf16.mxu0 %v8306_v53  ;;  %v8348_v53 = vld [vmem:[#allocation6 + $0x1e4] ss:$16 sps:$4 sm:$0xff]  }
 0x4a9   : > { %4310 = vmatpush1.bf16.msra.mxu0 %v8304_v54  ;;  %v8349_v54 = vld [vmem:[#allocation6 + $0x1e8] ss:$16 sps:$4 sm:$0xff]  }
 0x4aa   : > { %4311 = vmatprep.subr.bf16.mxu0 %v8312_v55  ;;  %v8351_v55 = vld [vmem:[#allocation6 + $0x1ec] ss:$16 sps:$4 sm:$0xff]  }
 0x4ad   : > { %4312 = vmatpush1.bf16.msra.mxu0 %v8310_v56  ;;  %v4423_v56 = vld [vmem:[#allocation7] sm:$0xff] }
 0x4ae   : > { %4313 = vmatprep.subr.bf16.mxu0 %v8318_v57  ;;  %v4427_v57 = vld [vmem:[#allocation7 + $0x20] sm:$0xff] }
 0x4b1   : > { %4314 = vmatpush1.bf16.msra.mxu0 %v8316_v58  ;;  %v4424_v58 = vld [vmem:[#allocation7 + $0x8] sm:$0xff] }
 0x4b2   : > { %4315 = vmatprep.subr.bf16.mxu0 %v8324_v36  ;;  %v4439_v36 = vld [vmem:[#allocation7 + $0x80] sm:$0xff] }
 0x55a   : > { %v7500_v5 = vpop.f32.mrb[16].mxu1 }
 0x55b   : > { %v3567_v6 = vpop.f32.mrb[17].mxu1  ;;  %v3576_v14 = vadd.f32 %v7500_v5, %v7044_v4 }
 0x55c   : > { %v3568_v7 = vadd.f32 %v7044_v4, %v3567_v6  ;;  %v7501_v11 = vpop.f32.mrb[18].mxu1 }
 0x55d   : > { %v3579_v15 = vadd.f32 %v7501_v11, %v7044_v4  ;;  %v3570_v16 = vpop.f32.mrb[19].mxu1  ;;  %3586 = vst [vmem:[%s646_s21 + $0x10] sm:$0xff] %v3576_v14 }
 0x55e   : > { %3584 = vst [vmem:[%s646_s21] sm:$0xff] %v3568_v7  ;;  %v3571_v17 = vadd.f32 %v7044_v4, %v3570_v16  ;;  %v8267_v16 = vld [vmem:[#allocation6 + $0x2c] ss:$16 sps:$4 sm:$0xff]  }
 0x55f   : > { %v3583_v18 = vpack.c.bf16 %v3579_v15, %v3576_v14  ;;  %3587 = vst [vmem:[%s646_s21 + $0x18] sm:$0xff] %v3579_v15  ;;  %v8259_v14 = vld [vmem:[#allocation6 + $0x8] ss:$16 sps:$4 sm:$0xff]  }
 0x560   : > { %v3582_v19 = vpack.c.bf16 %v3571_v17, %v3568_v7  ;;  %3585 = vst [vmem:[%s646_s21 + $0x8] sm:$0xff] %v3571_v17  ;;  %v8265_v17 = vld [vmem:[#allocation6 + $0x28] ss:$16 sps:$4 sm:$0xff]  }
 0x562   : > { %7518 = vmatprep.mubr.bf16.mxu1 %v3582_v19  ;;  %v8271_v19 = vld [vmem:[#allocation6 + $0x48] ss:$16 sps:$4 sm:$0xff]  }
 0x563   : > { %7519 = vmatmul.mubr.bf16.vlgmr.msra.gmra.mrb[20].mxu1 %v3583_v18  ;;  %v8273_v18 = vld [vmem:[#allocation6 + $0x4c] ss:$16 sps:$4 sm:$0xff]  }
 0x564   : > { %3823 = vmatpush1.bf16.msra.mxu1 %v8232_v20  ;;  %3854 = vmatprep.mubr.bf16.mxu1 %v8604_v35  ;;  %v8279_v20 = vld [vmem:[#allocation6 + $0x6c] ss:$16 sps:$4 sm:$0xff]  }
 0x565   : > { %3824 = vmatprep.subr.bf16.mxu1 %v8237_v21  ;;  %v8277_v21 = vld [vmem:[#allocation6 + $0x68] ss:$16 sps:$4 sm:$0xff]  }
 0x568   : > { %3825 = vmatpush1.bf16.msra.mxu1 %v8235_v22  ;;  %v8285_v22 = vld [vmem:[#allocation6 + $0x8c] ss:$16 sps:$4 sm:$0xff]  }
 0x569   : > { %3826 = vmatprep.subr.bf16.mxu1 %v8240_v23  ;;  %v8283_v23 = vld [vmem:[#allocation6 + $0x88] ss:$16 sps:$4 sm:$0xff]  }
 0x56c   : > { %3827 = vmatpush1.bf16.msra.mxu1 %v8238_v24  ;;  %v8291_v24 = vld [vmem:[#allocation6 + $0xac] ss:$16 sps:$4 sm:$0xff]  }
 0x56d   : > { %3828 = vmatprep.subr.bf16.mxu1 %v8243_v26  ;;  %v8289_v26 = vld [vmem:[#allocation6 + $0xa8] ss:$16 sps:$4 sm:$0xff]  }
 0x570   : > { %3829 = vmatpush1.bf16.msra.mxu1 %v8241_v28  ;;  %v8297_v28 = vld [vmem:[#allocation6 + $0xcc] ss:$16 sps:$4 sm:$0xff]  }
 0x571   : > { %3830 = vmatprep.subr.bf16.mxu1 %v8246_v29  ;;  %v8295_v29 = vld [vmem:[#allocation6 + $0xc8] ss:$16 sps:$4 sm:$0xff]  }
 0x574   : > { %3831 = vmatpush1.bf16.msra.mxu1 %v8244_v30  ;;  %v8303_v30 = vld [vmem:[#allocation6 + $0xec] ss:$16 sps:$4 sm:$0xff]  }
 0x575   : > { %3832 = vmatprep.subr.bf16.mxu1 %v8249_v31  ;;  %v8301_v31 = vld [vmem:[#allocation6 + $0xe8] ss:$16 sps:$4 sm:$0xff]  }
 0x578   : > { %3833 = vmatpush1.bf16.msra.mxu1 %v8247_v32  ;;  %v8309_v32 = vld [vmem:[#allocation6 + $0x10c] ss:$16 sps:$4 sm:$0xff]  }
 0x579   : > { %3834 = vmatprep.subr.bf16.mxu1 %v8252_v33  ;;  %v8307_v33 = vld [vmem:[#allocation6 + $0x108] ss:$16 sps:$4 sm:$0xff]  }
 0x57c   : > { %3835 = vmatpush1.bf16.msra.mxu1 %v8250_v34  ;;  %v8315_v34 = vld [vmem:[#allocation6 + $0x12c] ss:$16 sps:$4 sm:$0xff]  }
 0x57d   : > { %3836 = vmatprep.subr.bf16.mxu1 %v8255_v25  ;;  %v8321_v25 = vld [vmem:[#allocation6 + $0x14c] ss:$16 sps:$4 sm:$0xff]  }
 0x580   : > { %3837 = vmatpush1.bf16.msra.mxu1 %v8253_v27  ;;  %v8319_v27 = vld [vmem:[#allocation6 + $0x148] ss:$16 sps:$4 sm:$0xff]  }
 0x581   : > { %4346 = vmatprep.subr.bf16.mxu1 %v8261_v38  ;;  %v8322_v38 = vld [vmem:[#allocation6 + $0x160] ss:$16 sps:$4 sm:$0xff]  }
 0x582   : > { %4316 = vmatpush1.bf16.msra.mxu0 %v8322_v38  ;;  %v4440_v38 = vld [vmem:[#allocation7 + $0x88] sm:$0xff] }
 0x583   : > { %4317 = vmatprep.subr.bf16.mxu0 %v8330_v40 }
 0x586   : > { %4318 = vmatpush1.bf16.msra.mxu0 %v8328_v42 }
 0x587   : > { %4319 = vmatprep.subr.bf16.mxu0 %v8336_v44 }
 0x58a   : > { %4320 = vmatpush1.bf16.msra.mxu0 %v8334_v46  ;;  %v4447_v46 = vld [vmem:[#allocation7 + $0xc0] sm:$0xff] }
 0x58b   : > { %4321 = vmatprep.subr.bf16.mxu0 %v8342_v48  ;;  %v4451_v48 = vld [vmem:[#allocation7 + $0xe0] sm:$0xff] }
 0x58e   : > { %4322 = vmatpush1.bf16.msra.mxu0 %v8340_v50  ;;  %v4452_v50 = vld [vmem:[#allocation7 + $0xe8] sm:$0xff] }
 0x58f   : > { %4323 = vmatprep.subr.bf16.mxu0 %v8348_v53 }
 0x592   : > { %4324 = vmatpush1.bf16.msra.mxu0 %v8346_v52 }
 0x636   : > { %v7520_v60 = vpop.f32.mrb[20].mxu1 }
 0x637   : > { %v3702_v61 = vadd.f32 %v7520_v60, %v7053_v59  ;;  %v3693_v62 = vpop.f32.mrb[21].mxu1  ;;  %v7143_v60 = vcombine.high %v4423_v56, %v4427_v57 }
 0x638   : > { %v3694_v63 = vadd.f32 %v7053_v59, %v3693_v62  ;;  %v7521_v0 = vpop.f32.mrb[22].mxu1 }
 0x639   : > { %8408 = vtanh.f32 %v3702_v61  ;;  %v3705_v1 = vadd.f32 %v7521_v0, %v7053_v59  ;;  %v3696_v2 = vpop.f32.mrb[23].mxu1  ;;  %v4428_v61 = vld [vmem:[#allocation7 + $0x28] sm:$0xff]  ;;  %6001 = vmatprep.subr.bf16.mxu0 %v7143_v60  ;;  %v3730_v0 = vld [vmem:[%s9454_s25] sm:$0x3] }
 0x63a   : > { %8410 = vtanh.f32 %v3694_v63  ;;  %v3697_v3 = vadd.f32 %v7053_v59, %v3696_v2  ;;  %v7142_v59 = vcombine.low %v4423_v56, %v4427_v57  ;;  %v7144_v62 = vcombine.low %v4424_v58, %v4428_v61  ;;  %v4456_v60 = vld [vmem:[#allocation7 + $0x108] sm:$0xff] }
 0x63b   : > { %8412 = vtanh.f32 %v3705_v1  ;;  %v7145_v63 = vcombine.high %v4424_v58, %v4428_v61  ;;  %v3735_v1 = vrot.slane %v3730_v0, %v9014_v9  ;;  %v3739_v2 = vrot.slane %v3730_v0, %v9023_v12  ;;  %v4455_v58 = vld [vmem:[#allocation7 + $0x100] sm:$0xff]  ;;  %v4460_v61 = vld [vmem:[#allocation7 + $0x128] sm:$0xff] }
 0x63c   : > { %8414 = vtanh.f32 %v3697_v3  ;;  %v7167_v56 = vcombine.high %v4447_v46, %v4451_v48 }
 0x643   : > { %v8409_v4 = vpop.eup %8408 }
 0x644   : > { %v8411_v5 = vpop.eup %8410 }
 0x645   : > { %v8413_v6 = vpop.eup %8412 }
 0x646   : > { %v8415_v7 = vpop.eup %8414  ;;  %v3713_v11 = vpack.c.bf16 %v8413_v6, %v8409_v4 }
 0x647   : > { %v3712_v15 = vpack.c.bf16 %v8415_v7, %v8411_v5 }
 0x649   : > { %3855 = vmatmul.mubr.bf16.vlgmr.msra.gmra.mrb[24].mxu1 %v3712_v15 }
 0x64a   : > { %3864 = vmatprep.mubr.bf16.mxu1 %v8604_v35  ;;  %4347 = vmatpush1.bf16.msra.mxu1 %v8259_v14  ;;  %v8313_v35 = vld [vmem:[#allocation6 + $0x128] ss:$16 sps:$4 sm:$0xff]  }
 0x64b   : > { %4348 = vmatprep.subr.bf16.mxu1 %v8267_v16 }
 0x64e   : > { %4349 = vmatpush1.bf16.msra.mxu1 %v8265_v17 }
 0x64f   : > { %4350 = vmatprep.subr.bf16.mxu1 %v8273_v18 }
 0x651   : > { %3865 = vmatmul.mubr.bf16.gmra.mrb[28].mxu1 %v3713_v11 }
 0x652   : > { %4351 = vmatpush1.bf16.msra.mxu1 %v8271_v19 }
 0x653   : > { %4352 = vmatprep.subr.bf16.mxu1 %v8279_v20 }
 0x656   : > { %4353 = vmatpush1.bf16.msra.mxu1 %v8277_v21 }
 0x657   : > { %4354 = vmatprep.subr.bf16.mxu1 %v8285_v22 }
 0x65a   : > { %4355 = vmatpush1.bf16.msra.mxu1 %v8283_v23 }
 0x65b   : > { %4356 = vmatprep.subr.bf16.mxu1 %v8291_v24 }
 0x65e   : > { %4357 = vmatpush1.bf16.msra.mxu1 %v8289_v26 }
 0x65f   : > { %4358 = vmatprep.subr.bf16.mxu1 %v8297_v28  ;;  %v4431_v28 = vld [vmem:[#allocation7 + $0x40] sm:$0xff] }
 0x662   : > { %4359 = vmatpush1.bf16.msra.mxu1 %v8295_v29 }
 0x663   : > { %4360 = vmatprep.subr.bf16.mxu1 %v8303_v30  ;;  %v4435_v30 = vld [vmem:[#allocation7 + $0x60] sm:$0xff] }
 0x666   : > { %4361 = vmatpush1.bf16.msra.mxu1 %v8301_v31  ;;  %v4432_v31 = vld [vmem:[#allocation7 + $0x48] sm:$0xff] }
 0x667   : > { %4362 = vmatprep.subr.bf16.mxu1 %v8309_v32  ;;  %v4436_v32 = vld [vmem:[#allocation7 + $0x68] sm:$0xff] }
 0x668   : > { %v7152_v42 = vcombine.low %v4432_v31, %v4436_v32 }
 0x66a   : > { %4363 = vmatpush1.bf16.msra.mxu1 %v8307_v33 }
 0x66b   : > { %4364 = vmatprep.subr.bf16.mxu1 %v8315_v34 }
 0x66e   : > { %4365 = vmatpush1.bf16.msra.mxu1 %v8313_v35 }
 0x66f   : > { %4366 = vmatprep.subr.bf16.mxu1 %v8321_v25  ;;  %v7151_v25 = vcombine.high %v4431_v28, %v4435_v30 }
 0x672   : > { %4367 = vmatpush1.bf16.msra.mxu1 %v8319_v27  ;;  %v7153_v27 = vcombine.high %v4432_v31, %v4436_v32 }
 0x673   : > { %4368 = vmatprep.subr.bf16.mxu1 %v8327_v37  ;;  %v4443_v37 = vld [vmem:[#allocation7 + $0xa0] sm:$0xff] }
 0x674   : > { %v7159_v44 = vcombine.high %v4439_v36, %v4443_v37 }
 0x676   : > { %4369 = vmatpush1.bf16.msra.mxu1 %v8325_v39  ;;  %v4444_v39 = vld [vmem:[#allocation7 + $0xa8] sm:$0xff] }
 0x677   : > { %4370 = vmatprep.subr.bf16.mxu1 %v8333_v41  ;;  %v7150_v41 = vcombine.low %v4431_v28, %v4435_v30  ;;  %v4484_v28 = vld [vmem:[#allocation7 + $0x1e8] sm:$0xff] }
 0x67a   : > { %4371 = vmatpush1.bf16.msra.mxu1 %v8331_v43 }
 0x67b   : > { %4372 = vmatprep.subr.bf16.mxu1 %v8339_v45  ;;  %v7161_v45 = vcombine.high %v4440_v38, %v4444_v39 }
 0x67e   : > { %4373 = vmatpush1.bf16.msra.mxu1 %v8337_v47 }
 0x67f   : > { %4374 = vmatprep.subr.bf16.mxu1 %v8345_v49  ;;  %v4448_v49 = vld [vmem:[#allocation7 + $0xc8] sm:$0xff] }
 0x680   : > { %v7169_v57 = vcombine.high %v4448_v49, %v4452_v50 }
 0x682   : > { %4375 = vmatpush1.bf16.msra.mxu1 %v8343_v51 }
 0x683   : > { %4376 = vmatprep.subr.bf16.mxu1 %v8351_v55  ;;  %v7160_v55 = vcombine.low %v4440_v38, %v4444_v39  ;;  %v4495_v39 = vld [vmem:[#allocation7 + $0x240] sm:$0xff] }
 0x686   : > { %4377 = vmatpush1.bf16.msra.mxu1 %v8349_v54  ;;  %v7158_v54 = vcombine.low %v4439_v36, %v4443_v37 }
 0x687   : > { %6107 = vmatprep.subr.bf16.mxu1 %v7145_v63  ;;  %v7168_v63 = vcombine.low %v4448_v49, %v4452_v50  ;;  %v4504_v49 = vld [vmem:[#allocation7 + $0x288] sm:$0xff] }
 0x688   : > { %v4508_v50 = vld [vmem:[#allocation7 + $0x2a8] sm:$0xff] }
 0x71c   : > { %v3856_v3 = vpop.f32.mrb[24].mxu1 }
 0x71d   : > { %v3857_v4 = vadd.f32 %v3856_v3, %v3735_v1  ;;  %v3858_v5 = vpop.f32.mrb[25].mxu1  ;;  %v4467_v3 = vld [vmem:[#allocation7 + $0x160] sm:$0xff] }
 0x71e   : > { %v3859_v6 = vadd.f32 %v3858_v5, %v3739_v2  ;;  %v3860_v7 = vpop.f32.mrb[26].mxu1  ;;  %v4468_v5 = vld [vmem:[#allocation7 + $0x168] sm:$0xff] }
 0x71f   : > { %8416 = vtanh.f32 %v3857_v4  ;;  %v3861_v11 = vadd.f32 %v3860_v7, %v3735_v1  ;;  %v3862_v14 = vpop.f32.mrb[27].mxu1  ;;  %v4464_v4 = vld [vmem:[#allocation7 + $0x148] sm:$0xff]  ;;  %v7176_v7 = vcombine.low %v4456_v60, %v4460_v61 }
 0x720   : > { %8418 = vtanh.f32 %v3859_v6  ;;  %v3863_v15 = vadd.f32 %v3862_v14, %v3739_v2  ;;  %v7185_v14 = vcombine.high %v4464_v4, %v4468_v5 }
 0x721   : > { %8420 = vtanh.f32 %v3861_v11 }
 0x722   : > { %8422 = vtanh.f32 %v3863_v15  ;;  %v4471_v15 = vld [vmem:[#allocation7 + $0x180] sm:$0xff] }
 0x724   : > { %v3866_v16 = vpop.f32.mrb[28].mxu1 }
 0x725   : > { %v3867_v17 = vadd.f32 %v3866_v16, %v3735_v1  ;;  %v3868_v18 = vpop.f32.mrb[29].mxu1  ;;  %v4475_v16 = vld [vmem:[#allocation7 + $0x1a0] sm:$0xff] }
 0x726   : > { %v3869_v19 = vadd.f32 %v3868_v18, %v3739_v2  ;;  %v3870_v20 = vpop.f32.mrb[30].mxu1  ;;  %v4476_v18 = vld [vmem:[#allocation7 + $0x1a8] sm:$0xff] }
 0x727   : > { %8424 = vtanh.f32 %v3867_v17  ;;  %v3871_v21 = vadd.f32 %v3870_v20, %v3735_v1  ;;  %v3872_v22 = vpop.f32.mrb[31].mxu1  ;;  %v7177_v1 = vcombine.high %v4456_v60, %v4460_v61  ;;  %v4472_v17 = vld [vmem:[#allocation7 + $0x188] sm:$0xff]  ;;  %v7184_v20 = vcombine.low %v4464_v4, %v4468_v5 }
 0x728   : > { %8426 = vtanh.f32 %v3869_v19  ;;  %v3873_v23 = vadd.f32 %v3872_v22, %v3739_v2  ;;  %v4463_v2 = vld [vmem:[#allocation7 + $0x140] sm:$0xff]  ;;  %v7193_v22 = vcombine.high %v4472_v17, %v4476_v18  ;;  %v7192_v30 = vcombine.low %v4472_v17, %v4476_v18  ;;  %v4524_v5 = vld [vmem:[#allocation7 + $0x328] sm:$0xff] }
 0x729   : > { %v8417_v24 = vpop.eup %8416  ;;  %8428 = vtanh.f32 %v3871_v21  ;;  %v7183_v11 = vcombine.high %v4463_v2, %v4467_v3  ;;  %v7182_v19 = vcombine.low %v4463_v2, %v4467_v3  ;;  %v7191_v21 = vcombine.high %v4471_v15, %v4475_v16  ;;  %v4523_v2 = vld [vmem:[#allocation7 + $0x320] sm:$0xff]  ;;  %v4520_v3 = vld [vmem:[#allocation7 + $0x308] sm:$0xff] }
 0x72a   : > { %v8419_v26 = vpop.eup %8418  ;;  %8430 = vtanh.f32 %v3873_v23  ;;  %v4479_v23 = vld [vmem:[#allocation7 + $0x1c0] sm:$0xff]  ;;  %v7224_v60 = vcombine.low %v4504_v49, %v4508_v50  ;;  %v4532_v18 = vld [vmem:[#allocation7 + $0x368] sm:$0xff] }
 0x72b   : > { %v8421_v29 = vpop.eup %8420 }
 0x72c   : > { %v8423_v33 = vpop.eup %8422  ;;  %v3883_v34 = vpack.c.bf16 %v8421_v29, %v8417_v24  ;;  %v4483_v24 = vld [vmem:[#allocation7 + $0x1e0] sm:$0xff]  ;;  %v7190_v29 = vcombine.low %v4471_v15, %v4475_v16  ;;  %v4528_v16 = vld [vmem:[#allocation7 + $0x348] sm:$0xff] }
 0x72d   : > { %v3884_v35 = vpack.c.bf16 %v8423_v33, %v8419_v26  ;;  %v4480_v26 = vld [vmem:[#allocation7 + $0x1c8] sm:$0xff]  ;;  %v7199_v31 = vcombine.high %v4479_v23, %v4483_v24  ;;  %v4487_v33 = vld [vmem:[#allocation7 + $0x200] sm:$0xff] }
 0x72e   : > { %v7201_v32 = vcombine.high %v4480_v26, %v4484_v28  ;;  %v7200_v36 = vcombine.low %v4480_v26, %v4484_v28  ;;  %v4531_v15 = vld [vmem:[#allocation7 + $0x360] sm:$0xff]  ;;  %v4540_v28 = vld [vmem:[#allocation7 + $0x3a8] sm:$0xff] }
 0x72f   : > { %4325 = vmatprep.mubr.bf16.mxu0 %v3884_v35  ;;  %4378 = vmatprep.mubr.bf16.mxu1 %v3884_v35  ;;  %v4488_v35 = vld [vmem:[#allocation7 + $0x208] sm:$0xff] }
 0x730   : > { %4326 = vmatmul.mubr.bf16.vlgmr.msra.gmra.mrb[16].mxu0 %v3883_v34  ;;  %4379 = vmatmul.mubr.bf16.vlgmr.msra.gmra.mrb[32].mxu1 %v3883_v34  ;;  %v4491_v34 = vld [vmem:[#allocation7 + $0x220] sm:$0xff] }
 0x731   : > { %v8425_v40 = vpop.eup %8424  ;;  %6002 = vmatpush1.bf16.msra.mxu0 %v7142_v59  ;;  %6108 = vmatpush1.bf16.msra.mxu1 %v7144_v62  ;;  %v4459_v59 = vld [vmem:[#allocation7 + $0x120] sm:$0xff]  ;;  %v7166_v62 = vcombine.low %v4447_v46, %v4451_v48  ;;  %v7207_v37 = vcombine.high %v4487_v33, %v4491_v34 }
 0x732   : > { %v8427_v43 = vpop.eup %8426  ;;  %6003 = vmatprep.subr.bf16.mxu0 %v7151_v25  ;;  %6109 = vmatprep.subr.bf16.mxu1 %v7153_v27  ;;  %v7175_v0 = vcombine.high %v4455_v58, %v4459_v59  ;;  %v7174_v6 = vcombine.low %v4455_v58, %v4459_v59  ;;  %v4492_v25 = vld [vmem:[#allocation7 + $0x228] sm:$0xff]  ;;  %v7198_v27 = vcombine.low %v4479_v23, %v4483_v24  ;;  %v4507_v48 = vld [vmem:[#allocation7 + $0x2a0] sm:$0xff] }
 0x733   : > { %v8429_v47 = vpop.eup %8428  ;;  %v7209_v38 = vcombine.high %v4488_v35, %v4492_v25  ;;  %v4516_v58 = vld [vmem:[#allocation7 + $0x2e8] sm:$0xff]  ;;  %v4539_v23 = vld [vmem:[#allocation7 + $0x3a0] sm:$0xff] }
 0x734   : > { %v8431_v51 = vpop.eup %8430  ;;  %v3885_v52 = vpack.c.bf16 %v8429_v47, %v8425_v40  ;;  %v4499_v40 = vld [vmem:[#allocation7 + $0x260] sm:$0xff]  ;;  %v4536_v24 = vld [vmem:[#allocation7 + $0x388] sm:$0xff] }
 0x735   : > { %v3886_v53 = vpack.c.bf16 %v8431_v51, %v8427_v43  ;;  %6004 = vmatpush1.bf16.msra.mxu0 %v7150_v41  ;;  %6110 = vmatpush1.bf16.msra.mxu1 %v7152_v42  ;;  %v4496_v41 = vld [vmem:[#allocation7 + $0x248] sm:$0xff]  ;;  %v7206_v43 = vcombine.low %v4487_v33, %v4491_v34  ;;  %v4503_v47 = vld [vmem:[#allocation7 + $0x280] sm:$0xff]  ;;  %v7214_v51 = vcombine.low %v4495_v39, %v4499_v40 }
 0x736   : > { %6005 = vmatprep.subr.bf16.mxu0 %v7159_v44  ;;  %6111 = vmatprep.subr.bf16.mxu1 %v7161_v45  ;;  %v4500_v42 = vld [vmem:[#allocation7 + $0x268] sm:$0xff]  ;;  %v7208_v44 = vcombine.low %v4488_v35, %v4492_v25  ;;  %v7215_v45 = vcombine.high %v4495_v39, %v4499_v40  ;;  %v7222_v59 = vcombine.low %v4503_v47, %v4507_v48  ;;  %v4547_v33 = vld [vmem:[#allocation7 + $0x3e0] sm:$0xff] }
 0x737   : > { %4335 = vmatprep.mubr.bf16.mxu0 %v3886_v53  ;;  %4388 = vmatprep.mubr.bf16.mxu1 %v3886_v53  ;;  %v7217_v46 = vcombine.high %v4496_v41, %v4500_v42  ;;  %v7223_v53 = vcombine.high %v4503_v47, %v4507_v48  ;;  %v4544_v34 = vld [vmem:[#allocation7 + $0x3c8] sm:$0xff]  ;;  %v9299_v39 = vld [vmem:[#allocation7 + $0x420] sm:$0xff] }
 0x738   : > { %4336 = vmatmul.mubr.bf16.gmra.mrb[20].mxu0 %v3885_v52  ;;  %4389 = vmatmul.mubr.bf16.gmra.mrb[36].mxu1 %v3885_v52  ;;  %v7216_v52 = vcombine.low %v4496_v41, %v4500_v42  ;;  %v4548_v25 = vld [vmem:[#allocation7 + $0x3e8] sm:$0xff] }
 0x739   : > { %6006 = vmatpush1.bf16.msra.mxu0 %v7158_v54  ;;  %6112 = vmatpush1.bf16.msra.mxu1 %v7160_v55  ;;  %v7225_v54 = vcombine.high %v4504_v49, %v4508_v50  ;;  %v4511_v55 = vld [vmem:[#allocation7 + $0x2c0] sm:$0xff]  ;;  %v9301_v40 = vld [vmem:[#allocation7 + $0x408] sm:$0xff] }
 0x73a   : > { %6007 = vmatprep.subr.bf16.mxu0 %v7167_v56  ;;  %6113 = vmatprep.subr.bf16.mxu1 %v7169_v57  ;;  %v4515_v56 = vld [vmem:[#allocation7 + $0x2e0] sm:$0xff]  ;;  %v4512_v57 = vld [vmem:[#allocation7 + $0x2c8] sm:$0xff] }
 0x73b   : > { %v7231_v61 = vcombine.high %v4511_v55, %v4515_v56  ;;  %v9305_v42 = vld [vmem:[#allocation7 + $0x428] sm:$0xff] }
 0x73d   : > { %6008 = vmatpush1.bf16.msra.mxu0 %v7166_v62  ;;  %6114 = vmatpush1.bf16.msra.mxu1 %v7168_v63  ;;  %v7233_v62 = vcombine.high %v4512_v57, %v4516_v58  ;;  %v7230_v63 = vcombine.low %v4511_v55, %v4515_v56 }
 0x73e   : > { %6009 = vmatprep.subr.bf16.mxu0 %v7175_v0  ;;  %6115 = vmatprep.subr.bf16.mxu1 %v7177_v1  ;;  %v7232_v0 = vcombine.low %v4512_v57, %v4516_v58  ;;  %v4519_v1 = vld [vmem:[#allocation7 + $0x300] sm:$0xff] }
 0x73f   : > { %v7239_v4 = vcombine.high %v4519_v1, %v4523_v2 }
 0x741   : > { %6010 = vmatpush1.bf16.msra.mxu0 %v7174_v6  ;;  %6116 = vmatpush1.bf16.msra.mxu1 %v7176_v7  ;;  %v7238_v6 = vcombine.low %v4519_v1, %v4523_v2  ;;  %v7240_v7 = vcombine.low %v4520_v3, %v4524_v5 }
 0x742   : > { %6011 = vmatprep.subr.bf16.mxu0 %v7183_v11  ;;  %6117 = vmatprep.subr.bf16.mxu1 %v7185_v14  ;;  %v7241_v11 = vcombine.high %v4520_v3, %v4524_v5  ;;  %v4527_v14 = vld [vmem:[#allocation7 + $0x340] sm:$0xff] }
 0x743   : > { %v7247_v17 = vcombine.high %v4527_v14, %v4531_v15 }
 0x745   : > { %6012 = vmatpush1.bf16.msra.mxu0 %v7182_v19  ;;  %6118 = vmatpush1.bf16.msra.mxu1 %v7184_v20  ;;  %v7246_v19 = vcombine.low %v4527_v14, %v4531_v15  ;;  %v7248_v20 = vcombine.low %v4528_v16, %v4532_v18 }
 0x746   : > { %6013 = vmatprep.subr.bf16.mxu0 %v7191_v21  ;;  %6119 = vmatprep.subr.bf16.mxu1 %v7193_v22  ;;  %v7249_v21 = vcombine.high %v4528_v16, %v4532_v18  ;;  %v4535_v22 = vld [vmem:[#allocation7 + $0x380] sm:$0xff] }
 0x747   : > { %v7255_v26 = vcombine.high %v4535_v22, %v4539_v23 }
 0x749   : > { %6014 = vmatpush1.bf16.msra.mxu0 %v7190_v29  ;;  %6120 = vmatpush1.bf16.msra.mxu1 %v7192_v30  ;;  %v7254_v29 = vcombine.low %v4535_v22, %v4539_v23  ;;  %v7256_v30 = vcombine.low %v4536_v24, %v4540_v28 }
 0x74a   : > { %6015 = vmatprep.subr.bf16.mxu0 %v7199_v31  ;;  %6121 = vmatprep.subr.bf16.mxu1 %v7201_v32  ;;  %v7257_v31 = vcombine.high %v4536_v24, %v4540_v28  ;;  %v4543_v32 = vld [vmem:[#allocation7 + $0x3c0] sm:$0xff] }
 0x74b   : > { %v7263_v35 = vcombine.high %v4543_v32, %v4547_v33 }
 0x74d   : > { %6016 = vmatpush1.bf16.msra.mxu0 %v7198_v27  ;;  %6122 = vmatpush1.bf16.msra.mxu1 %v7200_v36  ;;  %v7262_v27 = vcombine.low %v4543_v32, %v4547_v33  ;;  %v7264_v36 = vcombine.low %v4544_v34, %v4548_v25 }
 0x74e   : > { %6017 = vmatprep.subr.bf16.mxu0 %v7207_v37  ;;  %6123 = vmatprep.subr.bf16.mxu1 %v7209_v38  ;;  %v7265_v37 = vcombine.high %v4544_v34, %v4548_v25  ;;  %v9297_v38 = vld [vmem:[#allocation7 + $0x400] sm:$0xff]  ;;  %v4564_v25 = vld [vmem:[#allocation7 + $0x468] sm:$0xff] }
 0x74f   : > { %v7271_v41 = vcombine.high %v9297_v38, %v9299_v39  ;;  %v4563_v34 = vld [vmem:[#allocation7 + $0x460] sm:$0xff] }
 0x751   : > { %6018 = vmatpush1.bf16.msra.mxu0 %v7206_v43  ;;  %6124 = vmatpush1.bf16.msra.mxu1 %v7208_v44  ;;  %v7270_v43 = vcombine.low %v9297_v38, %v9299_v39  ;;  %v7272_v44 = vcombine.low %v9301_v40, %v9305_v42  ;;  %v4580_v38 = vld [vmem:[#allocation7 + $0x4e8] sm:$0xff] }
 0x752   : > { %6019 = vmatprep.subr.bf16.mxu0 %v7215_v45  ;;  %6125 = vmatprep.subr.bf16.mxu1 %v7217_v46  ;;  %v7273_v45 = vcombine.high %v9301_v40, %v9305_v42  ;;  %v3951_v46 = vld [vmem:[%s9455_s1] sm:$0xf] }
 0x753   : > { %v3956_v47 = vrot.slane %v3951_v46, %v9014_v9  ;;  %v3964_v48 = vrot.slane %v3951_v46, %v9017_v10  ;;  %v3960_v49 = vrot.slane %v3951_v46, %v9023_v12  ;;  %v3968_v50 = vrot.slane %v3951_v46, %v9026_v13 }
 0x755   : > { %6020 = vmatpush1.bf16.msra.mxu0 %v7214_v51  ;;  %6126 = vmatpush1.bf16.msra.mxu1 %v7216_v52 }
 0x756   : > { %6021 = vmatprep.subr.bf16.mxu0 %v7223_v53  ;;  %6127 = vmatprep.subr.bf16.mxu1 %v7225_v54 }
 0x759   : > { %6022 = vmatpush1.bf16.msra.mxu0 %v7222_v59  ;;  %6128 = vmatpush1.bf16.msra.mxu1 %v7224_v60 }
 0x75a   : > { %6023 = vmatprep.subr.bf16.mxu0 %v7231_v61  ;;  %6129 = vmatprep.subr.bf16.mxu1 %v7233_v62 }
 0x75d   : > { %6024 = vmatpush1.bf16.msra.mxu0 %v7230_v63  ;;  %6130 = vmatpush1.bf16.msra.mxu1 %v7232_v0 }
 0x75e   : > { %6025 = vmatprep.subr.bf16.mxu0 %v7239_v4  ;;  %6131 = vmatprep.subr.bf16.mxu1 %v7241_v11 }
 0x761   : > { %6026 = vmatpush1.bf16.msra.mxu0 %v7238_v6  ;;  %6132 = vmatpush1.bf16.msra.mxu1 %v7240_v7 }
 0x762   : > { %6027 = vmatprep.subr.bf16.mxu0 %v7247_v17  ;;  %6133 = vmatprep.subr.bf16.mxu1 %v7249_v21 }
 0x765   : > { %6028 = vmatpush1.bf16.msra.mxu0 %v7246_v19  ;;  %6134 = vmatpush1.bf16.msra.mxu1 %v7248_v20 }
 0x766   : > { %6029 = vmatprep.subr.bf16.mxu0 %v7255_v26  ;;  %6135 = vmatprep.subr.bf16.mxu1 %v7257_v31  ;;  %v4559_v31 = vld [vmem:[#allocation7 + $0x440] sm:$0xff] }
 0x767   : > { %v7279_v46 = vcombine.high %v4559_v31, %v4563_v34 }
 0x769   : > { %6030 = vmatpush1.bf16.msra.mxu0 %v7254_v29  ;;  %6136 = vmatpush1.bf16.msra.mxu1 %v7256_v30 }
 0x76a   : > { %6031 = vmatprep.subr.bf16.mxu0 %v7263_v35  ;;  %6137 = vmatprep.subr.bf16.mxu1 %v7265_v37  ;;  %v4560_v35 = vld [vmem:[#allocation7 + $0x448] sm:$0xff] }
 0x76d   : > { %6032 = vmatpush1.bf16.msra.mxu0 %v7262_v27  ;;  %6138 = vmatpush1.bf16.msra.mxu1 %v7264_v36 }
 0x76e   : > { %6054 = vmatprep.subr.bf16.mxu0 %v7271_v41  ;;  %6160 = vmatprep.subr.bf16.mxu1 %v7273_v45 }
 0x803   : > { %v4327_v51 = vpop.f32.mrb[16].mxu0  ;;  %v4380_v52 = vpop.f32.mrb[32].mxu1 }
 0x804   : > { %v4328_v53 = vadd.f32 %v4327_v51, %v3956_v47  ;;  %v4381_v54 = vadd.f32 %v4380_v52, %v3964_v48  ;;  %v4329_v55 = vpop.f32.mrb[17].mxu0  ;;  %v4382_v56 = vpop.f32.mrb[33].mxu1  ;;  %v4571_v51 = vld [vmem:[#allocation7 + $0x4a0] sm:$0xff]  ;;  %v4568_v52 = vld [vmem:[#allocation7 + $0x488] sm:$0xff] }
 0x805   : > { %v4330_v57 = vadd.f32 %v4329_v55, %v3960_v49  ;;  %v4383_v58 = vadd.f32 %v4382_v56, %v3968_v50  ;;  %v4331_v59 = vpop.f32.mrb[18].mxu0  ;;  %v4384_v60 = vpop.f32.mrb[34].mxu1  ;;  %v7278_v56 = vcombine.low %v4559_v31, %v4563_v34  ;;  %v4600_v31 = vld [vmem:[#allocation7 + $0x588] sm:$0xff] }
 0x806   : > { %8432 = vtanh.f32 %v4328_v53  ;;  %v4332_v61 = vadd.f32 %v4331_v59, %v3956_v47  ;;  %v4333_v62 = vpop.f32.mrb[19].mxu0  ;;  %v4386_v63 = vpop.f32.mrb[35].mxu1  ;;  %v4385_v0 = vadd.f32 %v4384_v60, %v3964_v48  ;;  %v4572_v53 = vld [vmem:[#allocation7 + $0x4a8] sm:$0xff] }
 0x807   : > { %8434 = vtanh.f32 %v4381_v54  ;;  %v4334_v1 = vadd.f32 %v4333_v62, %v3960_v49  ;;  %v4387_v2 = vadd.f32 %v4386_v63, %v3968_v50  ;;  %v7289_v60 = vcombine.high %v4568_v52, %v4572_v53  ;;  %v4575_v63 = vld [vmem:[#allocation7 + $0x4c0] sm:$0xff] }
 0x808   : > { %8436 = vtanh.f32 %v4330_v57  ;;  %v7280_v57 = vcombine.low %v4560_v35, %v4564_v25 }
 0x809   : > { %8438 = vtanh.f32 %v4383_v58 }
 0x80a   : > { %8440 = vtanh.f32 %v4332_v61 }
 0x80b   : > { %8442 = vtanh.f32 %v4385_v0  ;;  %v4337_v3 = vpop.f32.mrb[20].mxu0  ;;  %v4390_v4 = vpop.f32.mrb[36].mxu1 }
 0x80c   : > { %8444 = vtanh.f32 %v4334_v1  ;;  %v4338_v5 = vadd.f32 %v4337_v3, %v3956_v47  ;;  %v4391_v6 = vadd.f32 %v4390_v4, %v3964_v48  ;;  %v4339_v7 = vpop.f32.mrb[21].mxu0  ;;  %v4392_v11 = vpop.f32.mrb[37].mxu1  ;;  %v4579_v1 = vld [vmem:[#allocation7 + $0x4e0] sm:$0xff] }
 0x80d   : > { %8446 = vtanh.f32 %v4387_v2  ;;  %v4340_v14 = vadd.f32 %v4339_v7, %v3960_v49  ;;  %v4393_v15 = vadd.f32 %v4392_v11, %v3968_v50  ;;  %v4341_v16 = vpop.f32.mrb[22].mxu0  ;;  %v4394_v17 = vpop.f32.mrb[38].mxu1  ;;  %v4576_v2 = vld [vmem:[#allocation7 + $0x4c8] sm:$0xff]  ;;  %v4583_v3 = vld [vmem:[#allocation7 + $0x500] sm:$0xff] }
 0x80e   : > { %8448 = vtanh.f32 %v4338_v5  ;;  %v4342_v18 = vadd.f32 %v4341_v16, %v3956_v47  ;;  %v4343_v19 = vpop.f32.mrb[23].mxu0  ;;  %v4396_v20 = vpop.f32.mrb[39].mxu1  ;;  %v4395_v21 = vadd.f32 %v4394_v17, %v3964_v48  ;;  %v7281_v47 = vcombine.high %v4560_v35, %v4564_v25  ;;  %v4567_v48 = vld [vmem:[#allocation7 + $0x480] sm:$0xff]  ;;  %v4584_v11 = vld [vmem:[#allocation7 + $0x508] sm:$0xff] }
 0x80f   : > { %8450 = vtanh.f32 %v4391_v6  ;;  %v4344_v23 = vadd.f32 %v4343_v19, %v3960_v49  ;;  %v4397_v26 = vadd.f32 %v4396_v20, %v3968_v50  ;;  %v7287_v59 = vcombine.high %v4567_v48, %v4571_v51  ;;  %v4587_v7 = vld [vmem:[#allocation7 + $0x520] sm:$0xff] }
 0x810   : > { %v8433_v22 = vpop.eup %8432  ;;  %8452 = vtanh.f32 %v4340_v14  ;;  %v7286_v42 = vcombine.low %v4567_v48, %v4571_v51  ;;  %v7295_v5 = vcombine.high %v4575_v63, %v4579_v1  ;;  %v7297_v6 = vcombine.high %v4576_v2, %v4580_v38  ;;  %v4588_v14 = vld [vmem:[#allocation7 + $0x528] sm:$0xff]  ;;  %v4591_v19 = vld [vmem:[#allocation7 + $0x540] sm:$0xff] }
 0x811   : > { %v8435_v24 = vpop.eup %8434  ;;  %8454 = vtanh.f32 %v4393_v15  ;;  %v7294_v15 = vcombine.low %v4575_v63, %v4579_v1  ;;  %v7296_v16 = vcombine.low %v4576_v2, %v4580_v38  ;;  %v7303_v17 = vcombine.high %v4583_v3, %v4587_v7  ;;  %v4595_v20 = vld [vmem:[#allocation7 + $0x560] sm:$0xff]  ;;  %v4628_v1 = vld [vmem:[#allocation7 + $0x668] sm:$0xff] }
 0x812   : > { %v8437_v28 = vpop.eup %8436  ;;  %8456 = vtanh.f32 %v4342_v18  ;;  %v7305_v18 = vcombine.high %v4584_v11, %v4588_v14  ;;  %v7310_v34 = vcombine.low %v4591_v19, %v4595_v20  ;;  %v4627_v63 = vld [vmem:[#allocation7 + $0x660] sm:$0xff] }
 0x813   : > { %v8439_v29 = vpop.eup %8438  ;;  %8458 = vtanh.f32 %v4395_v21  ;;  %v4592_v21 = vld [vmem:[#allocation7 + $0x548] sm:$0xff] }
 0x814   : > { %v8441_v30 = vpop.eup %8440  ;;  %8460 = vtanh.f32 %v4344_v23  ;;  %v7302_v23 = vcombine.low %v4583_v3, %v4587_v7  ;;  %v4635_v3 = vld [vmem:[#allocation7 + $0x6a0] sm:$0xff] }
 0x815   : > { %v8443_v32 = vpop.eup %8442  ;;  %8462 = vtanh.f32 %v4397_v26  ;;  %v9320_v33 = vpack.c.bf16 %v8441_v30, %v8433_v22  ;;  %v4596_v22 = vld [vmem:[#allocation7 + $0x568] sm:$0xff]  ;;  %v7311_v26 = vcombine.high %v4591_v19, %v4595_v20  ;;  %v4603_v30 = vld [vmem:[#allocation7 + $0x5a0] sm:$0xff] }
 0x816   : > { %v8445_v27 = vpop.eup %8444  ;;  %v9322_v36 = vpack.c.bf16 %v8443_v32, %v8435_v24  ;;  %v7304_v24 = vcombine.low %v4584_v11, %v4588_v14  ;;  %v4604_v32 = vld [vmem:[#allocation7 + $0x5a8] sm:$0xff]  ;;  %v7312_v35 = vcombine.low %v4592_v21, %v4596_v22 }
 0x817   : > { %v8447_v37 = vpop.eup %8446  ;;  %v9324_v41 = vpack.c.bf16 %v8445_v27, %v8437_v28  ;;  %v7313_v28 = vcombine.high %v4592_v21, %v4596_v22  ;;  %v7321_v27 = vcombine.high %v4600_v31, %v4604_v32  ;;  %v4644_v19 = vld [vmem:[#allocation7 + $0x6e8] sm:$0xff] }
 0x818   : > { %v8449_v45 = vpop.eup %8448  ;;  %v9326_v49 = vpack.c.bf16 %v8447_v37, %v8439_v29  ;;  %v4599_v29 = vld [vmem:[#allocation7 + $0x580] sm:$0xff] }
 0x819   : > { %v8451_v50 = vpop.eup %8450  ;;  %6033 = vmatprep.mubr.bf16.mxu0 %v9324_v41  ;;  %6139 = vmatprep.mubr.bf16.mxu1 %v9324_v41  ;;  %v7319_v25 = vcombine.high %v4599_v29, %v4603_v30  ;;  %v4607_v37 = vld [vmem:[#allocation7 + $0x5c0] sm:$0xff]  ;;  %v7318_v48 = vcombine.low %v4599_v29, %v4603_v30  ;;  %v4652_v29 = vld [vmem:[#allocation7 + $0x728] sm:$0xff] }
 0x81a   : > { %v8453_v54 = vpop.eup %8452  ;;  %6034 = vmatmul.mubr.bf16.vlgmr.msra.gmra.mrb[24].mxu0 %v9320_v33  ;;  %6140 = vmatmul.mubr.bf16.vlgmr.msra.gmra.mrb[40].mxu1 %v9320_v33 }
 0x81b   : > { %v8455_v55 = vpop.eup %8454  ;;  %6055 = vmatpush1.bf16.msra.mxu0 %v7270_v43  ;;  %6161 = vmatpush1.bf16.msra.mxu1 %v7272_v44  ;;  %v7288_v44 = vcombine.low %v4568_v52, %v4572_v53  ;;  %v4615_v53 = vld [vmem:[#allocation7 + $0x600] sm:$0xff] }
 0x81c   : > { %v8457_v58 = vpop.eup %8456  ;;  %6056 = vmatprep.subr.bf16.mxu0 %v7279_v46  ;;  %6162 = vmatprep.subr.bf16.mxu1 %v7281_v47  ;;  %v4608_v46 = vld [vmem:[#allocation7 + $0x5c8] sm:$0xff] }
 0x81d   : > { %v8459_v61 = vpop.eup %8458  ;;  %v9338_v62 = vpack.c.bf16 %v8457_v58, %v8449_v45  ;;  %v4611_v45 = vld [vmem:[#allocation7 + $0x5e0] sm:$0xff]  ;;  %v4612_v47 = vld [vmem:[#allocation7 + $0x5e8] sm:$0xff] }
 0x81e   : > { %v8461_v0 = vpop.eup %8460  ;;  %v9340_v39 = vpack.c.bf16 %v8459_v61, %v8451_v50  ;;  %v7320_v50 = vcombine.low %v4600_v31, %v4604_v32  ;;  %v7327_v51 = vcombine.high %v4607_v37, %v4611_v45  ;;  %v7329_v52 = vcombine.high %v4608_v46, %v4612_v47  ;;  %v4623_v61 = vld [vmem:[#allocation7 + $0x640] sm:$0xff] }
 0x81f   : > { %v8463_v43 = vpop.eup %8462  ;;  %6057 = vmatpush1.bf16.msra.mxu0 %v7278_v56  ;;  %6163 = vmatpush1.bf16.msra.mxu1 %v7280_v57  ;;  %v9342_v40 = vpack.c.bf16 %v8461_v0, %v8453_v54  ;;  %v4619_v54 = vld [vmem:[#allocation7 + $0x620] sm:$0xff]  ;;  %v4620_v56 = vld [vmem:[#allocation7 + $0x628] sm:$0xff]  ;;  %v7326_v57 = vcombine.low %v4607_v37, %v4611_v45  ;;  %v7328_v58 = vcombine.low %v4608_v46, %v4612_v47 }
 0x820   : > { %6058 = vmatprep.subr.bf16.mxu0 %v7287_v59  ;;  %6164 = vmatprep.subr.bf16.mxu1 %v7289_v60  ;;  %v9344_v4 = vpack.c.bf16 %v8463_v43, %v8455_v55  ;;  %v4616_v55 = vld [vmem:[#allocation7 + $0x608] sm:$0xff]  ;;  %v7335_v59 = vcombine.high %v4615_v53, %v4619_v54  ;;  %v7334_v2 = vcombine.low %v4615_v53, %v4619_v54 }
 0x821   : > { %6043 = vmatprep.mubr.bf16.mxu0 %v9342_v40  ;;  %6149 = vmatprep.mubr.bf16.mxu1 %v9342_v40  ;;  %v7337_v60 = vcombine.high %v4616_v55, %v4620_v56  ;;  %v4624_v0 = vld [vmem:[#allocation7 + $0x648] sm:$0xff]  ;;  %v7336_v38 = vcombine.low %v4616_v55, %v4620_v56  ;;  %v7343_v43 = vcombine.high %v4623_v61, %v4627_v63 }
 0x822   : > { %6044 = vmatmul.mubr.bf16.gmra.mrb[28].mxu0 %v9338_v62  ;;  %6150 = vmatmul.mubr.bf16.gmra.mrb[44].mxu1 %v9338_v62  ;;  %v7342_v7 = vcombine.low %v4623_v61, %v4627_v63  ;;  %v7344_v11 = vcombine.low %v4624_v0, %v4628_v1  ;;  %v4660_v37 = vld [vmem:[#allocation7 + $0x768] sm:$0xff] }
 0x823   : > { %6059 = vmatpush1.bf16.msra.mxu0 %v7286_v42  ;;  %6165 = vmatpush1.bf16.msra.mxu1 %v7288_v44  ;;  %v7345_v42 = vcombine.high %v4624_v0, %v4628_v1  ;;  %v4631_v44 = vld [vmem:[#allocation7 + $0x680] sm:$0xff]  ;;  %v4668_v53 = vld [vmem:[#allocation7 + $0x7a8] sm:$0xff] }
 0x824   : > { %6086 = vmatprep.mubr.bf16.mxu0 %v9326_v49  ;;  %6192 = vmatprep.mubr.bf16.mxu1 %v9326_v49  ;;  %v7351_v14 = vcombine.high %v4631_v44, %v4635_v3  ;;  %v7350_v20 = vcombine.low %v4631_v44, %v4635_v3  ;;  %v4676_v61 = vld [vmem:[#allocation7 + $0x7e8] sm:$0xff]  ;;  %v4430_v44 = vld [vmem:[#allocation7 + $0x38] sm:$0xff] }
 0x825   : > { %6060 = vmatprep.subr.bf16.mxu0 %v7295_v5  ;;  %6166 = vmatprep.subr.bf16.mxu1 %v7297_v6  ;;  %v4632_v5 = vld [vmem:[#allocation7 + $0x688] sm:$0xff] }
 0x826   : > { %v4636_v6 = vld [vmem:[#allocation7 + $0x6a8] sm:$0xff] }
 0x827   : > { %6061 = vmatpush1.bf16.msra.mxu0 %v7294_v15  ;;  %6167 = vmatpush1.bf16.msra.mxu1 %v7296_v16  ;;  %v7353_v15 = vcombine.high %v4632_v5, %v4636_v6  ;;  %v4639_v16 = vld [vmem:[#allocation7 + $0x6c0] sm:$0xff]  ;;  %v7352_v21 = vcombine.low %v4632_v5, %v4636_v6 }
 0x828   : > { %6062 = vmatprep.subr.bf16.mxu0 %v7303_v17  ;;  %6168 = vmatprep.subr.bf16.mxu1 %v7305_v18  ;;  %v4643_v17 = vld [vmem:[#allocation7 + $0x6e0] sm:$0xff]  ;;  %v4640_v18 = vld [vmem:[#allocation7 + $0x6c8] sm:$0xff] }
 0x829   : > { %v7359_v22 = vcombine.high %v4639_v16, %v4643_v17  ;;  %v7358_v30 = vcombine.low %v4639_v16, %v4643_v17  ;;  %v7360_v31 = vcombine.low %v4640_v18, %v4644_v19  ;;  %v4438_v16 = vld [vmem:[#allocation7 + $0x78] sm:$0xff] }
 0x82b   : > { %6063 = vmatpush1.bf16.msra.mxu0 %v7302_v23  ;;  %6169 = vmatpush1.bf16.msra.mxu1 %v7304_v24  ;;  %v7361_v23 = vcombine.high %v4640_v18, %v4644_v19  ;;  %v4647_v24 = vld [vmem:[#allocation7 + $0x700] sm:$0xff] }
 0x82c   : > { %6064 = vmatprep.subr.bf16.mxu0 %v7311_v26  ;;  %6170 = vmatprep.subr.bf16.mxu1 %v7313_v28  ;;  %v4651_v26 = vld [vmem:[#allocation7 + $0x720] sm:$0xff]  ;;  %v4648_v28 = vld [vmem:[#allocation7 + $0x708] sm:$0xff] }
 0x82d   : > { %v7367_v32 = vcombine.high %v4647_v24, %v4651_v26  ;;  %v7366_v45 = vcombine.low %v4647_v24, %v4651_v26  ;;  %v7368_v46 = vcombine.low %v4648_v28, %v4652_v29  ;;  %v4446_v24 = vld [vmem:[#allocation7 + $0xb8] sm:$0xff] }
 0x82f   : > { %6065 = vmatpush1.bf16.msra.mxu0 %v7310_v34  ;;  %6171 = vmatpush1.bf16.msra.mxu1 %v7312_v35  ;;  %v7369_v34 = vcombine.high %v4648_v28, %v4652_v29  ;;  %v4655_v35 = vld [vmem:[#allocation7 + $0x740] sm:$0xff] }
 0x830   : > { %6066 = vmatprep.subr.bf16.mxu0 %v7319_v25  ;;  %6172 = vmatprep.subr.bf16.mxu1 %v7321_v27  ;;  %v4659_v25 = vld [vmem:[#allocation7 + $0x760] sm:$0xff]  ;;  %v4656_v27 = vld [vmem:[#allocation7 + $0x748] sm:$0xff] }
 0x831   : > { %v7375_v47 = vcombine.high %v4655_v35, %v4659_v25  ;;  %v7374_v54 = vcombine.low %v4655_v35, %v4659_v25  ;;  %v7376_v55 = vcombine.low %v4656_v27, %v4660_v37  ;;  %v4454_v35 = vld [vmem:[#allocation7 + $0xf8] sm:$0xff] }
 0x833   : > { %6067 = vmatpush1.bf16.msra.mxu0 %v7318_v48  ;;  %6173 = vmatpush1.bf16.msra.mxu1 %v7320_v50  ;;  %v7377_v48 = vcombine.high %v4656_v27, %v4660_v37  ;;  %v4663_v50 = vld [vmem:[#allocation7 + $0x780] sm:$0xff] }
 0x834   : > { %6068 = vmatprep.subr.bf16.mxu0 %v7327_v51  ;;  %6174 = vmatprep.subr.bf16.mxu1 %v7329_v52  ;;  %v4667_v51 = vld [vmem:[#allocation7 + $0x7a0] sm:$0xff]  ;;  %v4664_v52 = vld [vmem:[#allocation7 + $0x788] sm:$0xff] }
 0x835   : > { %v7383_v56 = vcombine.high %v4663_v50, %v4667_v51  ;;  %v7382_v63 = vcombine.low %v4663_v50, %v4667_v51  ;;  %v7384_v0 = vcombine.low %v4664_v52, %v4668_v53  ;;  %v4462_v50 = vld [vmem:[#allocation7 + $0x138] sm:$0xff] }
 0x837   : > { %6069 = vmatpush1.bf16.msra.mxu0 %v7326_v57  ;;  %6175 = vmatpush1.bf16.msra.mxu1 %v7328_v58  ;;  %v7385_v57 = vcombine.high %v4664_v52, %v4668_v53  ;;  %v4671_v58 = vld [vmem:[#allocation7 + $0x7c0] sm:$0xff] }
 0x838   : > { %6070 = vmatprep.subr.bf16.mxu0 %v7335_v59  ;;  %6176 = vmatprep.subr.bf16.mxu1 %v7337_v60  ;;  %v4675_v59 = vld [vmem:[#allocation7 + $0x7e0] sm:$0xff]  ;;  %v4672_v60 = vld [vmem:[#allocation7 + $0x7c8] sm:$0xff] }
 0x839   : > { %v7391_v1 = vcombine.high %v4671_v58, %v4675_v59  ;;  %v7390_v3 = vcombine.low %v4671_v58, %v4675_v59  ;;  %v7392_v5 = vcombine.low %v4672_v60, %v4676_v61  ;;  %v4470_v58 = vld [vmem:[#allocation7 + $0x178] sm:$0xff] }
 0x83b   : > { %6071 = vmatpush1.bf16.msra.mxu0 %v7334_v2  ;;  %6177 = vmatpush1.bf16.msra.mxu1 %v7336_v38  ;;  %v7393_v2 = vcombine.high %v4672_v60, %v4676_v61  ;;  %v4425_v38 = vld [vmem:[#allocation7 + $0x10] sm:$0xff] }
 0x83c   : > { %6072 = vmatprep.subr.bf16.mxu0 %v7343_v43  ;;  %6178 = vmatprep.subr.bf16.mxu1 %v7345_v42  ;;  %v4429_v43 = vld [vmem:[#allocation7 + $0x30] sm:$0xff]  ;;  %v4426_v42 = vld [vmem:[#allocation7 + $0x18] sm:$0xff] }
 0x83d   : > { %v7147_v6 = vcombine.high %v4425_v38, %v4429_v43  ;;  %v7146_v17 = vcombine.low %v4425_v38, %v4429_v43  ;;  %v7148_v18 = vcombine.low %v4426_v42, %v4430_v44 }
 0x83f   : > { %6073 = vmatpush1.bf16.msra.mxu0 %v7342_v7  ;;  %6179 = vmatpush1.bf16.msra.mxu1 %v7344_v11  ;;  %v7149_v7 = vcombine.high %v4426_v42, %v4430_v44  ;;  %v4433_v11 = vld [vmem:[#allocation7 + $0x50] sm:$0xff] }
 0x840   : > { %6074 = vmatprep.subr.bf16.mxu0 %v7351_v14  ;;  %6180 = vmatprep.subr.bf16.mxu1 %v7353_v15  ;;  %v4437_v14 = vld [vmem:[#allocation7 + $0x70] sm:$0xff]  ;;  %v4434_v15 = vld [vmem:[#allocation7 + $0x58] sm:$0xff] }
 0x841   : > { %v7155_v19 = vcombine.high %v4433_v11, %v4437_v14  ;;  %v7154_v26 = vcombine.low %v4433_v11, %v4437_v14  ;;  %v7156_v28 = vcombine.low %v4434_v15, %v4438_v16 }
 0x843   : > { %6075 = vmatpush1.bf16.msra.mxu0 %v7350_v20  ;;  %6181 = vmatpush1.bf16.msra.mxu1 %v7352_v21  ;;  %v7157_v20 = vcombine.high %v4434_v15, %v4438_v16  ;;  %v4441_v21 = vld [vmem:[#allocation7 + $0x90] sm:$0xff] }
 0x844   : > { %6076 = vmatprep.subr.bf16.mxu0 %v7359_v22  ;;  %6182 = vmatprep.subr.bf16.mxu1 %v7361_v23  ;;  %v4445_v22 = vld [vmem:[#allocation7 + $0xb0] sm:$0xff]  ;;  %v4442_v23 = vld [vmem:[#allocation7 + $0x98] sm:$0xff] }
 0x845   : > { %v7163_v29 = vcombine.high %v4441_v21, %v4445_v22  ;;  %v7162_v25 = vcombine.low %v4441_v21, %v4445_v22  ;;  %v7164_v27 = vcombine.low %v4442_v23, %v4446_v24 }
 0x847   : > { %6077 = vmatpush1.bf16.msra.mxu0 %v7358_v30  ;;  %6183 = vmatpush1.bf16.msra.mxu1 %v7360_v31  ;;  %v7165_v30 = vcombine.high %v4442_v23, %v4446_v24  ;;  %v4449_v31 = vld [vmem:[#allocation7 + $0xd0] sm:$0xff] }
 0x848   : > { %6078 = vmatprep.subr.bf16.mxu0 %v7367_v32  ;;  %6184 = vmatprep.subr.bf16.mxu1 %v7369_v34  ;;  %v4453_v32 = vld [vmem:[#allocation7 + $0xf0] sm:$0xff]  ;;  %v4450_v34 = vld [vmem:[#allocation7 + $0xd8] sm:$0xff] }
 0x849   : > { %v7171_v37 = vcombine.high %v4449_v31, %v4453_v32  ;;  %v7170_v51 = vcombine.low %v4449_v31, %v4453_v32  ;;  %v7172_v52 = vcombine.low %v4450_v34, %v4454_v35 }
 0x84b   : > { %6079 = vmatpush1.bf16.msra.mxu0 %v7366_v45  ;;  %6185 = vmatpush1.bf16.msra.mxu1 %v7368_v46  ;;  %v7173_v45 = vcombine.high %v4450_v34, %v4454_v35  ;;  %v4457_v46 = vld [vmem:[#allocation7 + $0x110] sm:$0xff] }
 0x84c   : > { %6080 = vmatprep.subr.bf16.mxu0 %v7375_v47  ;;  %6186 = vmatprep.subr.bf16.mxu1 %v7377_v48  ;;  %v4461_v47 = vld [vmem:[#allocation7 + $0x130] sm:$0xff]  ;;  %v4458_v48 = vld [vmem:[#allocation7 + $0x118] sm:$0xff] }
 0x84d   : > { %v7179_v53 = vcombine.high %v4457_v46, %v4461_v47  ;;  %v7178_v59 = vcombine.low %v4457_v46, %v4461_v47  ;;  %v7180_v60 = vcombine.low %v4458_v48, %v4462_v50 }
 0x84f   : > { %6081 = vmatpush1.bf16.msra.mxu0 %v7374_v54  ;;  %6187 = vmatpush1.bf16.msra.mxu1 %v7376_v55  ;;  %v7181_v54 = vcombine.high %v4458_v48, %v4462_v50  ;;  %v4465_v55 = vld [vmem:[#allocation7 + $0x150] sm:$0xff] }
 0x850   : > { %6082 = vmatprep.subr.bf16.mxu0 %v7383_v56  ;;  %6188 = vmatprep.subr.bf16.mxu1 %v7385_v57  ;;  %v4469_v56 = vld [vmem:[#allocation7 + $0x170] sm:$0xff]  ;;  %v4466_v57 = vld [vmem:[#allocation7 + $0x158] sm:$0xff] }
 0x851   : > { %v7187_v61 = vcombine.high %v4465_v55, %v4469_v56  ;;  %v7186_v38 = vcombine.low %v4465_v55, %v4469_v56  ;;  %v7188_v43 = vcombine.low %v4466_v57, %v4470_v58 }
 0x853   : > { %6083 = vmatpush1.bf16.msra.mxu0 %v7382_v63  ;;  %6189 = vmatpush1.bf16.msra.mxu1 %v7384_v0  ;;  %v4473_v63 = vld [vmem:[#allocation7 + $0x190] sm:$0xff] }
 0x854   : > { %6084 = vmatprep.subr.bf16.mxu0 %v7391_v1  ;;  %6190 = vmatprep.subr.bf16.mxu1 %v7393_v2  ;;  %v4477_v0 = vld [vmem:[#allocation7 + $0x1b0] sm:$0xff]  ;;  %v4474_v1 = vld [vmem:[#allocation7 + $0x198] sm:$0xff] }
 0x855   : > { %v4478_v2 = vld [vmem:[#allocation7 + $0x1b8] sm:$0xff]  ;;  %v7195_v42 = vcombine.high %v4473_v63, %v4477_v0  ;;  %v7194_v11 = vcombine.low %v4473_v63, %v4477_v0 }
 0x856   : > { %v7197_v44 = vcombine.high %v4474_v1, %v4478_v2  ;;  %v7196_v14 = vcombine.low %v4474_v1, %v4478_v2 }
 0x857   : > { %6085 = vmatpush1.bf16.msra.mxu0 %v7390_v3  ;;  %6191 = vmatpush1.bf16.msra.mxu1 %v7392_v5  ;;  %v4481_v3 = vld [vmem:[#allocation7 + $0x1d0] sm:$0xff] }
 0x858   : > { %6213 = vmatprep.subr.bf16.mxu0 %v7147_v6  ;;  %6319 = vmatprep.subr.bf16.mxu1 %v7149_v7  ;;  %v4485_v5 = vld [vmem:[#allocation7 + $0x1f0] sm:$0xff]  ;;  %v4482_v6 = vld [vmem:[#allocation7 + $0x1d8] sm:$0xff] }
 0x859   : > { %v4486_v7 = vld [vmem:[#allocation7 + $0x1f8] sm:$0xff]  ;;  %v7203_v15 = vcombine.high %v4481_v3, %v4485_v5  ;;  %v7202_v21 = vcombine.low %v4481_v3, %v4485_v5 }
 0x85a   : > { %6087 = vmatmul.mubr.bf16.vlgmr.msra.gmra.mrb[24].mxu0 %v9322_v36  ;;  %6193 = vmatmul.mubr.bf16.vlgmr.msra.gmra.mrb[40].mxu1 %v9322_v36  ;;  %v7205_v16 = vcombine.high %v4482_v6, %v4486_v7  ;;  %v7204_v22 = vcombine.low %v4482_v6, %v4486_v7 }
 0x85b   : > { %6096 = vmatprep.mubr.bf16.mxu0 %v9344_v4  ;;  %6202 = vmatprep.mubr.bf16.mxu1 %v9344_v4 }
 0x85c   : > { %6214 = vmatpush1.bf16.msra.mxu0 %v7146_v17  ;;  %6320 = vmatpush1.bf16.msra.mxu1 %v7148_v18  ;;  %v4489_v17 = vld [vmem:[#allocation7 + $0x210] sm:$0xff] }
 0x85d   : > { %6215 = vmatprep.subr.bf16.mxu0 %v7155_v19  ;;  %6321 = vmatprep.subr.bf16.mxu1 %v7157_v20  ;;  %v4493_v18 = vld [vmem:[#allocation7 + $0x230] sm:$0xff]  ;;  %v4490_v19 = vld [vmem:[#allocation7 + $0x218] sm:$0xff] }
 0x85e   : > { %v4494_v20 = vld [vmem:[#allocation7 + $0x238] sm:$0xff]  ;;  %v7211_v23 = vcombine.high %v4489_v17, %v4493_v18  ;;  %v7210_v31 = vcombine.low %v4489_v17, %v4493_v18 }
 0x85f   : > { %v7213_v24 = vcombine.high %v4490_v19, %v4494_v20  ;;  %v7212_v32 = vcombine.low %v4490_v19, %v4494_v20 }
 0x860   : > { %6216 = vmatpush1.bf16.msra.mxu0 %v7154_v26  ;;  %6322 = vmatpush1.bf16.msra.mxu1 %v7156_v28  ;;  %v4497_v26 = vld [vmem:[#allocation7 + $0x250] sm:$0xff] }
 0x861   : > { %6217 = vmatprep.subr.bf16.mxu0 %v7163_v29  ;;  %6323 = vmatprep.subr.bf16.mxu1 %v7165_v30  ;;  %v4501_v28 = vld [vmem:[#allocation7 + $0x270] sm:$0xff]  ;;  %v4498_v29 = vld [vmem:[#allocation7 + $0x258] sm:$0xff] }
 0x862   : > { %6097 = vmatmul.mubr.bf16.gmra.mrb[28].mxu0 %v9340_v39  ;;  %6203 = vmatmul.mubr.bf16.gmra.mrb[44].mxu1 %v9340_v39  ;;  %v4502_v30 = vld [vmem:[#allocation7 + $0x278] sm:$0xff]  ;;  %v7219_v34 = vcombine.high %v4497_v26, %v4501_v28  ;;  %v7218_v46 = vcombine.low %v4497_v26, %v4501_v28 }
 0x863   : > { %6245 = vmatprep.mubr.bf16.mxu0 %v9324_v41  ;;  %6351 = vmatprep.mubr.bf16.mxu1 %v9324_v41  ;;  %v7189_v41 = vcombine.high %v4466_v57, %v4470_v58  ;;  %v7221_v35 = vcombine.high %v4498_v29, %v4502_v30  ;;  %v7220_v47 = vcombine.low %v4498_v29, %v4502_v30 }
 0x864   : > { %6218 = vmatpush1.bf16.msra.mxu0 %v7162_v25  ;;  %6324 = vmatpush1.bf16.msra.mxu1 %v7164_v27  ;;  %v4505_v25 = vld [vmem:[#allocation7 + $0x290] sm:$0xff] }
 0x865   : > { %6219 = vmatprep.subr.bf16.mxu0 %v7171_v37  ;;  %6325 = vmatprep.subr.bf16.mxu1 %v7173_v45  ;;  %v4509_v27 = vld [vmem:[#allocation7 + $0x2b0] sm:$0xff]  ;;  %v4506_v37 = vld [vmem:[#allocation7 + $0x298] sm:$0xff] }
 0x866   : > { %v4510_v45 = vld [vmem:[#allocation7 + $0x2b8] sm:$0xff]  ;;  %v7227_v48 = vcombine.high %v4505_v25, %v4509_v27  ;;  %v7226_v55 = vcombine.low %v4505_v25, %v4509_v27 }
 0x867   : > { %v7229_v50 = vcombine.high %v4506_v37, %v4510_v45  ;;  %v7228_v56 = vcombine.low %v4506_v37, %v4510_v45 }
 0x868   : > { %6220 = vmatpush1.bf16.msra.mxu0 %v7170_v51  ;;  %6326 = vmatpush1.bf16.msra.mxu1 %v7172_v52  ;;  %v4513_v51 = vld [vmem:[#allocation7 + $0x2d0] sm:$0xff] }
 0x869   : > { %6221 = vmatprep.subr.bf16.mxu0 %v7179_v53  ;;  %6327 = vmatprep.subr.bf16.mxu1 %v7181_v54  ;;  %v4517_v52 = vld [vmem:[#allocation7 + $0x2f0] sm:$0xff]  ;;  %v4514_v53 = vld [vmem:[#allocation7 + $0x2d8] sm:$0xff] }
 0x86a   : > { %v4518_v54 = vld [vmem:[#allocation7 + $0x2f8] sm:$0xff]  ;;  %v7235_v57 = vcombine.high %v4513_v51, %v4517_v52  ;;  %v7234_v63 = vcombine.low %v4513_v51, %v4517_v52 }
 0x86b   : > { %v7237_v58 = vcombine.high %v4514_v53, %v4518_v54  ;;  %v7236_v0 = vcombine.low %v4514_v53, %v4518_v54 }
 0x86c   : > { %6222 = vmatpush1.bf16.msra.mxu0 %v7178_v59  ;;  %6328 = vmatpush1.bf16.msra.mxu1 %v7180_v60  ;;  %v4521_v59 = vld [vmem:[#allocation7 + $0x310] sm:$0xff] }
 0x86d   : > { %6223 = vmatprep.subr.bf16.mxu0 %v7187_v61  ;;  %6329 = vmatprep.subr.bf16.mxu1 %v7189_v41  ;;  %v4525_v60 = vld [vmem:[#allocation7 + $0x330] sm:$0xff]  ;;  %v4522_v61 = vld [vmem:[#allocation7 + $0x318] sm:$0xff] }
 0x86e   : > { %v4526_v41 = vld [vmem:[#allocation7 + $0x338] sm:$0xff]  ;;  %v7243_v1 = vcombine.high %v4521_v59, %v4525_v60  ;;  %v7242_v3 = vcombine.low %v4521_v59, %v4525_v60 }
 0x86f   : > { %v7245_v2 = vcombine.high %v4522_v61, %v4526_v41  ;;  %v7244_v5 = vcombine.low %v4522_v61, %v4526_v41 }
 0x870   : > { %6224 = vmatpush1.bf16.msra.mxu0 %v7186_v38  ;;  %6330 = vmatpush1.bf16.msra.mxu1 %v7188_v43  ;;  %v4529_v38 = vld [vmem:[#allocation7 + $0x350] sm:$0xff] }
 0x871   : > { %6225 = vmatprep.subr.bf16.mxu0 %v7195_v42  ;;  %6331 = vmatprep.subr.bf16.mxu1 %v7197_v44  ;;  %v4533_v43 = vld [vmem:[#allocation7 + $0x370] sm:$0xff]  ;;  %v4530_v42 = vld [vmem:[#allocation7 + $0x358] sm:$0xff] }
 0x872   : > { %v4534_v44 = vld [vmem:[#allocation7 + $0x378] sm:$0xff]  ;;  %v7251_v6 = vcombine.high %v4529_v38, %v4533_v43  ;;  %v7250_v17 = vcombine.low %v4529_v38, %v4533_v43 }
 0x873   : > { %v7253_v7 = vcombine.high %v4530_v42, %v4534_v44  ;;  %v7252_v18 = vcombine.low %v4530_v42, %v4534_v44  ;;  %v4585_v44 = vld [vmem:[#allocation7 + $0x510] sm:$0xff] }
 0x874   : > { %6226 = vmatpush1.bf16.msra.mxu0 %v7194_v11  ;;  %6332 = vmatpush1.bf16.msra.mxu1 %v7196_v14  ;;  %v4537_v11 = vld [vmem:[#allocation7 + $0x390] sm:$0xff] }
 0x875   : > { %6227 = vmatprep.subr.bf16.mxu0 %v7203_v15  ;;  %6333 = vmatprep.subr.bf16.mxu1 %v7205_v16  ;;  %v4541_v14 = vld [vmem:[#allocation7 + $0x3b0] sm:$0xff]  ;;  %v4538_v15 = vld [vmem:[#allocation7 + $0x398] sm:$0xff] }
 0x876   : > { %v4542_v16 = vld [vmem:[#allocation7 + $0x3b8] sm:$0xff]  ;;  %v7259_v19 = vcombine.high %v4537_v11, %v4541_v14  ;;  %v7258_v26 = vcombine.low %v4537_v11, %v4541_v14 }
 0x877   : > { %v7261_v20 = vcombine.high %v4538_v15, %v4542_v16  ;;  %v7260_v28 = vcombine.low %v4538_v15, %v4542_v16  ;;  %v4593_v15 = vld [vmem:[#allocation7 + $0x550] sm:$0xff] }
 0x878   : > { %6228 = vmatpush1.bf16.msra.mxu0 %v7202_v21  ;;  %6334 = vmatpush1.bf16.msra.mxu1 %v7204_v22  ;;  %v4545_v21 = vld [vmem:[#allocation7 + $0x3d0] sm:$0xff] }
 0x879   : > { %6229 = vmatprep.subr.bf16.mxu0 %v7211_v23  ;;  %6335 = vmatprep.subr.bf16.mxu1 %v7213_v24  ;;  %v4549_v22 = vld [vmem:[#allocation7 + $0x3f0] sm:$0xff]  ;;  %v4546_v23 = vld [vmem:[#allocation7 + $0x3d8] sm:$0xff] }
 0x87a   : > { %v4550_v24 = vld [vmem:[#allocation7 + $0x3f8] sm:$0xff]  ;;  %v7267_v29 = vcombine.high %v4545_v21, %v4549_v22  ;;  %v7266_v25 = vcombine.low %v4545_v21, %v4549_v22  ;;  %v4597_v16 = vld [vmem:[#allocation7 + $0x570] sm:$0xff] }
 0x87b   : > { %v7269_v30 = vcombine.high %v4546_v23, %v4550_v24  ;;  %v7268_v27 = vcombine.low %v4546_v23, %v4550_v24  ;;  %v4601_v22 = vld [vmem:[#allocation7 + $0x590] sm:$0xff]  ;;  %v4606_v24 = vld [vmem:[#allocation7 + $0x5b8] sm:$0xff] }
 0x87c   : > { %6230 = vmatpush1.bf16.msra.mxu0 %v7210_v31  ;;  %6336 = vmatpush1.bf16.msra.mxu1 %v7212_v32  ;;  %v4553_v31 = vld [vmem:[#allocation7 + $0x410] sm:$0xff] }
 0x87d   : > { %6231 = vmatprep.subr.bf16.mxu0 %v7219_v34  ;;  %6337 = vmatprep.subr.bf16.mxu1 %v7221_v35  ;;  %v4557_v32 = vld [vmem:[#allocation7 + $0x430] sm:$0xff]  ;;  %v4554_v34 = vld [vmem:[#allocation7 + $0x418] sm:$0xff] }
 0x87e   : > { %v4558_v35 = vld [vmem:[#allocation7 + $0x438] sm:$0xff]  ;;  %v7275_v37 = vcombine.high %v4553_v31, %v4557_v32  ;;  %v7274_v51 = vcombine.low %v4553_v31, %v4557_v32  ;;  %v4605_v23 = vld [vmem:[#allocation7 + $0x5b0] sm:$0xff] }
 0x87f   : > { %v7277_v45 = vcombine.high %v4554_v34, %v4558_v35  ;;  %v7276_v52 = vcombine.low %v4554_v34, %v4558_v35  ;;  %v4609_v31 = vld [vmem:[#allocation7 + $0x5d0] sm:$0xff]  ;;  %v4610_v34 = vld [vmem:[#allocation7 + $0x5d8] sm:$0xff] }
 0x880   : > { %6232 = vmatpush1.bf16.msra.mxu0 %v7218_v46  ;;  %6338 = vmatpush1.bf16.msra.mxu1 %v7220_v47  ;;  %v4561_v46 = vld [vmem:[#allocation7 + $0x450] sm:$0xff]  ;;  %v4614_v35 = vld [vmem:[#allocation7 + $0x5f8] sm:$0xff] }
 0x881   : > { %6233 = vmatprep.subr.bf16.mxu0 %v7227_v48  ;;  %6339 = vmatprep.subr.bf16.mxu1 %v7229_v50  ;;  %v4565_v47 = vld [vmem:[#allocation7 + $0x470] sm:$0xff]  ;;  %v4562_v48 = vld [vmem:[#allocation7 + $0x458] sm:$0xff] }
 0x882   : > { %v4566_v50 = vld [vmem:[#allocation7 + $0x478] sm:$0xff]  ;;  %v7283_v53 = vcombine.high %v4561_v46, %v4565_v47  ;;  %v7282_v59 = vcombine.low %v4561_v46, %v4565_v47  ;;  %v4613_v32 = vld [vmem:[#allocation7 + $0x5f0] sm:$0xff] }
 0x883   : > { %v7285_v54 = vcombine.high %v4562_v48, %v4566_v50  ;;  %v7284_v60 = vcombine.low %v4562_v48, %v4566_v50  ;;  %v4617_v46 = vld [vmem:[#allocation7 + $0x610] sm:$0xff]  ;;  %v4618_v48 = vld [vmem:[#allocation7 + $0x618] sm:$0xff] }
 0x884   : > { %6234 = vmatpush1.bf16.msra.mxu0 %v7226_v55  ;;  %6340 = vmatpush1.bf16.msra.mxu1 %v7228_v56  ;;  %v4569_v55 = vld [vmem:[#allocation7 + $0x490] sm:$0xff]  ;;  %v4622_v50 = vld [vmem:[#allocation7 + $0x638] sm:$0xff] }
 0x885   : > { %6235 = vmatprep.subr.bf16.mxu0 %v7235_v57  ;;  %6341 = vmatprep.subr.bf16.mxu1 %v7237_v58  ;;  %v4573_v56 = vld [vmem:[#allocation7 + $0x4b0] sm:$0xff]  ;;  %v4570_v57 = vld [vmem:[#allocation7 + $0x498] sm:$0xff] }
 0x886   : > { %v4574_v58 = vld [vmem:[#allocation7 + $0x4b8] sm:$0xff]  ;;  %v7291_v61 = vcombine.high %v4569_v55, %v4573_v56  ;;  %v4621_v47 = vld [vmem:[#allocation7 + $0x630] sm:$0xff] }
 0x887   : > { %v7293_v41 = vcombine.high %v4570_v57, %v4574_v58  ;;  %v7292_v38 = vcombine.low %v4570_v57, %v4574_v58  ;;  %v4626_v57 = vld [vmem:[#allocation7 + $0x658] sm:$0xff] }
 0x888   : > { %6236 = vmatpush1.bf16.msra.mxu0 %v7234_v63  ;;  %6342 = vmatpush1.bf16.msra.mxu1 %v7236_v0  ;;  %v4577_v63 = vld [vmem:[#allocation7 + $0x4d0] sm:$0xff]  ;;  %v4630_v58 = vld [vmem:[#allocation7 + $0x678] sm:$0xff] }
 0x889   : > { %6237 = vmatprep.subr.bf16.mxu0 %v7243_v1  ;;  %6343 = vmatprep.subr.bf16.mxu1 %v7245_v2  ;;  %v4581_v0 = vld [vmem:[#allocation7 + $0x4f0] sm:$0xff]  ;;  %v4578_v1 = vld [vmem:[#allocation7 + $0x4d8] sm:$0xff] }
 0x88a   : > { %v4582_v2 = vld [vmem:[#allocation7 + $0x4f8] sm:$0xff]  ;;  %v7299_v43 = vcombine.high %v4577_v63, %v4581_v0 }
 0x88b   : > { %v7301_v42 = vcombine.high %v4578_v1, %v4582_v2 }
 0x88c   : > { %6238 = vmatpush1.bf16.msra.mxu0 %v7242_v3  ;;  %6344 = vmatpush1.bf16.msra.mxu1 %v7244_v5  ;;  %v4586_v3 = vld [vmem:[#allocation7 + $0x518] sm:$0xff] }
 0x88d   : > { %6239 = vmatprep.subr.bf16.mxu0 %v7251_v6  ;;  %6345 = vmatprep.subr.bf16.mxu1 %v7253_v7  ;;  %v4590_v5 = vld [vmem:[#allocation7 + $0x538] sm:$0xff]  ;;  %v7298_v6 = vcombine.low %v4577_v63, %v4581_v0  ;;  %v7300_v7 = vcombine.low %v4578_v1, %v4582_v2  ;;  %v4633_v63 = vld [vmem:[#allocation7 + $0x690] sm:$0xff] }
 0x88e   : > { %v7309_v14 = vcombine.high %v4586_v3, %v4590_v5  ;;  %v4637_v0 = vld [vmem:[#allocation7 + $0x6b0] sm:$0xff]  ;;  %v4634_v1 = vld [vmem:[#allocation7 + $0x698] sm:$0xff] }
 0x88f   : > { %v4638_v2 = vld [vmem:[#allocation7 + $0x6b8] sm:$0xff] }
 0x890   : > { %6240 = vmatpush1.bf16.msra.mxu0 %v7250_v17  ;;  %6346 = vmatpush1.bf16.msra.mxu1 %v7252_v18  ;;  %v4594_v17 = vld [vmem:[#allocation7 + $0x558] sm:$0xff] }
 0x891   : > { %6241 = vmatprep.subr.bf16.mxu0 %v7259_v19  ;;  %6347 = vmatprep.subr.bf16.mxu1 %v7261_v20  ;;  %v4598_v18 = vld [vmem:[#allocation7 + $0x578] sm:$0xff]  ;;  %v7308_v19 = vcombine.low %v4586_v3, %v4590_v5  ;;  %v7315_v20 = vcombine.high %v4593_v15, %v4597_v16 }
 0x892   : > { %v7317_v21 = vcombine.high %v4594_v17, %v4598_v18  ;;  %v4642_v3 = vld [vmem:[#allocation7 + $0x6d8] sm:$0xff] }
 0x893   : > { %v4646_v5 = vld [vmem:[#allocation7 + $0x6f8] sm:$0xff] }
 0x894   : > { %6242 = vmatpush1.bf16.msra.mxu0 %v7258_v26  ;;  %6348 = vmatpush1.bf16.msra.mxu1 %v7260_v28  ;;  %v7314_v26 = vcombine.low %v4593_v15, %v4597_v16  ;;  %v7316_v28 = vcombine.low %v4594_v17, %v4598_v18  ;;  %v4649_v15 = vld [vmem:[#allocation7 + $0x710] sm:$0xff]  ;;  %v4650_v17 = vld [vmem:[#allocation7 + $0x718] sm:$0xff] }
 0x895   : > { %6243 = vmatprep.subr.bf16.mxu0 %v7267_v29  ;;  %6349 = vmatprep.subr.bf16.mxu1 %v7269_v30  ;;  %v7323_v29 = vcombine.high %v4601_v22, %v4605_v23  ;;  %v4653_v16 = vld [vmem:[#allocation7 + $0x730] sm:$0xff]  ;;  %v4654_v18 = vld [vmem:[#allocation7 + $0x738] sm:$0xff] }
 0x898   : > { %6244 = vmatpush1.bf16.msra.mxu0 %v7266_v25  ;;  %6350 = vmatpush1.bf16.msra.mxu1 %v7268_v27  ;;  %v7322_v25 = vcombine.low %v4601_v22, %v4605_v23  ;;  %v4657_v22 = vld [vmem:[#allocation7 + $0x750] sm:$0xff] }
 0x899   : > { %6266 = vmatprep.subr.bf16.mxu0 %v7275_v37  ;;  %6372 = vmatprep.subr.bf16.mxu1 %v7277_v45  ;;  %v7331_v37 = vcombine.high %v4609_v31, %v4613_v32  ;;  %v7333_v45 = vcombine.high %v4610_v34, %v4614_v35  ;;  %v4661_v23 = vld [vmem:[#allocation7 + $0x770] sm:$0xff] }
 0x89b   : > { %6246 = vmatmul.mubr.bf16.vlgmr.msra.gmra.mrb[32].mxu0 %v9320_v33  ;;  %6352 = vmatmul.mubr.bf16.vlgmr.msra.gmra.mrb[48].mxu1 %v9320_v33  ;;  %v7290_v33 = vcombine.low %v4569_v55, %v4573_v56  ;;  %v4625_v55 = vld [vmem:[#allocation7 + $0x650] sm:$0xff] }
 0x89c   : > { %6255 = vmatprep.mubr.bf16.mxu0 %v9342_v40  ;;  %6267 = vmatpush1.bf16.msra.mxu0 %v7274_v51  ;;  %v7330_v51 = vcombine.low %v4609_v31, %v4613_v32  ;;  %v4629_v56 = vld [vmem:[#allocation7 + $0x670] sm:$0xff] }
 0x89d   : > { %6361 = vmatprep.mubr.bf16.mxu1 %v9342_v40  ;;  %6373 = vmatpush1.bf16.msra.mxu1 %v7276_v52  ;;  %v4589_v40 = vld [vmem:[#allocation7 + $0x530] sm:$0xff]  ;;  %v7332_v52 = vcombine.low %v4610_v34, %v4614_v35  ;;  %v4666_v34 = vld [vmem:[#allocation7 + $0x798] sm:$0xff] }
 0x89e   : > { %6268 = vmatprep.subr.bf16.mxu0 %v7283_v53  ;;  %6374 = vmatprep.subr.bf16.mxu1 %v7285_v54  ;;  %v7307_v11 = vcombine.high %v4585_v44, %v4589_v40  ;;  %v7339_v53 = vcombine.high %v4617_v46, %v4621_v47  ;;  %v7341_v54 = vcombine.high %v4618_v48, %v4622_v50  ;;  %v4665_v31 = vld [vmem:[#allocation7 + $0x790] sm:$0xff]  ;;  %v4670_v35 = vld [vmem:[#allocation7 + $0x7b8] sm:$0xff] }
 0x89f   : > { %v4669_v32 = vld [vmem:[#allocation7 + $0x7b0] sm:$0xff] }
 0x8a0   : > { %6269 = vmatpush1.bf16.msra.mxu0 %v7282_v59  ;;  %v7338_v59 = vcombine.low %v4617_v46, %v4621_v47  ;;  %v4673_v46 = vld [vmem:[#allocation7 + $0x7d0] sm:$0xff] }
 0x8a1   : > { %6375 = vmatpush1.bf16.msra.mxu1 %v7284_v60  ;;  %6270 = vmatprep.subr.bf16.mxu0 %v7291_v61  ;;  %v7340_v60 = vcombine.low %v4618_v48, %v4622_v50  ;;  %v7347_v61 = vcombine.high %v4625_v55, %v4629_v56  ;;  %v4677_v47 = vld [vmem:[#allocation7 + $0x7f0] sm:$0xff]  ;;  %v4674_v48 = vld [vmem:[#allocation7 + $0x7d8] sm:$0xff] }
 0x8a2   : > { %6376 = vmatprep.subr.bf16.mxu1 %v7293_v41  ;;  %v7349_v41 = vcombine.high %v4626_v57, %v4630_v58  ;;  %v4678_v50 = vld [vmem:[#allocation7 + $0x7f8] sm:$0xff] }
 0x8a3   : > { %6256 = vmatmul.mubr.bf16.gmra.mrb[36].mxu0 %v9338_v62  ;;  %6362 = vmatmul.mubr.bf16.gmra.mrb[52].mxu1 %v9338_v62  ;;  %v7306_v62 = vcombine.low %v4585_v44, %v4589_v40  ;;  %v4641_v44 = vld [vmem:[#allocation7 + $0x6d0] sm:$0xff] }
 0x8a4   : > { %6271 = vmatpush1.bf16.msra.mxu0 %v7290_v33  ;;  %6298 = vmatprep.mubr.bf16.mxu0 %v9326_v49  ;;  %v7346_v33 = vcombine.low %v4625_v55, %v4629_v56  ;;  %v4645_v40 = vld [vmem:[#allocation7 + $0x6f0] sm:$0xff]  ;;  %v7394_v55 = vcombine.low %v4673_v46, %v4677_v47  ;;  %v7396_v56 = vcombine.low %v4674_v48, %v4678_v50 }
 0x8a5   : > { %6377 = vmatpush1.bf16.msra.mxu1 %v7292_v38  ;;  %6404 = vmatprep.mubr.bf16.mxu1 %v9326_v49  ;;  %v4602_v49 = vld [vmem:[#allocation7 + $0x598] sm:$0xff]  ;;  %v7348_v38 = vcombine.low %v4626_v57, %v4630_v58 }
 0x8a6   : > { %6272 = vmatprep.subr.bf16.mxu0 %v7299_v43  ;;  %6378 = vmatprep.subr.bf16.mxu1 %v7301_v42  ;;  %v7325_v30 = vcombine.high %v4602_v49, %v4606_v24  ;;  %v7324_v27 = vcombine.low %v4602_v49, %v4606_v24  ;;  %v7355_v43 = vcombine.high %v4633_v63, %v4637_v0  ;;  %v4658_v49 = vld [vmem:[#allocation7 + $0x758] sm:$0xff] }
 0x8a7   : > { %v7357_v42 = vcombine.high %v4634_v1, %v4638_v2  ;;  %v4662_v24 = vld [vmem:[#allocation7 + $0x778] sm:$0xff] }
 0x8a8   : > { %6273 = vmatpush1.bf16.msra.mxu0 %v7298_v6  ;;  %v7354_v6 = vcombine.low %v4633_v63, %v4637_v0  ;;  %v4679_v57 = vld [vmem:[%s9456_s29] sm:$0xff] }
 0x8a9   : > { %6379 = vmatpush1.bf16.msra.mxu1 %v7300_v7  ;;  %6274 = vmatprep.subr.bf16.mxu0 %v7307_v11  ;;  %v7356_v7 = vcombine.low %v4634_v1, %v4638_v2  ;;  %v7363_v11 = vcombine.high %v4641_v44, %v4645_v40  ;;  %v4684_v58 = vrot.slane %v4679_v57, %v9014_v9 }
 0x8aa   : > { %6380 = vmatprep.subr.bf16.mxu1 %v7309_v14  ;;  %v7365_v14 = vcombine.high %v4642_v3, %v4646_v5 }
 0x8ac   : > { %6275 = vmatpush1.bf16.msra.mxu0 %v7306_v62  ;;  %v7362_v62 = vcombine.low %v4641_v44, %v4645_v40 }
 0x8ad   : > { %6381 = vmatpush1.bf16.msra.mxu1 %v7308_v19  ;;  %6276 = vmatprep.subr.bf16.mxu0 %v7315_v20  ;;  %v7364_v19 = vcombine.low %v4642_v3, %v4646_v5  ;;  %v7371_v20 = vcombine.high %v4649_v15, %v4653_v16 }
 0x8ae   : > { %6382 = vmatprep.subr.bf16.mxu1 %v7317_v21  ;;  %v7373_v21 = vcombine.high %v4650_v17, %v4654_v18 }
 0x8b0   : > { %6277 = vmatpush1.bf16.msra.mxu0 %v7314_v26  ;;  %v7370_v26 = vcombine.low %v4649_v15, %v4653_v16 }
 0x8b1   : > { %6383 = vmatpush1.bf16.msra.mxu1 %v7316_v28  ;;  %6278 = vmatprep.subr.bf16.mxu0 %v7323_v29  ;;  %v7372_v28 = vcombine.low %v4650_v17, %v4654_v18  ;;  %v7379_v29 = vcombine.high %v4657_v22, %v4661_v23 }
 0x8b2   : > { %6384 = vmatprep.subr.bf16.mxu1 %v7325_v30  ;;  %v7381_v30 = vcombine.high %v4658_v49, %v4662_v24 }
 0x8b4   : > { %6279 = vmatpush1.bf16.msra.mxu0 %v7322_v25  ;;  %v7378_v25 = vcombine.low %v4657_v22, %v4661_v23 }
 0x8b5   : > { %6385 = vmatpush1.bf16.msra.mxu1 %v7324_v27  ;;  %6280 = vmatprep.subr.bf16.mxu0 %v7331_v37  ;;  %v7380_v27 = vcombine.low %v4658_v49, %v4662_v24  ;;  %v7387_v37 = vcombine.high %v4665_v31, %v4669_v32 }
 0x8b6   : > { %6386 = vmatprep.subr.bf16.mxu1 %v7333_v45  ;;  %v7389_v45 = vcombine.high %v4666_v34, %v4670_v35 }
 0x8b8   : > { %6281 = vmatpush1.bf16.msra.mxu0 %v7330_v51  ;;  %v7386_v51 = vcombine.low %v4665_v31, %v4669_v32  ;;  %v4699_v31 = vsub.s32 4, %v9011_v8  ;;  %v4707_v32 = vsub.s32 6, %v9011_v8 }
 0x8b9   : > { %6387 = vmatpush1.bf16.msra.mxu1 %v7332_v52  ;;  %6282 = vmatprep.subr.bf16.mxu0 %v7339_v53  ;;  %v7388_v52 = vcombine.low %v4666_v34, %v4670_v35  ;;  %v7395_v53 = vcombine.high %v4673_v46, %v4677_v47  ;;  %v4703_v34 = vsub.s32 5, %v9011_v8  ;;  %v4711_v35 = vsub.s32 7, %v9011_v8 }
 0x8ba   : > { %6388 = vmatprep.subr.bf16.mxu1 %v7341_v54  ;;  %v7397_v54 = vcombine.high %v4674_v48, %v4678_v50 }
 0x8bc   : > { %6283 = vmatpush1.bf16.msra.mxu0 %v7338_v59  ;;  %v4692_v59 = vrot.slane %v4679_v57, %v9017_v10 }
 0x8bd   : > { %6389 = vmatpush1.bf16.msra.mxu1 %v7340_v60  ;;  %6284 = vmatprep.subr.bf16.mxu0 %v7347_v61  ;;  %v4688_v60 = vrot.slane %v4679_v57, %v9023_v12 }
 0x8be   : > { %6390 = vmatprep.subr.bf16.mxu1 %v7349_v41 }
 0x8c0   : > { %6285 = vmatpush1.bf16.msra.mxu0 %v7346_v33 }
 0x8c1   : > { %6391 = vmatpush1.bf16.msra.mxu1 %v7348_v38  ;;  %6286 = vmatprep.subr.bf16.mxu0 %v7355_v43 }
 0x8c2   : > { %6392 = vmatprep.subr.bf16.mxu1 %v7357_v42 }
 0x8c4   : > { %6287 = vmatpush1.bf16.msra.mxu0 %v7354_v6 }
 0x8c5   : > { %6393 = vmatpush1.bf16.msra.mxu1 %v7356_v7  ;;  %6288 = vmatprep.subr.bf16.mxu0 %v7363_v11 }
 0x8c6   : > { %6394 = vmatprep.subr.bf16.mxu1 %v7365_v14 }
 0x8c8   : > { %6289 = vmatpush1.bf16.msra.mxu0 %v7362_v62 }
 0x8c9   : > { %6395 = vmatpush1.bf16.msra.mxu1 %v7364_v19  ;;  %6290 = vmatprep.subr.bf16.mxu0 %v7371_v20 }
 0x8ca   : > { %6396 = vmatprep.subr.bf16.mxu1 %v7373_v21 }
 0x8cc   : > { %6291 = vmatpush1.bf16.msra.mxu0 %v7370_v26 }
 0x8cd   : > { %6397 = vmatpush1.bf16.msra.mxu1 %v7372_v28  ;;  %6292 = vmatprep.subr.bf16.mxu0 %v7379_v29 }
 0x8ce   : > { %6398 = vmatprep.subr.bf16.mxu1 %v7381_v30 }
 0x8d0   : > { %6293 = vmatpush1.bf16.msra.mxu0 %v7378_v25  ;;  %v4700_v25 = vrot.slane %v4679_v57, %v4699_v31 }
 0x8d1   : > { %6399 = vmatpush1.bf16.msra.mxu1 %v7380_v27  ;;  %6294 = vmatprep.subr.bf16.mxu0 %v7387_v37  ;;  %v4708_v27 = vrot.slane %v4679_v57, %v4707_v32  ;;  %v4704_v37 = vrot.slane %v4679_v57, %v4703_v34 }
 0x8d2   : > { %6400 = vmatprep.subr.bf16.mxu1 %v7389_v45  ;;  %v4712_v45 = vrot.slane %v4679_v57, %v4711_v35 }
 0x8d4   : > { %6295 = vmatpush1.bf16.msra.mxu0 %v7386_v51 }
 0x8d5   : > { %6401 = vmatpush1.bf16.msra.mxu1 %v7388_v52  ;;  %6296 = vmatprep.subr.bf16.mxu0 %v7395_v53 }
 0x8d6   : > { %6402 = vmatprep.subr.bf16.mxu1 %v7397_v54 }
 0x8d8   : > { %6297 = vmatpush1.bf16.msra.mxu0 %v7394_v55 }
 0x8d9   : > { %6403 = vmatpush1.bf16.msra.mxu1 %v7396_v56 }
 0x8db   : > { %6299 = vmatmul.mubr.bf16.vlgmr.msra.gmra.mrb[32].mxu0 %v9322_v36 }
 0x8dc   : > { %6405 = vmatmul.mubr.bf16.vlgmr.msra.gmra.mrb[48].mxu1 %v9322_v36  ;;  %6308 = vmatprep.mubr.bf16.mxu0 %v9344_v4  ;;  %v4696_v36 = vrot.slane %v4679_v57, %v9026_v13 }
 0x8dd   : > { %6414 = vmatprep.mubr.bf16.mxu1 %v9344_v4 }
 0x8e3   : > { %6309 = vmatmul.mubr.bf16.gmra.mrb[36].mxu0 %v9340_v39 }
 0x8e4   : > { %6415 = vmatmul.mubr.bf16.gmra.mrb[52].mxu1 %v9340_v39 }
 0x92d   : > { %v6088_v61 = vpop.f32.mrb[24].mxu0  ;;  %v6194_v41 = vpop.f32.mrb[40].mxu1 }
 0x92e   : > { %v7546_v4 = vadd.f32 %v6088_v61, %v4684_v58  ;;  %v7554_v63 = vadd.f32 %v6194_v41, %v4692_v59  ;;  %v6090_v0 = vpop.f32.mrb[25].mxu0  ;;  %v6196_v1 = vpop.f32.mrb[41].mxu1 }
 0x92f   : > { %v7547_v39 = vadd.f32 %v6090_v0, %v4688_v60  ;;  %v7555_v2 = vadd.f32 %v6196_v1, %v4696_v36  ;;  %v6092_v33 = vpop.f32.mrb[26].mxu0  ;;  %v6198_v38 = vpop.f32.mrb[42].mxu1 }
 0x930   : > { %v7548_v9 = vadd.f32 %v6092_v33, %v4684_v58  ;;  %v7556_v10 = vadd.f32 %v6198_v38, %v4692_v59  ;;  %v6094_v12 = vpop.f32.mrb[27].mxu0  ;;  %v6200_v13 = vpop.f32.mrb[43].mxu1 }
 0x931   : > { %v7418_v43 = vpack.c.bf16 %v7547_v39, %v7546_v4  ;;  %v7419_v42 = vpack.c.bf16 %v7555_v2, %v7554_v63  ;;  %v7549_v44 = vadd.f32 %v6094_v12, %v4688_v60  ;;  %v7557_v40 = vadd.f32 %v6200_v13, %v4696_v36 }
 0x933   : > { %6521 = vst [vmem:[%s9386_s12] sm:$0xff] %v7418_v43  ;;  %6522 = vst [vmem:[%s9386_s12 + $0x8] sm:$0xff] %v7419_v42  ;;  %v7422_v3 = vpack.c.bf16 %v7549_v44, %v7548_v9  ;;  %v7423_v5 = vpack.c.bf16 %v7557_v40, %v7556_v10 }
 0x935   : > { %6525 = vst [vmem:[%s9386_s12 + $0x20] sm:$0xff] %v7422_v3  ;;  %6526 = vst [vmem:[%s9386_s12 + $0x28] sm:$0xff] %v7423_v5  ;;  %v6098_v6 = vpop.f32.mrb[28].mxu0  ;;  %v6204_v7 = vpop.f32.mrb[44].mxu1 }
 0x936   : > { %v7550_v11 = vadd.f32 %v6098_v6, %v4684_v58  ;;  %v7558_v14 = vadd.f32 %v6204_v7, %v4692_v59  ;;  %v6100_v15 = vpop.f32.mrb[29].mxu0  ;;  %v6206_v16 = vpop.f32.mrb[45].mxu1 }
 0x937   : > { %v7551_v17 = vadd.f32 %v6100_v15, %v4688_v60  ;;  %v7559_v18 = vadd.f32 %v6206_v16, %v4696_v36  ;;  %v6102_v62 = vpop.f32.mrb[30].mxu0  ;;  %v6208_v19 = vpop.f32.mrb[46].mxu1 }
 0x938   : > { %v7552_v20 = vadd.f32 %v6102_v62, %v4684_v58  ;;  %v7560_v21 = vadd.f32 %v6208_v19, %v4692_v59  ;;  %v6104_v22 = vpop.f32.mrb[31].mxu0  ;;  %v6210_v23 = vpop.f32.mrb[47].mxu1 }
 0x939   : > { %v7426_v49 = vpack.c.bf16 %v7551_v17, %v7550_v11  ;;  %v7427_v24 = vpack.c.bf16 %v7559_v18, %v7558_v14  ;;  %v7553_v26 = vadd.f32 %v6104_v22, %v4688_v60  ;;  %v7561_v28 = vadd.f32 %v6210_v23, %v4696_v36 }
 0x93b   : > { %6529 = vst [vmem:[%s9386_s12 + $0x40] sm:$0xff] %v7426_v49  ;;  %6530 = vst [vmem:[%s9386_s12 + $0x48] sm:$0xff] %v7427_v24  ;;  %v7430_v29 = vpack.c.bf16 %v7553_v26, %v7552_v20  ;;  %v7431_v30 = vpack.c.bf16 %v7561_v28, %v7560_v21 }
 0x93d   : > { %6533 = vst [vmem:[%s9386_s12 + $0x60] sm:$0xff] %v7430_v29  ;;  %6534 = vst [vmem:[%s9386_s12 + $0x68] sm:$0xff] %v7431_v30 }
 0x9ae   : > { %v6300_v46 = vpop.f32.mrb[32].mxu0 }
 0x9af   : > { %v7562_v47 = vadd.f32 %v6300_v46, %v4700_v25  ;;  %v6406_v48 = vpop.f32.mrb[48].mxu1  ;;  %v6302_v50 = vpop.f32.mrb[33].mxu0 }
 0x9b0   : > { %v7570_v51 = vadd.f32 %v6406_v48, %v4708_v27  ;;  %v7563_v52 = vadd.f32 %v6302_v50, %v4704_v37  ;;  %v6408_v53 = vpop.f32.mrb[49].mxu1  ;;  %v6304_v54 = vpop.f32.mrb[34].mxu0 }
 0x9b1   : > { %v7571_v55 = vadd.f32 %v6408_v53, %v4712_v45  ;;  %v7564_v56 = vadd.f32 %v6304_v54, %v4700_v25  ;;  %v6410_v58 = vpop.f32.mrb[50].mxu1  ;;  %v6306_v8 = vpop.f32.mrb[35].mxu0 }
 0x9b2   : > { %v7420_v59 = vpack.c.bf16 %v7563_v52, %v7562_v47  ;;  %v7572_v60 = vadd.f32 %v6410_v58, %v4708_v27  ;;  %v7565_v36 = vadd.f32 %v6306_v8, %v4704_v37  ;;  %v6412_v57 = vpop.f32.mrb[51].mxu1 }
 0x9b3   : > { %v7421_v61 = vpack.c.bf16 %v7571_v55, %v7570_v51  ;;  %v7573_v41 = vadd.f32 %v6412_v57, %v4712_v45 }
 0x9b4   : > { %6523 = vst [vmem:[%s9386_s12 + $0x10] sm:$0xff] %v7420_v59  ;;  %v7424_v4 = vpack.c.bf16 %v7565_v36, %v7564_v56 }
 0x9b5   : > { %6524 = vst [vmem:[%s9386_s12 + $0x18] sm:$0xff] %v7421_v61  ;;  %v7425_v63 = vpack.c.bf16 %v7573_v41, %v7572_v60 }
 0x9b6   : > { %6527 = vst [vmem:[%s9386_s12 + $0x30] sm:$0xff] %v7424_v4  ;;  %v6310_v0 = vpop.f32.mrb[36].mxu0 }
 0x9b7   : > { %6528 = vst [vmem:[%s9386_s12 + $0x38] sm:$0xff] %v7425_v63  ;;  %v7566_v1 = vadd.f32 %v6310_v0, %v4700_v25  ;;  %v6416_v39 = vpop.f32.mrb[52].mxu1  ;;  %v6312_v2 = vpop.f32.mrb[37].mxu0 }
 0x9b8   : > { %v7574_v33 = vadd.f32 %v6416_v39, %v4708_v27  ;;  %v7567_v38 = vadd.f32 %v6312_v2, %v4704_v37  ;;  %v6418_v9 = vpop.f32.mrb[53].mxu1  ;;  %v6314_v10 = vpop.f32.mrb[38].mxu0 }
 0x9b9   : > { %v7575_v12 = vadd.f32 %v6418_v9, %v4712_v45  ;;  %v7568_v13 = vadd.f32 %v6314_v10, %v4700_v25  ;;  %v6420_v43 = vpop.f32.mrb[54].mxu1  ;;  %v6316_v42 = vpop.f32.mrb[39].mxu0 }
 0x9ba   : > { %v7428_v44 = vpack.c.bf16 %v7567_v38, %v7566_v1  ;;  %v7576_v40 = vadd.f32 %v6420_v43, %v4708_v27  ;;  %v7569_v3 = vadd.f32 %v6316_v42, %v4704_v37  ;;  %v6422_v5 = vpop.f32.mrb[55].mxu1 }
 0x9bb   : > { %v7429_v6 = vpack.c.bf16 %v7575_v12, %v7574_v33  ;;  %v7577_v7 = vadd.f32 %v6422_v5, %v4712_v45 }
 0x9bc   : > { %6531 = vst [vmem:[%s9386_s12 + $0x50] sm:$0xff] %v7428_v44  ;;  %v7432_v11 = vpack.c.bf16 %v7569_v3, %v7568_v13 }
 0x9bd   : > { %6532 = vst [vmem:[%s9386_s12 + $0x58] sm:$0xff] %v7429_v6  ;;  %v7433_v14 = vpack.c.bf16 %v7577_v7, %v7576_v40 }
 0x9be   : > { %6535 = vst [vmem:[%s9386_s12 + $0x70] sm:$0xff] %v7432_v11 }
 0x9bf   : > { %6536 = vst [vmem:[%s9386_s12 + $0x78] sm:$0xff] %v7433_v14 }
 0x9c0 PF: > { %s32_s27 = sadd.s32 1, %s8594_s27  }
 0x9c1   : > { %p29_p3 = scmp.ge.s32.totalorder %s32_s27, 4  }
 0x9c3   :  { %31 = sbr.rel (!%p29_p3) target bundleno = 12 (0xc), region = 147 }
 0x9ca   :  { %6578 = vsyncpa [#allocation3], 1 }
 0x9cb   :  { %6580 = vsyncpa [#allocation3 + $0x1], 1 }
 0x9cc   :  { %6581 = vsyncpa [#allocation5], 1 }
 0x9cd   :  { %6582 = vsyncpa [#allocation8], 1 }

</bundles_post_ra>
